<compile_context>
chip_gen: v7x
topology: tpu7x:2x2x1
jax: 0.10.0
libtpu: 0.0.40
codegen_flags: <defaults>
</compile_context>

<pallas_src>
import functools

import numpy as np
import jax
import jax.numpy as jnp
from jax import lax
from jax.experimental import pallas as pl
from jax.experimental.pallas import tpu as pltpu


# -------- synthetic `args` (shapes implied by fc1(100,1) and view(-1,4*5*5)) --------
class Args:
    input_channel_1 = 1
    output_channel_1 = 4
    input_channel_2 = 4     # must equal output_channel_1
    output_channel_2 = 4    # 4 * 5 * 5 = 100 -> fc1(100, 1)
    dropout = 0.25


args = Args()

# Spatial pipeline implied by fc1(100, 1):
#   180 --conv(3,s3)--> 60 --pool2--> 30 --conv(3,s3)--> 10 --pool2--> 5
S0 = 180
C1O = args.output_channel_1
C2I = args.input_channel_2
C2O = args.output_channel_2


# ---------------------------- fused Pallas kernel ----------------------------
def make_fused_kernel(bt):
    """bt = samples per grid step (block batch), bt % 8 == 0."""

    def kernel(x_ref, drop_ref, k1_ref, b1_ref, k2_ref, b2_ref,
               wf_ref, g2_ref, bfc_ref, o_ref, h1_scr):
        f32 = jnp.float32

        # ---- stage 1: conv1(3,s3) + bias + ReLU + 2x2 maxpool, ONE bf16 dot ----
        # x block (bt*30, 1080): row = (sample, oh-pair), cols = 6 image rows.
        # K1 cols = [oh-parity(2) | ow-parity(2) | c1(4) x 32] -> 512.
        y1 = jnp.dot(x_ref[...], k1_ref[...], preferred_element_type=f32)   # (bt*30, 512)
        m1 = jnp.maximum(jnp.maximum(y1[:, 0:128], y1[:, 128:256]),
                         jnp.maximum(y1[:, 256:384], y1[:, 384:512]))
        # bias is constant over each pool window -> add once after the max.
        h1_scr[...] = jnp.maximum(m1 + b1_ref[...], 0.0)   # (bt*30, 128) [c1*32 + ow1]

        # ---- stage 2: conv2(3,s3) + bias + dropout + 2x2 maxpool + ReLU ----
        # Gather the 6 pooled-conv1 rows feeding each pooled conv2 row with
        # strided sublane loads (replaces the old S2/P/Q selection matmuls),
        # then ONE K=768 bf16 dot with the kh/ow/oh-pool structure folded in K2.
        parts = [h1_scr[pl.ds(off, bt * 5, stride=6), :] for off in range(6)]
        lhs2 = jnp.concatenate(parts, axis=1)                                # (bt*5, 768)
        y2 = jnp.dot(lhs2.astype(jnp.bfloat16), k2_ref[...],
                     preferred_element_type=f32)                             # (bt*5, 512)
        y2 = (y2 + b2_ref[...]) * drop_ref[...]            # bias + dropout (before pool)
        m2 = jnp.maximum(jnp.maximum(y2[:, 0:128], y2[:, 128:256]),
                         jnp.maximum(y2[:, 256:384], y2[:, 384:512]))
        h2p = jnp.maximum(m2, 0.0)                         # (bt*5, 128) [c2*32 + ow]

        # ---- stage 3: fc1 (torch NCHW flatten folded into wf layout) + sigmoid ----
        z = h2p * wf_ref[...]                                    # (bt*5, 128)
        r = jnp.dot(g2_ref[...], z, preferred_element_type=f32)  # (bt, 128) per-sample sums
        s = jnp.sum(r, axis=1, keepdims=True) + bfc_ref[...]     # (bt, 1)
        o_ref[...] = 1.0 / (1.0 + jnp.exp(-s))

    return kernel


# ---------------------------- host-side parameter prep ----------------------------
def prepare_params(w1, b1, w2, b2, wf, bf, block_b):
    """Build the block-structured conv weights (pooling + kh folded in), padded
    biases, flatten-folded fc weight pattern and the per-sample-sum selector."""
    w1 = np.asarray(w1, np.float32); b1 = np.asarray(b1, np.float32)
    w2 = np.asarray(w2, np.float32); b2 = np.asarray(b2, np.float32)
    wf = np.asarray(wf, np.float32); bf = np.asarray(bf, np.float32)

    # conv1 + pool1: x row j holds image rows 6j..6j+5 (1080 cols).
    # output col = ohp*256 + owp*128 + c*32 + q  (oh = 2j+ohp, ow = 2q+owp)
    K1 = np.zeros((6 * S0, 512), np.float32)
    for ohp in range(2):
        for owp in range(2):
            for c in range(C1O):
                for q in range(30):
                    for kh in range(3):
                        for kw in range(3):
                            row = (3 * ohp + kh) * S0 + 6 * q + 3 * owp + kw
                            col = ohp * 256 + owp * 128 + c * 32 + q
                            K1[row, col] = w1[c, 0, kh, kw]
    B1 = np.repeat(b1, 32)[None, :]                       # (1, 128)

    # conv2 + pool2: lhs2 col = off*128 + c1*32 + ow1  (off = row offset 0..5)
    # output col = ohp*256 + owp*128 + c2*32 + m  (oh2 = 2n+ohp, ow2 = 2m+owp)
    K2 = np.zeros((6 * 128, 512), np.float32)
    for ohp in range(2):
        for owp in range(2):
            for c2 in range(C2O):
                for m in range(5):
                    for c1 in range(C2I):
                        for kh in range(3):
                            for kw in range(3):
                                row = (3 * ohp + kh) * 128 + c1 * 32 + 6 * m + 3 * owp + kw
                                col = ohp * 256 + owp * 128 + c2 * 32 + m
                                K2[row, col] = w2[c2, c1, kh, kw]
    B2 = np.tile(np.repeat(b2, 32), 4)[None, :]           # (1, 512)

    # fc1: torch NCHW flatten index c2*25 + n*5 + m mapped onto the kernel's
    # [row = (sample, n), col = c2*32 + m] activation layout (padding cols = 0).
    WF5 = np.zeros((5, 128), np.float32)
    for n in range(5):
        for c2 in range(C2O):
            for m in range(5):
                WF5[n, c2 * 32 + m] = wf[0, c2 * 25 + n * 5 + m]
    WF = np.tile(WF5, (block_b, 1))                        # (block_b*5, 128)

    # per-sample sum over the 5 pooled rows (tiny 0/1 matmul, bt x bt*5)
    G2 = np.repeat(np.eye(block_b, dtype=np.float32), 5, axis=1)
    BF = bf.reshape(1, 1)

    return dict(
        K1=jnp.asarray(K1, jnp.bfloat16), B1=jnp.asarray(B1),
        K2=jnp.asarray(K2, jnp.bfloat16), B2=jnp.asarray(B2),
        WF=jnp.asarray(WF), G2=jnp.asarray(G2), BF=jnp.asarray(BF))


# ---------------------------- forward (single pallas_call) ----------------------------
@functools.partial(jax.jit, static_argnames=("block_b",))
def model_cnn_forward(x, dropscale, prep, block_b=16):
    B = x.shape[0]
    assert B % block_b == 0 and block_b % 8 == 0
    bb = block_b

    # free, contiguous reshape: row = (sample, oh-pair), cols = 6 image rows
    xr = x.reshape(B * 30, 6 * S0).astype(jnp.bfloat16)

    def full2d(a):
        return pl.BlockSpec(a.shape, lambda i: (0, 0))

    in_specs = [
        pl.BlockSpec((bb * 30, 6 * S0), lambda i: (i, 0)),   # x block
        pl.BlockSpec((bb * 5, 512), lambda i: (i, 0)),       # dropout keep/(1-p) scale
        full2d(prep["K1"]), full2d(prep["B1"]),
        full2d(prep["K2"]), full2d(prep["B2"]),
        full2d(prep["WF"]), full2d(prep["G2"]), full2d(prep["BF"]),
    ]

    out = pl.pallas_call(
        make_fused_kernel(bb),
        out_shape=jax.ShapeDtypeStruct((B, 1), jnp.float32),
        grid=(B // bb,),
        in_specs=in_specs,
        out_specs=pl.BlockSpec((bb, 1), lambda i: (i, 0)),
        scratch_shapes=[pltpu.VMEM((bb * 30, 128), jnp.float32)],
        compiler_params=pltpu.CompilerParams(dimension_semantics=("parallel",)),
    )(xr, dropscale, prep["K1"], prep["B1"], prep["K2"], prep["B2"],
      prep["WF"], prep["G2"], prep["BF"])
    return out


# ---------------------------- pure-JAX (f32) reference ----------------------------
def forward_reference(x, w1, b1, w2, b2, wf, bf, drop):
    B = x.shape[0]
    dn = ("NCHW", "OIHW", "NCHW")
    y1 = lax.conv_general_dilated(x[:, None, :, :], w1, (3, 3), "VALID",
                                  dimension_numbers=dn)
    y1 = jnp.maximum(y1 + b1[None, :, None, None], 0.0)                 # (B,4,60,60)
    y1 = y1.reshape(B, C1O, 30, 2, 30, 2).max(axis=(3, 5))              # (B,4,30,30)
    y2 = lax.conv_general_dilated(y1, w2, (3, 3), "VALID",
                                  dimension_numbers=dn)
    y2 = y2 + b2[None, :, None, None]                                   # (B,4,10,10)
    # same dropout values the kernel used, mapped from its layout back to NCHW
    mask = drop.reshape(B, 5, 2, 2, C2O, 32)[:, :, :, :, :, :5]
    mask = mask.transpose(0, 4, 1, 2, 5, 3).reshape(B, C2O, 10, 10)
    y2 = y2 * mask
    y2 = jnp.maximum(y2.reshape(B, C2O, 5, 2, 5, 2).max(axis=(3, 5)), 0.0)
    flat = y2.reshape(B, C2O * 25)                                      # torch NCHW flatten
    return jax.nn.sigmoid(flat @ wf.T + bf)


if __name__ == "__main__":
    key = jax.random.PRNGKey(0)
    kx, kw1, kb1, kw2, kb2, kwf, kbf, kd = jax.random.split(key, 8)

    B, BB = 32, 16        # 2 grid steps -> both v7x TensorCores busy; serial on v5e/v6e

    # 180 is the minimum spatial size consistent with conv(3,s3)->pool2->conv(3,s3)
    # ->pool2 producing the 4*5*5 = 100 features consumed by fc1.
    x = jax.random.normal(kx, (B, S0, S0), jnp.float32)
    w1 = jax.random.normal(kw1, (C1O, args.input_channel_1, 3, 3), jnp.float32) * 0.2
    b1 = jax.random.normal(kb1, (C1O,), jnp.float32) * 0.1
    w2 = jax.random.normal(kw2, (C2O, C2I, 3, 3), jnp.float32) * 0.2
    b2 = jax.random.normal(kb2, (C2O,), jnp.float32) * 0.1
    wf = jax.random.normal(kwf, (1, 100), jnp.float32) * 0.1
    bf = jax.random.normal(kbf, (1,), jnp.float32) * 0.1

    # F.dropout(p=0.25) in training mode: i.i.d. keep mask scaled by 1/(1-p),
    # generated host-side directly in the kernel's conv2-output layout
    # (rows = (sample, pooled-oh), cols = [oh-par | ow-par | c2 | ow]).
    p = args.dropout
    keep = jax.random.bernoulli(kd, 1.0 - p, (B * 5, 512))
    dropscale = keep.astype(jnp.float32) / (1.0 - p)

    prep = prepare_params(w1, b1, w2, b2, wf, bf, BB)
    out = jax.block_until_ready(model_cnn_forward(x, dropscale, prep, block_b=BB))

    ref = jax.block_until_ready(forward_reference(x, w1, b1, w2, b2, wf, bf, dropscale))
    assert out.shape == (B, 1) and out.dtype == jnp.float32
    # kernel uses bf16 MXU operands (f32 accumulate); reference is pure f32
    assert bool(jnp.allclose(out, ref, atol=2e-2, rtol=2e-2)), (out, ref)
    print("KERNEL_OK")
</pallas_src>

<mosaic_0001>
module attributes {stable_mosaic.version = 11 : i64} {
  func.func @kernel(%arg0: i32, %arg1: memref<480x1080xbf16, #tpu.memory_space<vmem>>, %arg2: memref<80x512xf32, #tpu.memory_space<vmem>>, %arg3: memref<1080x512xbf16, #tpu.memory_space<vmem>>, %arg4: memref<1x128xf32, #tpu.memory_space<vmem>>, %arg5: memref<768x512xbf16, #tpu.memory_space<vmem>>, %arg6: memref<1x512xf32, #tpu.memory_space<vmem>>, %arg7: memref<80x128xf32, #tpu.memory_space<vmem>>, %arg8: memref<16x80xf32, #tpu.memory_space<vmem>>, %arg9: memref<1x1xf32, #tpu.memory_space<vmem>>, %arg10: memref<16x1xf32, #tpu.memory_space<vmem>>, %arg11: memref<480x128xf32, #tpu.memory_space<vmem>>) attributes {dimension_semantics = [#tpu.dimension_semantics<parallel>], iteration_bounds = array<i64: 2>, scalar_prefetch = 0 : i64, scratch_operands = 1 : i64, tpu.core_type = #tpu.core_type<tc>, window_params = [{transform_indices = @transform_0, window_bounds = array<i64: 480, 1080>}, {transform_indices = @transform_1, window_bounds = array<i64: 80, 512>}, {pipeline_mode = #tpu.pipeline_mode<synchronous>, transform_indices = @transform_2, window_bounds = array<i64: 1080, 512>}, {pipeline_mode = #tpu.pipeline_mode<synchronous>, transform_indices = @transform_3, window_bounds = array<i64: 1, 128>}, {pipeline_mode = #tpu.pipeline_mode<synchronous>, transform_indices = @transform_4, window_bounds = array<i64: 768, 512>}, {pipeline_mode = #tpu.pipeline_mode<synchronous>, transform_indices = @transform_5, window_bounds = array<i64: 1, 512>}, {pipeline_mode = #tpu.pipeline_mode<synchronous>, transform_indices = @transform_6, window_bounds = array<i64: 80, 128>}, {pipeline_mode = #tpu.pipeline_mode<synchronous>, transform_indices = @transform_7, window_bounds = array<i64: 16, 80>}, {pipeline_mode = #tpu.pipeline_mode<synchronous>, transform_indices = @transform_8, window_bounds = array<i64: 1, 1>}, {transform_indices = @transform_9, window_bounds = array<i64: 16, 1>}]} {
    %c0 = arith.constant 0 : index
    %c0_0 = arith.constant 0 : index
    %0 = vector.load %arg1[%c0, %c0_0] : memref<480x1080xbf16, #tpu.memory_space<vmem>>, vector<480x1080xbf16>
    %c0_1 = arith.constant 0 : index
    %c0_2 = arith.constant 0 : index
    %1 = vector.load %arg3[%c0_1, %c0_2] : memref<1080x512xbf16, #tpu.memory_space<vmem>>, vector<1080x512xbf16>
    %cst = arith.constant dense<0.000000e+00> : vector<480x512xf32>
    %2 = tpu.matmul %0, %1, %cst {dimension_numbers = #tpu.dot_dimension_numbers<[1], [0], [0], [1], [0, 0, 1, 1], [], []>} : vector<480x1080xbf16>, vector<1080x512xbf16>, vector<480x512xf32> -> vector<480x512xf32>
    %3 = vector.extract_strided_slice %2 {offsets = [0, 0], sizes = [480, 128], strides = [1, 1]} : vector<480x512xf32> to vector<480x128xf32>
    %4 = vector.extract_strided_slice %2 {offsets = [0, 128], sizes = [480, 128], strides = [1, 1]} : vector<480x512xf32> to vector<480x128xf32>
    %5 = arith.maximumf %3, %4 : vector<480x128xf32>
    %6 = vector.extract_strided_slice %2 {offsets = [0, 256], sizes = [480, 128], strides = [1, 1]} : vector<480x512xf32> to vector<480x128xf32>
    %7 = vector.extract_strided_slice %2 {offsets = [0, 384], sizes = [480, 128], strides = [1, 1]} : vector<480x512xf32> to vector<480x128xf32>
    %8 = arith.maximumf %6, %7 : vector<480x128xf32>
    %9 = arith.maximumf %5, %8 : vector<480x128xf32>
    %c0_3 = arith.constant 0 : index
    %c0_4 = arith.constant 0 : index
    %10 = vector.load %arg4[%c0_3, %c0_4] : memref<1x128xf32, #tpu.memory_space<vmem>>, vector<1x128xf32>
    %11 = vector.broadcast %10 : vector<1x128xf32> to vector<480x128xf32>
    %12 = arith.addf %9, %11 : vector<480x128xf32>
    %cst_5 = arith.constant 0.000000e+00 : f32
    %13 = vector.broadcast %cst_5 : f32 to vector<480x128xf32>
    %14 = arith.maximumf %12, %13 : vector<480x128xf32>
    %c0_6 = arith.constant 0 : index
    %c0_7 = arith.constant 0 : index
    %15 = vector.load %arg11[%c0_6, %c0_7] : memref<480x128xf32, #tpu.memory_space<vmem>>, vector<480x128xf32>
    tpu.vector_store %arg11[%c0_6, %c0_7], %14 {strides = array<i32>} : memref<480x128xf32, #tpu.memory_space<vmem>>, vector<480x128xf32>,
    %c0_8 = arith.constant 0 : index
    %c0_9 = arith.constant 0 : index
    %16 = tpu.strided_load %arg11[%c0_8, %c0_9] {strides = array<i32: 6, 1>} : memref<480x128xf32, #tpu.memory_space<vmem>>, vector<80x128xf32>
    %c1 = arith.constant 1 : index
    %c0_10 = arith.constant 0 : index
    %17 = tpu.strided_load %arg11[%c1, %c0_10] {strides = array<i32: 6, 1>} : memref<480x128xf32, #tpu.memory_space<vmem>>, vector<80x128xf32>
    %c2 = arith.constant 2 : index
    %c0_11 = arith.constant 0 : index
    %18 = tpu.strided_load %arg11[%c2, %c0_11] {strides = array<i32: 6, 1>} : memref<480x128xf32, #tpu.memory_space<vmem>>, vector<80x128xf32>
    %c3 = arith.constant 3 : index
    %c0_12 = arith.constant 0 : index
    %19 = tpu.strided_load %arg11[%c3, %c0_12] {strides = array<i32: 6, 1>} : memref<480x128xf32, #tpu.memory_space<vmem>>, vector<80x128xf32>
    %c4 = arith.constant 4 : index
    %c0_13 = arith.constant 0 : index
    %20 = tpu.strided_load %arg11[%c4, %c0_13] {strides = array<i32: 6, 1>} : memref<480x128xf32, #tpu.memory_space<vmem>>, vector<80x128xf32>
    %c5 = arith.constant 5 : index
    %c0_14 = arith.constant 0 : index
    %21 = tpu.strided_load %arg11[%c5, %c0_14] {strides = array<i32: 6, 1>} : memref<480x128xf32, #tpu.memory_space<vmem>>, vector<80x128xf32>
    %22 = tpu.concatenate %16, %17, %18, %19, %20, %21 in 1 : vector<80x128xf32>, vector<80x128xf32>, vector<80x128xf32>, vector<80x128xf32>, vector<80x128xf32>, vector<80x128xf32> -> vector<80x768xf32>
    %23 = arith.truncf %22 : vector<80x768xf32> to vector<80x768xbf16>
    %c0_15 = arith.constant 0 : index
    %c0_16 = arith.constant 0 : index
    %24 = vector.load %arg5[%c0_15, %c0_16] : memref<768x512xbf16, #tpu.memory_space<vmem>>, vector<768x512xbf16>
    %cst_17 = arith.constant dense<0.000000e+00> : vector<80x512xf32>
    %25 = tpu.matmul %23, %24, %cst_17 {dimension_numbers = #tpu.dot_dimension_numbers<[1], [0], [0], [1], [0, 0, 1, 1], [], []>} : vector<80x768xbf16>, vector<768x512xbf16>, vector<80x512xf32> -> vector<80x512xf32>
    %c0_18 = arith.constant 0 : index
    %c0_19 = arith.constant 0 : index
    %26 = vector.load %arg6[%c0_18, %c0_19] : memref<1x512xf32, #tpu.memory_space<vmem>>, vector<1x512xf32>
    %27 = vector.broadcast %26 : vector<1x512xf32> to vector<80x512xf32>
    %28 = arith.addf %25, %27 : vector<80x512xf32>
    %c0_20 = arith.constant 0 : index
    %c0_21 = arith.constant 0 : index
    %29 = vector.load %arg2[%c0_20, %c0_21] : memref<80x512xf32, #tpu.memory_space<vmem>>, vector<80x512xf32>
    %30 = arith.mulf %28, %29 : vector<80x512xf32>
    %31 = vector.extract_strided_slice %30 {offsets = [0, 0], sizes = [80, 128], strides = [1, 1]} : vector<80x512xf32> to vector<80x128xf32>
    %32 = vector.extract_strided_slice %30 {offsets = [0, 128], sizes = [80, 128], strides = [1, 1]} : vector<80x512xf32> to vector<80x128xf32>
    %33 = arith.maximumf %31, %32 : vector<80x128xf32>
    %34 = vector.extract_strided_slice %30 {offsets = [0, 256], sizes = [80, 128], strides = [1, 1]} : vector<80x512xf32> to vector<80x128xf32>
    %35 = vector.extract_strided_slice %30 {offsets = [0, 384], sizes = [80, 128], strides = [1, 1]} : vector<80x512xf32> to vector<80x128xf32>
    %36 = arith.maximumf %34, %35 : vector<80x128xf32>
    %37 = arith.maximumf %33, %36 : vector<80x128xf32>
    %cst_22 = arith.constant 0.000000e+00 : f32
    %38 = vector.broadcast %cst_22 : f32 to vector<80x128xf32>
    %39 = arith.maximumf %37, %38 : vector<80x128xf32>
    %c0_23 = arith.constant 0 : index
    %c0_24 = arith.constant 0 : index
    %40 = vector.load %arg7[%c0_23, %c0_24] : memref<80x128xf32, #tpu.memory_space<vmem>>, vector<80x128xf32>
    %41 = arith.mulf %39, %40 : vector<80x128xf32>
    %c0_25 = arith.constant 0 : index
    %c0_26 = arith.constant 0 : index
    %42 = vector.load %arg8[%c0_25, %c0_26] : memref<16x80xf32, #tpu.memory_space<vmem>>, vector<16x80xf32>
    %cst_27 = arith.constant dense<0.000000e+00> : vector<16x128xf32>
    %43 = tpu.matmul %42, %41, %cst_27 {dimension_numbers = #tpu.dot_dimension_numbers<[1], [0], [0], [1], [0, 0, 1, 1], [], []>} : vector<16x80xf32>, vector<80x128xf32>, vector<16x128xf32> -> vector<16x128xf32>
    %cst_28 = arith.constant dense<0.000000e+00> : vector<16xf32>
    %44 = vector.multi_reduction <add>, %43, %cst_28 [1] : vector<16x128xf32> to vector<16xf32>
    %45 = vector.shape_cast %44 : vector<16xf32> to vector<16x1xf32>
    %c0_29 = arith.constant 0 : index
    %c0_30 = arith.constant 0 : index
    %46 = vector.load %arg9[%c0_29, %c0_30] : memref<1x1xf32, #tpu.memory_space<vmem>>, vector<1x1xf32>
    %47 = vector.broadcast %46 : vector<1x1xf32> to vector<16x1xf32>
    %48 = arith.addf %45, %47 : vector<16x1xf32>
    %cst_31 = arith.constant 0.000000e+00 : f32
    %49 = vector.broadcast %cst_31 : f32 to vector<16x1xf32>
    %50 = arith.subf %49, %48 : vector<16x1xf32>
    %51 = math.exp %50 : vector<16x1xf32>
    %cst_32 = arith.constant 1.000000e+00 : f32
    %52 = vector.broadcast %cst_32 : f32 to vector<16x1xf32>
    %53 = arith.addf %52, %51 : vector<16x1xf32>
    %cst_33 = arith.constant 1.000000e+00 : f32
    %54 = vector.broadcast %cst_33 : f32 to vector<16x1xf32>
    %55 = arith.divf %54, %53 : vector<16x1xf32>
    %c0_34 = arith.constant 0 : index
    %c0_35 = arith.constant 0 : index
    %56 = vector.load %arg10[%c0_34, %c0_35] : memref<16x1xf32, #tpu.memory_space<vmem>>, vector<16x1xf32>
    tpu.vector_store %arg10[%c0_34, %c0_35], %55 {strides = array<i32>} : memref<16x1xf32, #tpu.memory_space<vmem>>, vector<16x1xf32>,
    return
  }
  func.func @transform_0(%arg0: i32) -> (i32, i32) {
    %c0_i32 = arith.constant 0 : i32
    %c0_i32_0 = arith.constant 0 : i32
    return %arg0, %c0_i32 : i32, i32
  }
  func.func @transform_1(%arg0: i32) -> (i32, i32) {
    %c0_i32 = arith.constant 0 : i32
    %c0_i32_0 = arith.constant 0 : i32
    return %arg0, %c0_i32 : i32, i32
  }
  func.func @transform_2(%arg0: i32) -> (i32, i32) {
    %c0_i32 = arith.constant 0 : i32
    %c0_i32_0 = arith.constant 0 : i32
    %c0_i32_1 = arith.constant 0 : i32
    return %c0_i32, %c0_i32_0 : i32, i32
  }
  func.func @transform_3(%arg0: i32) -> (i32, i32) {
    %c0_i32 = arith.constant 0 : i32
    %c0_i32_0 = arith.constant 0 : i32
    %c0_i32_1 = arith.constant 0 : i32
    return %c0_i32, %c0_i32_0 : i32, i32
  }
  func.func @transform_4(%arg0: i32) -> (i32, i32) {
    %c0_i32 = arith.constant 0 : i32
    %c0_i32_0 = arith.constant 0 : i32
    %c0_i32_1 = arith.constant 0 : i32
    return %c0_i32, %c0_i32_0 : i32, i32
  }
  func.func @transform_5(%arg0: i32) -> (i32, i32) {
    %c0_i32 = arith.constant 0 : i32
    %c0_i32_0 = arith.constant 0 : i32
    %c0_i32_1 = arith.constant 0 : i32
    return %c0_i32, %c0_i32_0 : i32, i32
  }
  func.func @transform_6(%arg0: i32) -> (i32, i32) {
    %c0_i32 = arith.constant 0 : i32
    %c0_i32_0 = arith.constant 0 : i32
    %c0_i32_1 = arith.constant 0 : i32
    return %c0_i32, %c0_i32_0 : i32, i32
  }
  func.func @transform_7(%arg0: i32) -> (i32, i32) {
    %c0_i32 = arith.constant 0 : i32
    %c0_i32_0 = arith.constant 0 : i32
    %c0_i32_1 = arith.constant 0 : i32
    return %c0_i32, %c0_i32_0 : i32, i32
  }
  func.func @transform_8(%arg0: i32) -> (i32, i32) {
    %c0_i32 = arith.constant 0 : i32
    %c0_i32_0 = arith.constant 0 : i32
    %c0_i32_1 = arith.constant 0 : i32
    return %c0_i32, %c0_i32_0 : i32, i32
  }
  func.func @transform_9(%arg0: i32) -> (i32, i32) {
    %c0_i32 = arith.constant 0 : i32
    %c0_i32_0 = arith.constant 0 : i32
    return %arg0, %c0_i32 : i32, i32
  }
}

</mosaic_0001>

<bundles_post_ra>
// kernel: model_cnn_forward.1
= control target key start
LH: loop header
LB: loop body
LE: loop exit
PB: predicated region body
PF: predicated region fallthrough
CT: control target
= control target key end

     0   :  { %s12692_s11 = smov 0   ;;  %s14696_s0 = inlined_call_operand.vmem [shape: bf16[960,1080], index: 0, kind: input, shape index: {}]   ;;  %s14697_s1 = inlined_call_operand.vmem [shape: f32[160,512], index: 1, kind: input, shape index: {}]   ;;  %s14698_s2 = inlined_call_operand.vmem [shape: bf16[1080,512], index: 2, kind: input, shape index: {}]   ;;  %s14699_s3 = inlined_call_operand.vmem [shape: f32[1,128], index: 3, kind: input, shape index: {}]   ;;  %s14700_s4 = inlined_call_operand.vmem [shape: bf16[768,512], index: 4, kind: input, shape index: {}]   ;;  %s14701_s5 = inlined_call_operand.vmem [shape: f32[1,512], index: 5, kind: input, shape index: {}]   ;;  %s14702_s6 = inlined_call_operand.vmem [shape: f32[80,128], index: 6, kind: input, shape index: {}]   ;;  %s14703_s7 = inlined_call_operand.vmem [shape: f32[16,80], index: 7, kind: input, shape index: {}]   ;;  %s14704_s8 = inlined_call_operand.<no memory space> [shape: f32[1,1], index: 8, kind: input, shape index: {}]   ;;  %s14705_s9 = inlined_call_operand.vmem [shape: f32[32,1], index: 9, kind: output, shape index: {}]  }
   0x1   :  { %v14_v0 = vstv %s14704_s8 }
   0x2   :  { %15 = vst [vmem:[#allocation3] sm:$0x1] %v14_v0 }
   0x3 LB: > { %s12698_s12 = sadd.s32 4294967295, %s12636_s11   ;;  %p9583_p0 = scmp.ge.s32.totalorder %s12636_s11, 1  ;;  %s12636_s11 = sphi %s12692_s11, %s21_s11  }
   0x4   : > { %p303_p1 = scmp.lt.s32.totalorder %s12636_s11, 3 }
   0x6   : > { %p304_p2 = pnand %p9583_p0, %p303_p1 }
   0x7   : > { %v11537_v1 = vld [vmem:[%s14698_s2 + $0x4] ss:$16 sps:$4 sm:$0xff] (!%p304_p2)   ;;  %v11539_v2 = vld [vmem:[%s14698_s2 + $0xc] ss:$16 sps:$4 sm:$0xff] (!%p304_p2)   ;;  %v11541_v3 = vld [vmem:[%s14698_s2] ss:$16 sps:$4 sm:$0xff] (!%p304_p2)  }
   0x8   : > { %307 = sbr.rel (%p304_p2) target bundleno = 2226 (0x8b2), region = 56  ;;  %3741 = vmatprep.subr.bf16.mxu0 (!%p304_p2), %v11537_v1  ;;  %v11542_v4 = vld [vmem:[%s14698_s2 + $0x8] ss:$16 sps:$4 sm:$0xff] (!%p304_p2)   ;;  %5406 = vmatprep.subr.bf16.mxu1 (!%p304_p2), %v11539_v2  ;;  %v11543_v5 = vld [vmem:[%s14698_s2 + $0x24] ss:$16 sps:$4 sm:$0xff] (!%p304_p2)   ;;  %vm3728_vm0 = vcmask (!%p304_p2), 1043456  }
   0x9   : > { %3742 = vmatpush1.bf16.msra.mxu0 (!%p304_p2), %v11541_v3  ;;  %5407 = vmatpush1.bf16.msra.mxu1 (!%p304_p2), %v11542_v4  ;;  %v11545_v6 = vld [vmem:[%s14698_s2 + $0x2c] ss:$16 sps:$4 sm:$0xff] (!%p304_p2)   ;;  %v11547_v7 = vld [vmem:[%s14698_s2 + $0x20] ss:$16 sps:$4 sm:$0xff] (!%p304_p2)   ;;  %v11548_v8 = vld [vmem:[%s14698_s2 + $0x28] ss:$16 sps:$4 sm:$0xff] (!%p304_p2)  }
   0xa   : > { %3743 = vmatprep.subr.bf16.mxu0 (!%p304_p2), %v11543_v5  ;;  %5408 = vmatprep.subr.bf16.mxu1 (!%p304_p2), %v11545_v6  ;;  %v11549_v9 = vld [vmem:[%s14698_s2 + $0x44] ss:$16 sps:$4 sm:$0xff] (!%p304_p2)   ;;  %v11551_v10 = vld [vmem:[%s14698_s2 + $0x4c] ss:$16 sps:$4 sm:$0xff] (!%p304_p2)   ;;  %v11553_v11 = vld [vmem:[%s14698_s2 + $0x40] ss:$16 sps:$4 sm:$0xff] (!%p304_p2)  }
   0xb   : > { %v11554_v12 = vld [vmem:[%s14698_s2 + $0x48] ss:$16 sps:$4 sm:$0xff] (!%p304_p2)   ;;  %v11555_v13 = vld [vmem:[%s14698_s2 + $0x64] ss:$16 sps:$4 sm:$0xff] (!%p304_p2)   ;;  %v11557_v14 = vld [vmem:[%s14698_s2 + $0x6c] ss:$16 sps:$4 sm:$0xff] (!%p304_p2)  }
   0xc   : > { %v11559_v15 = vld [vmem:[%s14698_s2 + $0x60] ss:$16 sps:$4 sm:$0xff] (!%p304_p2)   ;;  %v11560_v16 = vld [vmem:[%s14698_s2 + $0x68] ss:$16 sps:$4 sm:$0xff] (!%p304_p2)   ;;  %v11561_v17 = vld [vmem:[%s14698_s2 + $0x84] ss:$16 sps:$4 sm:$0xff] (!%p304_p2)  }
   0xd   : > { %3744 = vmatpush1.bf16.msra.mxu0 (!%p304_p2), %v11547_v7  ;;  %5409 = vmatpush1.bf16.msra.mxu1 (!%p304_p2), %v11548_v8  ;;  %v11563_v18 = vld [vmem:[%s14698_s2 + $0x8c] ss:$16 sps:$4 sm:$0xff] (!%p304_p2)   ;;  %v11565_v19 = vld [vmem:[%s14698_s2 + $0x80] ss:$16 sps:$4 sm:$0xff] (!%p304_p2)   ;;  %v11566_v20 = vld [vmem:[%s14698_s2 + $0x88] ss:$16 sps:$4 sm:$0xff] (!%p304_p2)  }
   0xe   : > { %3745 = vmatprep.subr.bf16.mxu0 (!%p304_p2), %v11549_v9  ;;  %5410 = vmatprep.subr.bf16.mxu1 (!%p304_p2), %v11551_v10  ;;  %v11567_v21 = vld [vmem:[%s14698_s2 + $0xa4] ss:$16 sps:$4 sm:$0xff] (!%p304_p2)   ;;  %v11569_v22 = vld [vmem:[%s14698_s2 + $0xac] ss:$16 sps:$4 sm:$0xff] (!%p304_p2)   ;;  %v11571_v23 = vld [vmem:[%s14698_s2 + $0xa0] ss:$16 sps:$4 sm:$0xff] (!%p304_p2)  }
   0xf   : > { %v11572_v24 = vld [vmem:[%s14698_s2 + $0xa8] ss:$16 sps:$4 sm:$0xff]   ;;  %v11573_v25 = vld [vmem:[%s14698_s2 + $0xc4] ss:$16 sps:$4 sm:$0xff]   ;;  %v11575_v26 = vld [vmem:[%s14698_s2 + $0xcc] ss:$16 sps:$4 sm:$0xff]  }
  0x10   : > { %v11577_v27 = vld [vmem:[%s14698_s2 + $0xc0] ss:$16 sps:$4 sm:$0xff]   ;;  %v11578_v28 = vld [vmem:[%s14698_s2 + $0xc8] ss:$16 sps:$4 sm:$0xff]   ;;  %v11579_v29 = vld [vmem:[%s14698_s2 + $0xe4] ss:$16 sps:$4 sm:$0xff]  }
  0x11   : > { %3746 = vmatpush1.bf16.msra.mxu0 %v11553_v11  ;;  %5411 = vmatpush1.bf16.msra.mxu1 %v11554_v12  ;;  %s346_s30 = smul.u32 60, %s12698_s12  ;;  %v11581_v30 = vld [vmem:[%s14698_s2 + $0xec] ss:$16 sps:$4 sm:$0xff]   ;;  %v11583_v31 = vld [vmem:[%s14698_s2 + $0xe0] ss:$16 sps:$4 sm:$0xff]   ;;  %vm3637_vm1 = vcmask 457728  }
  0x12   : > { %3747 = vmatprep.subr.bf16.mxu0 %v11555_v13  ;;  %5412 = vmatprep.subr.bf16.mxu1 %v11557_v14  ;;  %v11584_v32 = vld [vmem:[%s14698_s2 + $0xe8] ss:$16 sps:$4 sm:$0xff]   ;;  %v11585_v33 = vld [vmem:[%s14698_s2 + $0x104] ss:$16 sps:$4 sm:$0xff]   ;;  %v11587_v34 = vld [vmem:[%s14698_s2 + $0x10c] ss:$16 sps:$4 sm:$0xff]  }
  0x13   : > { %p347_p3 = scmp.lt.s32.totalorder %s346_s30, 119  ;;  %v11589_v35 = vld [vmem:[%s14698_s2 + $0x100] ss:$16 sps:$4 sm:$0xff]   ;;  %v11590_v36 = vld [vmem:[%s14698_s2 + $0x108] ss:$16 sps:$4 sm:$0xff]   ;;  %vm9401_vm2 = vcmask 654336  }
  0x14   : > { %v11591_v37 = vld [vmem:[%s14698_s2 + $0x124] ss:$16 sps:$4 sm:$0xff]   ;;  %v11593_v38 = vld [vmem:[%s14698_s2 + $0x12c] ss:$16 sps:$4 sm:$0xff]   ;;  %v11595_v39 = vld [vmem:[%s14698_s2 + $0x120] ss:$16 sps:$4 sm:$0xff]  }
  0x15   : > { %3748 = vmatpush1.bf16.msra.mxu0 %v11559_v15  ;;  %5413 = vmatpush1.bf16.msra.mxu1 %v11560_v16  ;;  %s14707_s30 = smov (!%p347_p3, %s346_s30), 119  ;;  %v11596_v40 = vld [vmem:[%s14698_s2 + $0x128] ss:$16 sps:$4 sm:$0xff]   ;;  %v11597_v41 = vld [vmem:[%s14698_s2 + $0x144] ss:$16 sps:$4 sm:$0xff]   ;;  %s9587_s25 = sshll.u32 %s12698_s12, 1 }
  0x16   : > { %3749 = vmatprep.subr.bf16.mxu0 %v11561_v17  ;;  %5414 = vmatprep.subr.bf16.mxu1 %v11563_v18  ;;  %s11527_s16 = smul.u32 36, %s14707_s30  ;;  %v11599_v42 = vld [vmem:[%s14698_s2 + $0x14c] ss:$16 sps:$4 sm:$0xff]   ;;  %v11601_v43 = vld [vmem:[%s14698_s2 + $0x140] ss:$16 sps:$4 sm:$0xff]   ;;  %p361_p5 = scmp.lt.s32.totalorder %s9587_s25, 3 }
  0x17   : > { %v11602_v44 = vld [vmem:[%s14698_s2 + $0x148] ss:$16 sps:$4 sm:$0xff]   ;;  %v11603_v45 = vld [vmem:[%s14698_s2 + $0x164] ss:$16 sps:$4 sm:$0xff]   ;;  %v11605_v46 = vld [vmem:[%s14698_s2 + $0x16c] ss:$16 sps:$4 sm:$0xff]  }
  0x18   : > { %s12841_s26 = scalar_lea.vmem %s14696_s0, %s11527_s16  ;;  %v11607_v47 = vld [vmem:[%s14698_s2 + $0x160] ss:$16 sps:$4 sm:$0xff]   ;;  %v11608_v48 = vld [vmem:[%s14698_s2 + $0x168] ss:$16 sps:$4 sm:$0xff]   ;;  %v11609_v50 = vld [vmem:[%s14698_s2 + $0x184] ss:$16 sps:$4 sm:$0xff]  }
  0x19   : > { %3750 = vmatpush1.bf16.msra.mxu0 %v11565_v19  ;;  %5415 = vmatpush1.bf16.msra.mxu1 %v11566_v20  ;;  %v11635_v49 = vld [vmem:[%s12841_s26 + $0x4] ss:$36 sps:$4 sm:$0xff]   ;;  %v11611_v51 = vld [vmem:[%s14698_s2 + $0x18c] ss:$16 sps:$4 sm:$0xff]   ;;  %v11613_v52 = vld [vmem:[%s14698_s2 + $0x180] ss:$16 sps:$4 sm:$0xff]  }
  0x1a   : > { %3751 = vmatprep.subr.bf16.mxu0 %v11567_v21  ;;  %5416 = vmatprep.subr.bf16.mxu1 %v11569_v22  ;;  %v11614_v53 = vld [vmem:[%s14698_s2 + $0x188] ss:$16 sps:$4 sm:$0xff]   ;;  %v11615_v54 = vld [vmem:[%s14698_s2 + $0x1a4] ss:$16 sps:$4 sm:$0xff]   ;;  %v11617_v55 = vld [vmem:[%s14698_s2 + $0x1ac] ss:$16 sps:$4 sm:$0xff]  }
  0x1b   : > { %3773 = vmatprep.mubr.bf16.mxu0 %v11635_v49  ;;  %5438 = vmatprep.mubr.bf16.mxu1 %v11635_v49  ;;  %v11619_v56 = vld [vmem:[%s14698_s2 + $0x1a0] ss:$16 sps:$4 sm:$0xff]   ;;  %v11620_v57 = vld [vmem:[%s14698_s2 + $0x1a8] ss:$16 sps:$4 sm:$0xff]   ;;  %v11621_v58 = vld [vmem:[%s14698_s2 + $0x1c4] ss:$16 sps:$4 sm:$0xff]  }
  0x1c   : > { %v11623_v59 = vld [vmem:[%s14698_s2 + $0x1cc] ss:$16 sps:$4 sm:$0xff]   ;;  %v11625_v60 = vld [vmem:[%s14698_s2 + $0x1c0] ss:$16 sps:$4 sm:$0xff]   ;;  %v11626_v61 = vld [vmem:[%s14698_s2 + $0x1c8] ss:$16 sps:$4 sm:$0xff]  }
  0x1d   : > { %3752 = vmatpush1.bf16.msra.mxu0 %v11571_v23  ;;  %5417 = vmatpush1.bf16.msra.mxu1 %v11572_v24  ;;  %v11627_v62 = vld [vmem:[%s14698_s2 + $0x1e4] ss:$16 sps:$4 sm:$0xff]   ;;  %v11629_v63 = vld [vmem:[%s14698_s2 + $0x1ec] ss:$16 sps:$4 sm:$0xff]   ;;  %v11631_v0 = vld [vmem:[%s14698_s2 + $0x1e0] ss:$16 sps:$4 sm:$0xff]  }
  0x1e   : > { %3753 = vmatprep.subr.bf16.mxu0 %v11573_v25  ;;  %5418 = vmatprep.subr.bf16.mxu1 %v11575_v26  ;;  %v11632_v1 = vld [vmem:[%s14698_s2 + $0x1e8] ss:$16 sps:$4 sm:$0xff]   ;;  %v11638_v2 = vld [vmem:[%s14698_s2 + $0x204] ss:$16 sps:$4 sm:$0xff]   ;;  %v11641_v3 = vld [vmem:[%s14698_s2 + $0x20c] ss:$16 sps:$4 sm:$0xff]  }
  0x1f   : > { %v11633_v4 = vld [vmem:[%s12841_s26] ss:$36 sps:$4 sm:$0xff]   ;;  %v11639_v6 = vld [vmem:[%s14698_s2 + $0x208] ss:$16 sps:$4 sm:$0xff]   ;;  %v11642_v7 = vld [vmem:[%s12841_s26 + $0x4c] ss:$36 sps:$4 sm:$0xff]  }
  0x20   : > { %v11636_v5 = vld [vmem:[%s14698_s2 + $0x200] ss:$16 sps:$4 sm:$0xff]   ;;  %v11650_v8 = vld [vmem:[%s14698_s2 + $0x224] ss:$16 sps:$4 sm:$0xff]   ;;  %v11653_v9 = vld [vmem:[%s14698_s2 + $0x22c] ss:$16 sps:$4 sm:$0xff]  }
  0x21   : > { %3754 = vmatpush1.bf16.msra.mxu0 %v11577_v27  ;;  %5419 = vmatpush1.bf16.msra.mxu1 %v11578_v28  ;;  %v11648_v10 = vld [vmem:[%s14698_s2 + $0x220] ss:$16 sps:$4 sm:$0xff]   ;;  %v11651_v11 = vld [vmem:[%s14698_s2 + $0x228] ss:$16 sps:$4 sm:$0xff]   ;;  %v11662_v12 = vld [vmem:[%s14698_s2 + $0x244] ss:$16 sps:$4 sm:$0xff]  }
  0x22   : > { %3755 = vmatprep.subr.bf16.mxu0 %v11579_v29  ;;  %5420 = vmatprep.subr.bf16.mxu1 %v11581_v30  ;;  %v11665_v13 = vld [vmem:[%s14698_s2 + $0x24c] ss:$16 sps:$4 sm:$0xff]   ;;  %v11645_v15 = vld [vmem:[%s12841_s26 + $0x94] ss:$36 sps:$4 sm:$0xff]   ;;  %v11660_v16 = vld [vmem:[%s14698_s2 + $0x240] ss:$16 sps:$4 sm:$0xff]  }
  0x23   : > { %v11644_v14 = vld [vmem:[%s12841_s26 + $0x48] ss:$36 sps:$4 sm:$0xff]   ;;  %v11674_v18 = vld [vmem:[%s14698_s2 + $0x264] ss:$16 sps:$4 sm:$0xff]   ;;  %v11672_v20 = vld [vmem:[%s14698_s2 + $0x260] ss:$16 sps:$4 sm:$0xff]  }
  0x24   : > { %v11663_v17 = vld [vmem:[%s14698_s2 + $0x248] ss:$16 sps:$4 sm:$0xff]   ;;  %v11677_v19 = vld [vmem:[%s14698_s2 + $0x26c] ss:$16 sps:$4 sm:$0xff]   ;;  %v11686_v22 = vld [vmem:[%s14698_s2 + $0x284] ss:$16 sps:$4 sm:$0xff]  }
  0x25   : > { %3756 = vmatpush1.bf16.msra.mxu0 %v11583_v31  ;;  %5421 = vmatpush1.bf16.msra.mxu1 %v11584_v32  ;;  %v11675_v21 = vld [vmem:[%s14698_s2 + $0x268] ss:$16 sps:$4 sm:$0xff]   ;;  %v11689_v23 = vld [vmem:[%s14698_s2 + $0x28c] ss:$16 sps:$4 sm:$0xff]   ;;  %v11647_v24 = vld [vmem:[%s12841_s26 + $0x90] ss:$36 sps:$4 sm:$0xff]  }
  0x26   : > { %3757 = vmatprep.subr.bf16.mxu0 %v11585_v33  ;;  %5422 = vmatprep.subr.bf16.mxu1 %v11587_v34  ;;  %v11654_v25 = vld [vmem:[%s12841_s26 + $0xdc] ss:$36 sps:$4 sm:$0xff]   ;;  %v11687_v27 = vld [vmem:[%s14698_s2 + $0x288] ss:$16 sps:$4 sm:$0xff]   ;;  %v11697_v28 = vld [vmem:[%s14698_s2 + $0x2a4] ss:$16 sps:$4 sm:$0xff]  }
  0x27   : > { %v11684_v26 = vld [vmem:[%s14698_s2 + $0x280] ss:$16 sps:$4 sm:$0xff]   ;;  %v11700_v29 = vld [vmem:[%s14698_s2 + $0x2ac] ss:$16 sps:$4 sm:$0xff]   ;;  %v11698_v31 = vld [vmem:[%s14698_s2 + $0x2a8] ss:$16 sps:$4 sm:$0xff]  }
  0x28   : > { %v11695_v30 = vld [vmem:[%s14698_s2 + $0x2a0] ss:$16 sps:$4 sm:$0xff]   ;;  %v11707_v32 = vld [vmem:[%s14698_s2 + $0x2c4] ss:$16 sps:$4 sm:$0xff]   ;;  %v11710_v33 = vld [vmem:[%s14698_s2 + $0x2cc] ss:$16 sps:$4 sm:$0xff]  }
  0x29   : > { %3758 = vmatpush1.bf16.msra.mxu0 %v11589_v35  ;;  %5423 = vmatpush1.bf16.msra.mxu1 %v11590_v36  ;;  %v11656_v34 = vld [vmem:[%s12841_s26 + $0xd8] ss:$36 sps:$4 sm:$0xff]   ;;  %v11657_v35 = vld [vmem:[%s12841_s26 + $0x124] ss:$36 sps:$4 sm:$0xff]   ;;  %v11705_v36 = vld [vmem:[%s14698_s2 + $0x2c0] ss:$16 sps:$4 sm:$0xff]  }
  0x2a   : > { %3759 = vmatprep.subr.bf16.mxu0 %v11591_v37  ;;  %5424 = vmatprep.subr.bf16.mxu1 %v11593_v38  ;;  %v11708_v37 = vld [vmem:[%s14698_s2 + $0x2c8] ss:$16 sps:$4 sm:$0xff]   ;;  %v11719_v38 = vld [vmem:[%s14698_s2 + $0x2e4] ss:$16 sps:$4 sm:$0xff]   ;;  %v11746_v49 = vld [vmem:[%s14698_s2 + $0x32c] ss:$16 sps:$4 sm:$0xff]  }
  0x2b   : > { %s14711_s25 = smov (!%p361_p5, %s9587_s25), 3  ;;  %vm9508_vm3 = vcmask 7168  }
  0x2c   : > { %s9588_s27 = sshll.u32 %s14711_s25, 3 }
  0x2d   : > { %3760 = vmatpush1.bf16.msra.mxu0 %v11595_v39  ;;  %5425 = vmatpush1.bf16.msra.mxu1 %v11596_v40  ;;  %v11722_v39 = vld [vmem:[%s14698_s2 + $0x2ec] ss:$16 sps:$4 sm:$0xff]   ;;  %v11717_v40 = vld [vmem:[%s14698_s2 + $0x2e0] ss:$16 sps:$4 sm:$0xff]   ;;  %s364_s10 = scalar_lea.vmem %s14705_s9, %s9588_s27 }
  0x2e   : > { %3761 = vmatprep.subr.bf16.mxu0 %v11597_v41  ;;  %5426 = vmatprep.subr.bf16.mxu1 %v11599_v42  ;;  %v11720_v41 = vld [vmem:[%s14698_s2 + $0x2e8] ss:$16 sps:$4 sm:$0xff]   ;;  %v11731_v42 = vld [vmem:[%s14698_s2 + $0x304] ss:$16 sps:$4 sm:$0xff]  }
  0x31   : > { %3762 = vmatpush1.bf16.msra.mxu0 %v11601_v43  ;;  %5427 = vmatpush1.bf16.msra.mxu1 %v11602_v44  ;;  %v11734_v43 = vld [vmem:[%s14698_s2 + $0x30c] ss:$16 sps:$4 sm:$0xff]   ;;  %v11659_v44 = vld [vmem:[%s12841_s26 + $0x120] ss:$36 sps:$4 sm:$0xff]  }
  0x32   : > { %3763 = vmatprep.subr.bf16.mxu0 %v11603_v45  ;;  %5428 = vmatprep.subr.bf16.mxu1 %v11605_v46  ;;  %v11666_v45 = vld [vmem:[%s12841_s26 + $0x16c] ss:$36 sps:$4 sm:$0xff]  }
  0x33   : > { %v11729_v46 = vld [vmem:[%s14698_s2 + $0x300] ss:$16 sps:$4 sm:$0xff]  }
  0x35   : > { %3764 = vmatpush1.bf16.msra.mxu0 %v11607_v47  ;;  %5429 = vmatpush1.bf16.msra.mxu1 %v11608_v48  ;;  %v11732_v47 = vld [vmem:[%s14698_s2 + $0x308] ss:$16 sps:$4 sm:$0xff]   ;;  %v11743_v48 = vld [vmem:[%s14698_s2 + $0x324] ss:$16 sps:$4 sm:$0xff]  }
  0x36   : > { %3765 = vmatprep.subr.bf16.mxu0 %v11609_v50  ;;  %5430 = vmatprep.subr.bf16.mxu1 %v11611_v51  ;;  %v11741_v50 = vld [vmem:[%s14698_s2 + $0x320] ss:$16 sps:$4 sm:$0xff]   ;;  %v11744_v51 = vld [vmem:[%s14698_s2 + $0x328] ss:$16 sps:$4 sm:$0xff]  }
  0x39   : > { %3766 = vmatpush1.bf16.msra.mxu0 %v11613_v52  ;;  %5431 = vmatpush1.bf16.msra.mxu1 %v11614_v53  ;;  %v11755_v52 = vld [vmem:[%s14698_s2 + $0x344] ss:$16 sps:$4 sm:$0xff]   ;;  %v11668_v53 = vld [vmem:[%s12841_s26 + $0x168] ss:$36 sps:$4 sm:$0xff]  }
  0x3a   : > { %3767 = vmatprep.subr.bf16.mxu0 %v11615_v54  ;;  %5432 = vmatprep.subr.bf16.mxu1 %v11617_v55  ;;  %v11758_v54 = vld [vmem:[%s14698_s2 + $0x34c] ss:$16 sps:$4 sm:$0xff]   ;;  %v11669_v55 = vld [vmem:[%s12841_s26 + $0x1b4] ss:$36 sps:$4 sm:$0xff]  }
  0x3d   : > { %3768 = vmatpush1.bf16.msra.mxu0 %v11619_v56  ;;  %5433 = vmatpush1.bf16.msra.mxu1 %v11620_v57  ;;  %v11753_v56 = vld [vmem:[%s14698_s2 + $0x340] ss:$16 sps:$4 sm:$0xff]   ;;  %v11756_v57 = vld [vmem:[%s14698_s2 + $0x348] ss:$16 sps:$4 sm:$0xff]  }
  0x3e   : > { %3769 = vmatprep.subr.bf16.mxu0 %v11621_v58  ;;  %5434 = vmatprep.subr.bf16.mxu1 %v11623_v59  ;;  %v11767_v58 = vld [vmem:[%s14698_s2 + $0x364] ss:$16 sps:$4 sm:$0xff]   ;;  %v11765_v59 = vld [vmem:[%s14698_s2 + $0x360] ss:$16 sps:$4 sm:$0xff]  }
  0x41   : > { %3770 = vmatpush1.bf16.msra.mxu0 %v11625_v60  ;;  %5435 = vmatpush1.bf16.msra.mxu1 %v11626_v61  ;;  %v11768_v60 = vld [vmem:[%s14698_s2 + $0x368] ss:$16 sps:$4 sm:$0xff]   ;;  %v11770_v61 = vld [vmem:[%s14698_s2 + $0x36c] ss:$16 sps:$4 sm:$0xff]  }
  0x42   : > { %3771 = vmatprep.subr.bf16.mxu0 %v11627_v62  ;;  %5436 = vmatprep.subr.bf16.mxu1 %v11629_v63  ;;  %v11671_v62 = vld [vmem:[%s12841_s26 + $0x1b0] ss:$36 sps:$4 sm:$0xff]   ;;  %v11678_v63 = vld [vmem:[%s12841_s26 + $0x1fc] ss:$36 sps:$4 sm:$0xff]  }
  0x45   : > { %3772 = vmatpush1.bf16.msra.mxu0 %v11631_v0  ;;  %5437 = vmatpush1.bf16.msra.mxu1 %v11632_v1  ;;  %v11680_v0 = vld [vmem:[%s12841_s26 + $0x1f8] ss:$36 sps:$4 sm:$0xff]   ;;  %v11681_v1 = vld [vmem:[%s12841_s26 + $0x244] ss:$36 sps:$4 sm:$0xff]  }
  0x46   : > { %4074 = vmatprep.subr.bf16.mxu0 %v11638_v2  ;;  %5739 = vmatprep.subr.bf16.mxu1 %v11641_v3  ;;  %v11777_v2 = vld [vmem:[%s14698_s2 + $0x380] ss:$16 sps:$4 sm:$0xff]   ;;  %v11779_v3 = vld [vmem:[%s14698_s2 + $0x384] ss:$16 sps:$4 sm:$0xff]  }
  0x48   : > { %3774 = vmatmul.mubr.bf16.vlgmr.msra.gmra.mrb[0].mxu0 %v11633_v4  ;;  %5439 = vmatmul.mubr.bf16.vlgmr.msra.gmra.mrb[0].mxu1 %v11633_v4  ;;  %v11780_v4 = vld [vmem:[%s14698_s2 + $0x388] ss:$16 sps:$4 sm:$0xff]  }
  0x49   : > { %4075 = vmatpush1.bf16.msra.mxu0 %v11636_v5  ;;  %5740 = vmatpush1.bf16.msra.mxu1 %v11639_v6  ;;  %v11782_v5 = vld [vmem:[%s14698_s2 + $0x38c] ss:$16 sps:$4 sm:$0xff]   ;;  %v11683_v6 = vld [vmem:[%s12841_s26 + $0x240] ss:$36 sps:$4 sm:$0xff]  }
  0x4a   : > { %3783 = vmatprep.mubr.bf16.mxu0 %v11642_v7  ;;  %5448 = vmatprep.mubr.bf16.mxu1 %v11642_v7  ;;  %v11690_v7 = vld [vmem:[%s12841_s26 + $0x28c] ss:$36 sps:$4 sm:$0xff]  }
  0x4b   : > { %4076 = vmatprep.subr.bf16.mxu0 %v11650_v8  ;;  %5741 = vmatprep.subr.bf16.mxu1 %v11653_v9  ;;  %v11788_v8 = vld [vmem:[%s14698_s2 + $0x3a0] ss:$16 sps:$4 sm:$0xff]   ;;  %v11790_v9 = vld [vmem:[%s14698_s2 + $0x3a4] ss:$16 sps:$4 sm:$0xff]  }
  0x4d   : > { %4077 = vmatpush1.bf16.msra.mxu0 %v11648_v10  ;;  %5742 = vmatpush1.bf16.msra.mxu1 %v11651_v11  ;;  %v11791_v10 = vld [vmem:[%s14698_s2 + $0x3a8] ss:$16 sps:$4 sm:$0xff]  }
  0x4e   : > { %4078 = vmatprep.subr.bf16.mxu0 %v11662_v12  ;;  %5743 = vmatprep.subr.bf16.mxu1 %v11665_v13  ;;  %v11692_v11 = vld [vmem:[%s12841_s26 + $0x288] ss:$36 sps:$4 sm:$0xff]   ;;  %v11693_v13 = vld [vmem:[%s12841_s26 + $0x2d4] ss:$36 sps:$4 sm:$0xff]  }
  0x4f   : > { %v11793_v12 = vld [vmem:[%s14698_s2 + $0x3ac] ss:$16 sps:$4 sm:$0xff]  }
  0x50   : > { %3784 = vmatmul.mubr.bf16.gmra.mrb[4].mxu0 %v11644_v14  ;;  %5449 = vmatmul.mubr.bf16.gmra.mrb[4].mxu1 %v11644_v14  ;;  %v11701_v14 = vld [vmem:[%s12841_s26 + $0x2d0] ss:$36 sps:$4 sm:$0xff]  }
  0x51   : > { %3793 = vmatprep.mubr.bf16.mxu0 %v11645_v15  ;;  %5458 = vmatprep.mubr.bf16.mxu1 %v11645_v15  ;;  %v11702_v15 = vld [vmem:[%s12841_s26 + $0x31c] ss:$36 sps:$4 sm:$0xff]  }
  0x52   : > { %4079 = vmatpush1.bf16.msra.mxu0 %v11660_v16  ;;  %5744 = vmatpush1.bf16.msra.mxu1 %v11663_v17  ;;  %v11798_v16 = vld [vmem:[%s14698_s2 + $0x3c0] ss:$16 sps:$4 sm:$0xff]   ;;  %v11800_v17 = vld [vmem:[%s14698_s2 + $0x3c4] ss:$16 sps:$4 sm:$0xff]  }
  0x53   : > { %4080 = vmatprep.subr.bf16.mxu0 %v11674_v18  ;;  %5745 = vmatprep.subr.bf16.mxu1 %v11677_v19  ;;  %v11801_v18 = vld [vmem:[%s14698_s2 + $0x3c8] ss:$16 sps:$4 sm:$0xff]   ;;  %v11803_v19 = vld [vmem:[%s14698_s2 + $0x3cc] ss:$16 sps:$4 sm:$0xff]  }
  0x56   : > { %4081 = vmatpush1.bf16.msra.mxu0 %v11672_v20  ;;  %5746 = vmatpush1.bf16.msra.mxu1 %v11675_v21  ;;  %v11704_v20 = vld [vmem:[%s12841_s26 + $0x318] ss:$36 sps:$4 sm:$0xff]   ;;  %v11711_v21 = vld [vmem:[%s12841_s26 + $0x364] ss:$36 sps:$4 sm:$0xff]  }
  0x57   : > { %4082 = vmatprep.subr.bf16.mxu0 %v11686_v22  ;;  %5747 = vmatprep.subr.bf16.mxu1 %v11689_v23  ;;  %v11713_v22 = vld [vmem:[%s12841_s26 + $0x360] ss:$36 sps:$4 sm:$0xff]   ;;  %v11714_v23 = vld [vmem:[%s12841_s26 + $0x3ac] ss:$36 sps:$4 sm:$0xff]  }
  0x58   : > { %3794 = vmatmul.mubr.bf16.gmra.mrb[8].mxu0 %v11647_v24  ;;  %5459 = vmatmul.mubr.bf16.gmra.mrb[8].mxu1 %v11647_v24  ;;  %v11810_v24 = vld [vmem:[%s14698_s2 + $0x3e0] ss:$16 sps:$4 sm:$0xff]  }
  0x59   : > { %3803 = vmatprep.mubr.bf16.mxu0 %v11654_v25  ;;  %5468 = vmatprep.mubr.bf16.mxu1 %v11654_v25  ;;  %v11812_v25 = vld [vmem:[%s14698_s2 + $0x3e4] ss:$16 sps:$4 sm:$0xff]  }
  0x5a   : > { %4083 = vmatpush1.bf16.msra.mxu0 %v11684_v26  ;;  %5748 = vmatpush1.bf16.msra.mxu1 %v11687_v27  ;;  %v11813_v26 = vld [vmem:[%s14698_s2 + $0x3e8] ss:$16 sps:$4 sm:$0xff]   ;;  %v11815_v27 = vld [vmem:[%s14698_s2 + $0x3ec] ss:$16 sps:$4 sm:$0xff]  }
  0x5b   : > { %4084 = vmatprep.subr.bf16.mxu0 %v11697_v28  ;;  %5749 = vmatprep.subr.bf16.mxu1 %v11700_v29  ;;  %v11716_v28 = vld [vmem:[%s12841_s26 + $0x3a8] ss:$36 sps:$4 sm:$0xff]   ;;  %v11723_v29 = vld [vmem:[%s12841_s26 + $0x3f4] ss:$36 sps:$4 sm:$0xff]  }
  0x5e   : > { %4085 = vmatpush1.bf16.msra.mxu0 %v11695_v30  ;;  %5750 = vmatpush1.bf16.msra.mxu1 %v11698_v31  ;;  %v11725_v30 = vld [vmem:[%s12841_s26 + $0x3f0] ss:$36 sps:$4 sm:$0xff]   ;;  %v11726_v31 = vld [vmem:[%s12841_s26 + $0x43c] ss:$36 sps:$4 sm:$0xff]  }
  0x5f   : > { %4086 = vmatprep.subr.bf16.mxu0 %v11707_v32  ;;  %5751 = vmatprep.subr.bf16.mxu1 %v11710_v33  ;;  %v11824_v32 = vld [vmem:[%s14698_s2 + $0x404] ss:$16 sps:$4 sm:$0xff]   ;;  %v11827_v33 = vld [vmem:[%s14698_s2 + $0x40c] ss:$16 sps:$4 sm:$0xff]  }
  0x60   : > { %3804 = vmatmul.mubr.bf16.gmra.mrb[12].mxu0 %v11656_v34  ;;  %5469 = vmatmul.mubr.bf16.gmra.mrb[12].mxu1 %v11656_v34  ;;  %v11728_v34 = vld [vmem:[%s12841_s26 + $0x438] ss:$36 sps:$4 sm:$0xff]  }
  0x61   : > { %3813 = vmatprep.mubr.bf16.mxu0 %v11657_v35  ;;  %5478 = vmatprep.mubr.bf16.mxu1 %v11657_v35  ;;  %v11735_v35 = vld [vmem:[%s12841_s26 + $0x484] ss:$36 sps:$4 sm:$0xff]  }
  0x62   : > { %4087 = vmatpush1.bf16.msra.mxu0 %v11705_v36  ;;  %5752 = vmatpush1.bf16.msra.mxu1 %v11708_v37  ;;  %v11737_v36 = vld [vmem:[%s12841_s26 + $0x480] ss:$36 sps:$4 sm:$0xff]   ;;  %v11738_v37 = vld [vmem:[%s12841_s26 + $0x4cc] ss:$36 sps:$4 sm:$0xff]  }
  0x63   : > { %4088 = vmatprep.subr.bf16.mxu0 %v11719_v38  ;;  %5753 = vmatprep.subr.bf16.mxu1 %v11722_v39  ;;  %v11740_v38 = vld [vmem:[%s12841_s26 + $0x4c8] ss:$36 sps:$4 sm:$0xff]   ;;  %v11747_v39 = vld [vmem:[%s12841_s26 + $0x514] ss:$36 sps:$4 sm:$0xff]  }
  0x66   : > { %4089 = vmatpush1.bf16.msra.mxu0 %v11717_v40  ;;  %5754 = vmatpush1.bf16.msra.mxu1 %v11720_v41  ;;  %v11749_v40 = vld [vmem:[%s12841_s26 + $0x510] ss:$36 sps:$4 sm:$0xff]   ;;  %v11750_v41 = vld [vmem:[%s12841_s26 + $0x55c] ss:$36 sps:$4 sm:$0xff]  }
  0x67   : > { %4090 = vmatprep.subr.bf16.mxu0 %v11731_v42  ;;  %5755 = vmatprep.subr.bf16.mxu1 %v11734_v43  ;;  %v11752_v42 = vld [vmem:[%s12841_s26 + $0x558] ss:$36 sps:$4 sm:$0xff]   ;;  %v11759_v43 = vld [vmem:[%s12841_s26 + $0x5a4] ss:$36 sps:$4 sm:$0xff]  }
  0x68   : > { %3814 = vmatmul.mubr.bf16.gmra.mrb[16].mxu0 %v11659_v44  ;;  %5479 = vmatmul.mubr.bf16.gmra.mrb[16].mxu1 %v11659_v44  ;;  %v11761_v44 = vld [vmem:[%s12841_s26 + $0x5a0] ss:$36 sps:$4 sm:$0xff]  }
  0x69   : > { %3823 = vmatprep.mubr.bf16.mxu0 %v11666_v45  ;;  %5488 = vmatprep.mubr.bf16.mxu1 %v11666_v45  ;;  %v11762_v45 = vld [vmem:[%s12841_s26 + $0x5ec] ss:$36 sps:$4 sm:$0xff]  }
  0x6a   : > { %4091 = vmatpush1.bf16.msra.mxu0 %v11729_v46  ;;  %5756 = vmatpush1.bf16.msra.mxu1 %v11732_v47  ;;  %v11764_v46 = vld [vmem:[%s12841_s26 + $0x5e8] ss:$36 sps:$4 sm:$0xff]   ;;  %v11771_v47 = vld [vmem:[%s12841_s26 + $0x634] ss:$36 sps:$4 sm:$0xff]  }
  0x6b   : > { %4092 = vmatprep.subr.bf16.mxu0 %v11743_v48  ;;  %5757 = vmatprep.subr.bf16.mxu1 %v11746_v49  ;;  %v11773_v48 = vld [vmem:[%s12841_s26 + $0x630] ss:$36 sps:$4 sm:$0xff]   ;;  %v11774_v49 = vld [vmem:[%s12841_s26 + $0x67c] ss:$36 sps:$4 sm:$0xff]  }
  0x6e   : > { %4093 = vmatpush1.bf16.msra.mxu0 %v11741_v50  ;;  %5758 = vmatpush1.bf16.msra.mxu1 %v11744_v51  ;;  %v11776_v50 = vld [vmem:[%s12841_s26 + $0x678] ss:$36 sps:$4 sm:$0xff]   ;;  %v11783_v51 = vld [vmem:[%s12841_s26 + $0x6c4] ss:$36 sps:$4 sm:$0xff]  }
  0x6f   : > { %4094 = vmatprep.subr.bf16.mxu0 %v11755_v52  ;;  %5759 = vmatprep.subr.bf16.mxu1 %v11758_v54  ;;  %v11785_v52 = vld [vmem:[%s12841_s26 + $0x6c0] ss:$36 sps:$4 sm:$0xff]   ;;  %v11794_v54 = vld [vmem:[%s12841_s26 + $0x708] ss:$36 sps:$4 sm:$0xff]  }
  0x70   : > { %3824 = vmatmul.mubr.bf16.gmra.mrb[20].mxu0 %v11668_v53  ;;  %5489 = vmatmul.mubr.bf16.gmra.mrb[20].mxu1 %v11668_v53  ;;  %v11786_v53 = vld [vmem:[%s12841_s26 + $0x70c] ss:$36 sps:$4 sm:$0xff]  }
  0x71   : > { %3833 = vmatprep.mubr.bf16.mxu0 %v11669_v55  ;;  %5498 = vmatprep.mubr.bf16.mxu1 %v11669_v55  ;;  %v11795_v55 = vld [vmem:[%s12841_s26 + $0x754] ss:$36 sps:$4 sm:$0xff]  }
  0x72   : > { %4095 = vmatpush1.bf16.msra.mxu0 %v11753_v56  ;;  %5760 = vmatpush1.bf16.msra.mxu1 %v11756_v57  ;;  %v11797_v56 = vld [vmem:[%s12841_s26 + $0x750] ss:$36 sps:$4 sm:$0xff]   ;;  %v11804_v57 = vld [vmem:[%s12841_s26 + $0x79c] ss:$36 sps:$4 sm:$0xff]  }
  0x73   : > { %4096 = vmatprep.subr.bf16.mxu0 %v11767_v58  ;;  %5761 = vmatprep.subr.bf16.mxu1 %v11770_v61  ;;  %v11806_v58 = vld [vmem:[%s12841_s26 + $0x798] ss:$36 sps:$4 sm:$0xff]   ;;  %v11816_v61 = vld [vmem:[%s12841_s26 + $0x82c] ss:$36 sps:$4 sm:$0xff]  }
  0x76   : > { %4097 = vmatpush1.bf16.msra.mxu0 %v11765_v59  ;;  %5762 = vmatpush1.bf16.msra.mxu1 %v11768_v60  ;;  %v11807_v59 = vld [vmem:[%s12841_s26 + $0x7e4] ss:$36 sps:$4 sm:$0xff]  }
  0x77   : > { %4098 = vmatprep.subr.bf16.mxu0 %v11779_v3  ;;  %5763 = vmatprep.subr.bf16.mxu1 %v11782_v5  ;;  %v11809_v60 = vld [vmem:[%s12841_s26 + $0x7e0] ss:$36 sps:$4 sm:$0xff]   ;;  %v11828_v3 = vld [vmem:[%s12841_s26 + $0x54] ss:$36 sps:$4 sm:$0xff]   ;;  %v11839_v5 = vld [vmem:[%s14698_s2 + $0x42c] ss:$16 sps:$4 sm:$0xff]  }
  0x78   : > { %3834 = vmatmul.mubr.bf16.gmra.mrb[24].mxu0 %v11671_v62  ;;  %5499 = vmatmul.mubr.bf16.gmra.mrb[24].mxu1 %v11671_v62  ;;  %v11818_v62 = vld [vmem:[%s12841_s26 + $0x828] ss:$36 sps:$4 sm:$0xff]  }
  0x79   : > { %3843 = vmatprep.mubr.bf16.mxu0 %v11678_v63  ;;  %5508 = vmatprep.mubr.bf16.mxu1 %v11678_v63  ;;  %v11821_v63 = vld [vmem:[%s12841_s26 + $0xc] ss:$36 sps:$4 sm:$0xff]  }
  0x7a   : > { %4099 = vmatpush1.bf16.msra.mxu0 %v11777_v2  ;;  %5764 = vmatpush1.bf16.msra.mxu1 %v11780_v4  ;;  %v11825_v2 = vld [vmem:[%s14698_s2 + $0x408] ss:$16 sps:$4 sm:$0xff]   ;;  %v11836_v4 = vld [vmem:[%s14698_s2 + $0x424] ss:$16 sps:$4 sm:$0xff]  }
  0x7b   : > { %4100 = vmatprep.subr.bf16.mxu0 %v11790_v9  ;;  %5765 = vmatprep.subr.bf16.mxu1 %v11793_v12  ;;  %v11851_v9 = vld [vmem:[%s14698_s2 + $0x44c] ss:$16 sps:$4 sm:$0xff]   ;;  %v11846_v12 = vld [vmem:[%s14698_s2 + $0x440] ss:$16 sps:$4 sm:$0xff]  }
  0x7e   : > { %4101 = vmatpush1.bf16.msra.mxu0 %v11788_v8  ;;  %5766 = vmatpush1.bf16.msra.mxu1 %v11791_v10  ;;  %v11848_v8 = vld [vmem:[%s14698_s2 + $0x444] ss:$16 sps:$4 sm:$0xff]  }
  0x7f   : > { %4102 = vmatprep.subr.bf16.mxu0 %v11800_v17  ;;  %5767 = vmatprep.subr.bf16.mxu1 %v11803_v19  ;;  %v11830_v10 = vld [vmem:[%s12841_s26 + $0x50] ss:$36 sps:$4 sm:$0xff]   ;;  %v11861_v17 = vld [vmem:[%s14698_s2 + $0x468] ss:$16 sps:$4 sm:$0xff]   ;;  %v11875_v19 = vld [vmem:[%s14698_s2 + $0x48c] ss:$16 sps:$4 sm:$0xff]  }
  0x80   : > { %3844 = vmatmul.mubr.bf16.gmra.mrb[28].mxu0 %v11680_v0  ;;  %5509 = vmatmul.mubr.bf16.gmra.mrb[28].mxu1 %v11680_v0  ;;  %v11819_v0 = vld [vmem:[%s12841_s26 + $0x8] ss:$36 sps:$4 sm:$0xff]  }
  0x81   : > { %3853 = vmatprep.mubr.bf16.mxu0 %v11681_v1  ;;  %5518 = vmatprep.mubr.bf16.mxu1 %v11681_v1  ;;  %v11822_v1 = vld [vmem:[%s14698_s2 + $0x400] ss:$16 sps:$4 sm:$0xff]  }
  0x82   : > { %4103 = vmatpush1.bf16.msra.mxu0 %v11798_v16  ;;  %5768 = vmatpush1.bf16.msra.mxu1 %v11801_v18  ;;  %v11858_v16 = vld [vmem:[%s14698_s2 + $0x460] ss:$16 sps:$4 sm:$0xff]   ;;  %v11872_v18 = vld [vmem:[%s14698_s2 + $0x484] ss:$16 sps:$4 sm:$0xff]  }
  0x83   : > { %4104 = vmatprep.subr.bf16.mxu0 %v11812_v25  ;;  %5769 = vmatprep.subr.bf16.mxu1 %v11815_v27  ;;  %v11886_v25 = vld [vmem:[%s14698_s2 + $0x4ac] ss:$16 sps:$4 sm:$0xff]   ;;  %v11884_v27 = vld [vmem:[%s14698_s2 + $0x4a8] ss:$16 sps:$4 sm:$0xff]  }
  0x86   : > { %4105 = vmatpush1.bf16.msra.mxu0 %v11810_v24  ;;  %5770 = vmatpush1.bf16.msra.mxu1 %v11813_v26  ;;  %v11883_v24 = vld [vmem:[%s14698_s2 + $0x4a4] ss:$16 sps:$4 sm:$0xff]   ;;  %v11881_v26 = vld [vmem:[%s14698_s2 + $0x4a0] ss:$16 sps:$4 sm:$0xff]  }
  0x87   : > { %4407 = vmatprep.subr.bf16.mxu0 %v11824_v32  ;;  %6072 = vmatprep.subr.bf16.mxu1 %v11827_v33  ;;  %v11891_v32 = vld [vmem:[%s14698_s2 + $0x4c0] ss:$16 sps:$4 sm:$0xff]   ;;  %v11894_v33 = vld [vmem:[%s14698_s2 + $0x4c8] ss:$16 sps:$4 sm:$0xff]  }
  0x88   : > { %3854 = vmatmul.mubr.bf16.gmra.mrb[32].mxu0 %v11683_v6  ;;  %5519 = vmatmul.mubr.bf16.gmra.mrb[32].mxu1 %v11683_v6  ;;  %v11834_v6 = vld [vmem:[%s14698_s2 + $0x420] ss:$16 sps:$4 sm:$0xff]  }
  0x89   : > { %3863 = vmatprep.mubr.bf16.mxu0 %v11690_v7  ;;  %5528 = vmatprep.mubr.bf16.mxu1 %v11690_v7  ;;  %v11837_v7 = vld [vmem:[%s14698_s2 + $0x428] ss:$16 sps:$4 sm:$0xff]  }
  0x90   : > { %3864 = vmatmul.mubr.bf16.gmra.mrb[36].mxu0 %v11692_v11  ;;  %5529 = vmatmul.mubr.bf16.gmra.mrb[36].mxu1 %v11692_v11  ;;  %v11831_v11 = vld [vmem:[%s12841_s26 + $0x9c] ss:$36 sps:$4 sm:$0xff]  }
  0x91   : > { %3873 = vmatprep.mubr.bf16.mxu0 %v11693_v13  ;;  %5538 = vmatprep.mubr.bf16.mxu1 %v11693_v13  ;;  %v11849_v13 = vld [vmem:[%s14698_s2 + $0x448] ss:$16 sps:$4 sm:$0xff]  }
  0x98   : > { %3874 = vmatmul.mubr.bf16.gmra.mrb[40].mxu0 %v11701_v14  ;;  %5539 = vmatmul.mubr.bf16.gmra.mrb[40].mxu1 %v11701_v14  ;;  %v11860_v14 = vld [vmem:[%s14698_s2 + $0x464] ss:$16 sps:$4 sm:$0xff]  }
  0x99   : > { %3883 = vmatprep.mubr.bf16.mxu0 %v11702_v15  ;;  %5548 = vmatprep.mubr.bf16.mxu1 %v11702_v15  ;;  %v11863_v15 = vld [vmem:[%s14698_s2 + $0x46c] ss:$16 sps:$4 sm:$0xff]  }
  0xa0   : > { %3884 = vmatmul.mubr.bf16.gmra.mrb[44].mxu0 %v11704_v20  ;;  %5549 = vmatmul.mubr.bf16.gmra.mrb[44].mxu1 %v11704_v20  ;;  %v11833_v20 = vld [vmem:[%s12841_s26 + $0x98] ss:$36 sps:$4 sm:$0xff]  }
  0xa1   : > { %3893 = vmatprep.mubr.bf16.mxu0 %v11711_v21  ;;  %5558 = vmatprep.mubr.bf16.mxu1 %v11711_v21  ;;  %v11840_v21 = vld [vmem:[%s12841_s26 + $0xe4] ss:$36 sps:$4 sm:$0xff]  }
  0xa8   : > { %3894 = vmatmul.mubr.bf16.gmra.mrb[48].mxu0 %v11713_v22  ;;  %5559 = vmatmul.mubr.bf16.gmra.mrb[48].mxu1 %v11713_v22  ;;  %v11870_v22 = vld [vmem:[%s14698_s2 + $0x480] ss:$16 sps:$4 sm:$0xff]  }
  0xa9   : > { %3903 = vmatprep.mubr.bf16.mxu0 %v11714_v23  ;;  %5568 = vmatprep.mubr.bf16.mxu1 %v11714_v23  ;;  %v11873_v23 = vld [vmem:[%s14698_s2 + $0x488] ss:$16 sps:$4 sm:$0xff]  }
  0xb0   : > { %3904 = vmatmul.mubr.bf16.gmra.mrb[52].mxu0 %v11716_v28  ;;  %5569 = vmatmul.mubr.bf16.gmra.mrb[52].mxu1 %v11716_v28  ;;  %v11893_v28 = vld [vmem:[%s14698_s2 + $0x4c4] ss:$16 sps:$4 sm:$0xff]  }
  0xb1   : > { %3913 = vmatprep.mubr.bf16.mxu0 %v11723_v29  ;;  %5578 = vmatprep.mubr.bf16.mxu1 %v11723_v29  ;;  %v11896_v29 = vld [vmem:[%s14698_s2 + $0x4cc] ss:$16 sps:$4 sm:$0xff]  }
  0xb8   : > { %3914 = vmatmul.mubr.bf16.gmra.mrb[56].mxu0 %v11725_v30  ;;  %5579 = vmatmul.mubr.bf16.gmra.mrb[56].mxu1 %v11725_v30  ;;  %v11842_v30 = vld [vmem:[%s12841_s26 + $0xe0] ss:$36 sps:$4 sm:$0xff]  }
  0xb9   : > { %3923 = vmatprep.mubr.bf16.mxu0 %v11726_v31  ;;  %5588 = vmatprep.mubr.bf16.mxu1 %v11726_v31  ;;  %v11843_v31 = vld [vmem:[%s12841_s26 + $0x12c] ss:$36 sps:$4 sm:$0xff]  }
  0xc0   : > { %3924 = vmatmul.mubr.bf16.gmra.mrb[60].mxu0 %v11728_v34  ;;  %5589 = vmatmul.mubr.bf16.gmra.mrb[60].mxu1 %v11728_v34  ;;  %v11905_v34 = vld [vmem:[%s14698_s2 + $0x4e4] ss:$16 sps:$4 sm:$0xff]  }
  0xc1   : > { %3933 = vmatprep.mubr.bf16.mxu0 %v11735_v35  ;;  %5598 = vmatprep.mubr.bf16.mxu1 %v11735_v35  ;;  %v11908_v35 = vld [vmem:[%s14698_s2 + $0x4ec] ss:$16 sps:$4 sm:$0xff]  }
  0xc8   : > { %3934 = vmatmul.mubr.bf16.gmra.mrb[64].mxu0 %v11737_v36  ;;  %5599 = vmatmul.mubr.bf16.gmra.mrb[64].mxu1 %v11737_v36  ;;  %v11903_v36 = vld [vmem:[%s14698_s2 + $0x4e0] ss:$16 sps:$4 sm:$0xff]  }
  0xc9   : > { %3943 = vmatprep.mubr.bf16.mxu0 %v11738_v37  ;;  %5608 = vmatprep.mubr.bf16.mxu1 %v11738_v37  ;;  %v11906_v37 = vld [vmem:[%s14698_s2 + $0x4e8] ss:$16 sps:$4 sm:$0xff]  }
  0xd0   : > { %3944 = vmatmul.mubr.bf16.gmra.mrb[68].mxu0 %v11740_v38  ;;  %5609 = vmatmul.mubr.bf16.gmra.mrb[68].mxu1 %v11740_v38  ;;  %v11917_v38 = vld [vmem:[%s14698_s2 + $0x504] ss:$16 sps:$4 sm:$0xff]  }
  0xd1   : > { %3953 = vmatprep.mubr.bf16.mxu0 %v11747_v39  ;;  %5618 = vmatprep.mubr.bf16.mxu1 %v11747_v39  ;;  %v11920_v39 = vld [vmem:[%s14698_s2 + $0x50c] ss:$16 sps:$4 sm:$0xff]  }
  0xd8   : > { %3954 = vmatmul.mubr.bf16.gmra.mrb[72].mxu0 %v11749_v40  ;;  %5619 = vmatmul.mubr.bf16.gmra.mrb[72].mxu1 %v11749_v40  ;;  %v11845_v40 = vld [vmem:[%s12841_s26 + $0x128] ss:$36 sps:$4 sm:$0xff]  }
  0xd9   : > { %3963 = vmatprep.mubr.bf16.mxu0 %v11750_v41  ;;  %5628 = vmatprep.mubr.bf16.mxu1 %v11750_v41  ;;  %v11852_v41 = vld [vmem:[%s12841_s26 + $0x174] ss:$36 sps:$4 sm:$0xff]  }
  0xe0   : > { %3964 = vmatmul.mubr.bf16.gmra.mrb[76].mxu0 %v11752_v42  ;;  %5629 = vmatmul.mubr.bf16.gmra.mrb[76].mxu1 %v11752_v42  ;;  %v11915_v42 = vld [vmem:[%s14698_s2 + $0x500] ss:$16 sps:$4 sm:$0xff]  }
  0xe1   : > { %3973 = vmatprep.mubr.bf16.mxu0 %v11759_v43  ;;  %5638 = vmatprep.mubr.bf16.mxu1 %v11759_v43  ;;  %v11918_v43 = vld [vmem:[%s14698_s2 + $0x508] ss:$16 sps:$4 sm:$0xff]  }
  0xe8   : > { %3974 = vmatmul.mubr.bf16.gmra.mrb[80].mxu0 %v11761_v44  ;;  %5639 = vmatmul.mubr.bf16.gmra.mrb[80].mxu1 %v11761_v44  ;;  %v11929_v44 = vld [vmem:[%s14698_s2 + $0x524] ss:$16 sps:$4 sm:$0xff]  }
  0xe9   : > { %3983 = vmatprep.mubr.bf16.mxu0 %v11762_v45  ;;  %5648 = vmatprep.mubr.bf16.mxu1 %v11762_v45  ;;  %v11932_v45 = vld [vmem:[%s14698_s2 + $0x52c] ss:$16 sps:$4 sm:$0xff]  }
  0xf0   : > { %3984 = vmatmul.mubr.bf16.gmra.mrb[84].mxu0 %v11764_v46  ;;  %5649 = vmatmul.mubr.bf16.gmra.mrb[84].mxu1 %v11764_v46  ;;  %v11927_v46 = vld [vmem:[%s14698_s2 + $0x520] ss:$16 sps:$4 sm:$0xff]  }
  0xf1   : > { %3993 = vmatprep.mubr.bf16.mxu0 %v11771_v47  ;;  %5658 = vmatprep.mubr.bf16.mxu1 %v11771_v47  ;;  %v11930_v47 = vld [vmem:[%s14698_s2 + $0x528] ss:$16 sps:$4 sm:$0xff]  }
  0xf8   : > { %3994 = vmatmul.mubr.bf16.gmra.mrb[88].mxu0 %v11773_v48  ;;  %5659 = vmatmul.mubr.bf16.gmra.mrb[88].mxu1 %v11773_v48  ;;  %v11941_v48 = vld [vmem:[%s14698_s2 + $0x544] ss:$16 sps:$4 sm:$0xff]  }
  0xf9   : > { %4003 = vmatprep.mubr.bf16.mxu0 %v11774_v49  ;;  %5668 = vmatprep.mubr.bf16.mxu1 %v11774_v49  ;;  %v11944_v49 = vld [vmem:[%s14698_s2 + $0x54c] ss:$16 sps:$4 sm:$0xff]  }
 0x100   : > { %4004 = vmatmul.mubr.bf16.gmra.mrb[92].mxu0 %v11776_v50  ;;  %5669 = vmatmul.mubr.bf16.gmra.mrb[92].mxu1 %v11776_v50  ;;  %v11854_v50 = vld [vmem:[%s12841_s26 + $0x170] ss:$36 sps:$4 sm:$0xff]  }
 0x101   : > { %4013 = vmatprep.mubr.bf16.mxu0 %v11783_v51  ;;  %5678 = vmatprep.mubr.bf16.mxu1 %v11783_v51  ;;  %v11855_v51 = vld [vmem:[%s12841_s26 + $0x1bc] ss:$36 sps:$4 sm:$0xff]  }
 0x108   : > { %4014 = vmatmul.mubr.bf16.gmra.mrb[96].mxu0 %v11785_v52  ;;  %5679 = vmatmul.mubr.bf16.gmra.mrb[96].mxu1 %v11785_v52  ;;  %v11939_v52 = vld [vmem:[%s14698_s2 + $0x540] ss:$16 sps:$4 sm:$0xff]  }
 0x109   : > { %4023 = vmatprep.mubr.bf16.mxu0 %v11786_v53  ;;  %5688 = vmatprep.mubr.bf16.mxu1 %v11786_v53  ;;  %v11942_v53 = vld [vmem:[%s14698_s2 + $0x548] ss:$16 sps:$4 sm:$0xff]  }
 0x110   : > { %4024 = vmatmul.mubr.bf16.gmra.mrb[100].mxu0 %v11794_v54  ;;  %5689 = vmatmul.mubr.bf16.gmra.mrb[100].mxu1 %v11794_v54  ;;  %v11953_v54 = vld [vmem:[%s14698_s2 + $0x564] ss:$16 sps:$4 sm:$0xff]  }
 0x111   : > { %4033 = vmatprep.mubr.bf16.mxu0 %v11795_v55  ;;  %5698 = vmatprep.mubr.bf16.mxu1 %v11795_v55  ;;  %v11956_v55 = vld [vmem:[%s14698_s2 + $0x56c] ss:$16 sps:$4 sm:$0xff]  }
 0x118   : > { %4034 = vmatmul.mubr.bf16.gmra.mrb[104].mxu0 %v11797_v56  ;;  %5699 = vmatmul.mubr.bf16.gmra.mrb[104].mxu1 %v11797_v56  ;;  %v11951_v56 = vld [vmem:[%s14698_s2 + $0x560] ss:$16 sps:$4 sm:$0xff]  }
 0x119   : > { %4043 = vmatprep.mubr.bf16.mxu0 %v11804_v57  ;;  %5708 = vmatprep.mubr.bf16.mxu1 %v11804_v57  ;;  %v11954_v57 = vld [vmem:[%s14698_s2 + $0x568] ss:$16 sps:$4 sm:$0xff]  }
 0x120   : > { %4044 = vmatmul.mubr.bf16.gmra.mrb[108].mxu0 %v11806_v58  ;;  %5709 = vmatmul.mubr.bf16.gmra.mrb[108].mxu1 %v11806_v58  ;;  %v11857_v58 = vld [vmem:[%s12841_s26 + $0x1b8] ss:$36 sps:$4 sm:$0xff]  }
 0x121   : > { %4053 = vmatprep.mubr.bf16.mxu0 %v11807_v59  ;;  %5718 = vmatprep.mubr.bf16.mxu1 %v11807_v59  ;;  %v11864_v59 = vld [vmem:[%s12841_s26 + $0x204] ss:$36 sps:$4 sm:$0xff]  }
 0x128   : > { %4054 = vmatmul.mubr.bf16.gmra.mrb[112].mxu0 %v11809_v60  ;;  %5719 = vmatmul.mubr.bf16.gmra.mrb[112].mxu1 %v11809_v60  ;;  %v11866_v60 = vld [vmem:[%s12841_s26 + $0x200] ss:$36 sps:$4 sm:$0xff]  }
 0x129   : > { %4063 = vmatprep.mubr.bf16.mxu0 %v11816_v61  ;;  %5728 = vmatprep.mubr.bf16.mxu1 %v11816_v61  ;;  %v11867_v61 = vld [vmem:[%s12841_s26 + $0x24c] ss:$36 sps:$4 sm:$0xff]  }
 0x130   : > { %4064 = vmatmul.mubr.bf16.gmra.mrb[116].mxu0 %v11818_v62  ;;  %5729 = vmatmul.mubr.bf16.gmra.mrb[116].mxu1 %v11818_v62  ;;  %v11963_v62 = vld [vmem:[%s14698_s2 + $0x580] ss:$16 sps:$4 sm:$0xff]  }
 0x131   : > { %4106 = vmatprep.mubr.bf16.mxu0 %v11821_v63  ;;  %5771 = vmatprep.mubr.bf16.mxu1 %v11821_v63  ;;  %v11965_v63 = vld [vmem:[%s14698_s2 + $0x584] ss:$16 sps:$4 sm:$0xff]  }
 0x138   : > { %4107 = vmatmul.mubr.bf16.vlgmr.msra.gmra.mrb[0].mxu0 %v11819_v0  ;;  %5772 = vmatmul.mubr.bf16.vlgmr.msra.gmra.mrb[0].mxu1 %v11819_v0  ;;  %v11966_v0 = vld [vmem:[%s14698_s2 + $0x588] ss:$16 sps:$4 sm:$0xff]  }
 0x139   : > { %4408 = vmatpush1.bf16.msra.mxu0 %v11822_v1  ;;  %6073 = vmatpush1.bf16.msra.mxu1 %v11825_v2  ;;  %v11968_v1 = vld [vmem:[%s14698_s2 + $0x58c] ss:$16 sps:$4 sm:$0xff]  }
 0x13a   : > { %4116 = vmatprep.mubr.bf16.mxu0 %v11828_v3  ;;  %5781 = vmatprep.mubr.bf16.mxu1 %v11828_v3  ;;  %v11869_v2 = vld [vmem:[%s12841_s26 + $0x248] ss:$36 sps:$4 sm:$0xff]   ;;  %v11876_v3 = vld [vmem:[%s12841_s26 + $0x294] ss:$36 sps:$4 sm:$0xff]  }
 0x13b   : > { %4409 = vmatprep.subr.bf16.mxu0 %v11836_v4  ;;  %6074 = vmatprep.subr.bf16.mxu1 %v11839_v5  ;;  %v11974_v4 = vld [vmem:[%s14698_s2 + $0x5a0] ss:$16 sps:$4 sm:$0xff]   ;;  %v11976_v5 = vld [vmem:[%s14698_s2 + $0x5a4] ss:$16 sps:$4 sm:$0xff]  }
 0x13d   : > { %4410 = vmatpush1.bf16.msra.mxu0 %v11834_v6  ;;  %6075 = vmatpush1.bf16.msra.mxu1 %v11837_v7  ;;  %v11977_v6 = vld [vmem:[%s14698_s2 + $0x5a8] ss:$16 sps:$4 sm:$0xff]   ;;  %v11979_v7 = vld [vmem:[%s14698_s2 + $0x5ac] ss:$16 sps:$4 sm:$0xff]  }
 0x13e   : > { %4411 = vmatprep.subr.bf16.mxu0 %v11848_v8  ;;  %6076 = vmatprep.subr.bf16.mxu1 %v11851_v9  ;;  %v11878_v8 = vld [vmem:[%s12841_s26 + $0x290] ss:$36 sps:$4 sm:$0xff]   ;;  %v11879_v9 = vld [vmem:[%s12841_s26 + $0x2dc] ss:$36 sps:$4 sm:$0xff]  }
 0x140   : > { %4117 = vmatmul.mubr.bf16.gmra.mrb[4].mxu0 %v11830_v10  ;;  %5782 = vmatmul.mubr.bf16.gmra.mrb[4].mxu1 %v11830_v10  ;;  %v11887_v10 = vld [vmem:[%s12841_s26 + $0x2d8] ss:$36 sps:$4 sm:$0xff]  }
 0x141   : > { %4126 = vmatprep.mubr.bf16.mxu0 %v11831_v11  ;;  %5791 = vmatprep.mubr.bf16.mxu1 %v11831_v11  ;;  %v11888_v11 = vld [vmem:[%s12841_s26 + $0x324] ss:$36 sps:$4 sm:$0xff]  }
 0x142   : > { %4412 = vmatpush1.bf16.msra.mxu0 %v11846_v12  ;;  %6077 = vmatpush1.bf16.msra.mxu1 %v11849_v13  ;;  %v11984_v12 = vld [vmem:[%s14698_s2 + $0x5c0] ss:$16 sps:$4 sm:$0xff]   ;;  %v11986_v13 = vld [vmem:[%s14698_s2 + $0x5c4] ss:$16 sps:$4 sm:$0xff]  }
 0x143   : > { %4413 = vmatprep.subr.bf16.mxu0 %v11860_v14  ;;  %6078 = vmatprep.subr.bf16.mxu1 %v11863_v15  ;;  %v11987_v14 = vld [vmem:[%s14698_s2 + $0x5c8] ss:$16 sps:$4 sm:$0xff]   ;;  %v11989_v15 = vld [vmem:[%s14698_s2 + $0x5cc] ss:$16 sps:$4 sm:$0xff]  }
 0x146   : > { %4414 = vmatpush1.bf16.msra.mxu0 %v11858_v16  ;;  %6079 = vmatpush1.bf16.msra.mxu1 %v11861_v17  ;;  %v11890_v16 = vld [vmem:[%s12841_s26 + $0x320] ss:$36 sps:$4 sm:$0xff]   ;;  %v11897_v17 = vld [vmem:[%s12841_s26 + $0x36c] ss:$36 sps:$4 sm:$0xff]  }
 0x147   : > { %4415 = vmatprep.subr.bf16.mxu0 %v11872_v18  ;;  %6080 = vmatprep.subr.bf16.mxu1 %v11875_v19  ;;  %v11899_v18 = vld [vmem:[%s12841_s26 + $0x368] ss:$36 sps:$4 sm:$0xff]   ;;  %v11900_v19 = vld [vmem:[%s12841_s26 + $0x3b4] ss:$36 sps:$4 sm:$0xff]  }
 0x148   : > { %4127 = vmatmul.mubr.bf16.gmra.mrb[8].mxu0 %v11833_v20  ;;  %5792 = vmatmul.mubr.bf16.gmra.mrb[8].mxu1 %v11833_v20  ;;  %v11996_v20 = vld [vmem:[%s14698_s2 + $0x5e0] ss:$16 sps:$4 sm:$0xff]  }
 0x149   : > { %4136 = vmatprep.mubr.bf16.mxu0 %v11840_v21  ;;  %5801 = vmatprep.mubr.bf16.mxu1 %v11840_v21  ;;  %v11998_v21 = vld [vmem:[%s14698_s2 + $0x5e4] ss:$16 sps:$4 sm:$0xff]  }
 0x14a   : > { %4416 = vmatpush1.bf16.msra.mxu0 %v11870_v22  ;;  %6081 = vmatpush1.bf16.msra.mxu1 %v11873_v23  ;;  %v11999_v22 = vld [vmem:[%s14698_s2 + $0x5e8] ss:$16 sps:$4 sm:$0xff]   ;;  %v12001_v23 = vld [vmem:[%s14698_s2 + $0x5ec] ss:$16 sps:$4 sm:$0xff]  }
 0x14b   : > { %4417 = vmatprep.subr.bf16.mxu0 %v11883_v24  ;;  %6082 = vmatprep.subr.bf16.mxu1 %v11886_v25  ;;  %v11902_v24 = vld [vmem:[%s12841_s26 + $0x3b0] ss:$36 sps:$4 sm:$0xff]   ;;  %v11909_v25 = vld [vmem:[%s12841_s26 + $0x3fc] ss:$36 sps:$4 sm:$0xff]  }
 0x14e   : > { %4418 = vmatpush1.bf16.msra.mxu0 %v11881_v26  ;;  %6083 = vmatpush1.bf16.msra.mxu1 %v11884_v27  ;;  %v11911_v26 = vld [vmem:[%s12841_s26 + $0x3f8] ss:$36 sps:$4 sm:$0xff]   ;;  %v11912_v27 = vld [vmem:[%s12841_s26 + $0x444] ss:$36 sps:$4 sm:$0xff]  }
 0x14f   : > { %4419 = vmatprep.subr.bf16.mxu0 %v11893_v28  ;;  %6084 = vmatprep.subr.bf16.mxu1 %v11896_v29  ;;  %v12010_v28 = vld [vmem:[%s14698_s2 + $0x604] ss:$16 sps:$4 sm:$0xff]   ;;  %v12013_v29 = vld [vmem:[%s14698_s2 + $0x60c] ss:$16 sps:$4 sm:$0xff]  }
 0x150   : > { %4137 = vmatmul.mubr.bf16.gmra.mrb[12].mxu0 %v11842_v30  ;;  %5802 = vmatmul.mubr.bf16.gmra.mrb[12].mxu1 %v11842_v30  ;;  %v11914_v30 = vld [vmem:[%s12841_s26 + $0x440] ss:$36 sps:$4 sm:$0xff]  }
 0x151   : > { %4146 = vmatprep.mubr.bf16.mxu0 %v11843_v31  ;;  %5811 = vmatprep.mubr.bf16.mxu1 %v11843_v31  ;;  %v11921_v31 = vld [vmem:[%s12841_s26 + $0x48c] ss:$36 sps:$4 sm:$0xff]  }
 0x152   : > { %4420 = vmatpush1.bf16.msra.mxu0 %v11891_v32  ;;  %6085 = vmatpush1.bf16.msra.mxu1 %v11894_v33  ;;  %v11923_v32 = vld [vmem:[%s12841_s26 + $0x488] ss:$36 sps:$4 sm:$0xff]   ;;  %v11924_v33 = vld [vmem:[%s12841_s26 + $0x4d4] ss:$36 sps:$4 sm:$0xff]  }
 0x153   : > { %4421 = vmatprep.subr.bf16.mxu0 %v11905_v34  ;;  %6086 = vmatprep.subr.bf16.mxu1 %v11908_v35  ;;  %v11926_v34 = vld [vmem:[%s12841_s26 + $0x4d0] ss:$36 sps:$4 sm:$0xff]   ;;  %v11933_v35 = vld [vmem:[%s12841_s26 + $0x51c] ss:$36 sps:$4 sm:$0xff]  }
 0x156   : > { %4422 = vmatpush1.bf16.msra.mxu0 %v11903_v36  ;;  %6087 = vmatpush1.bf16.msra.mxu1 %v11906_v37  ;;  %v11935_v36 = vld [vmem:[%s12841_s26 + $0x518] ss:$36 sps:$4 sm:$0xff]   ;;  %v11936_v37 = vld [vmem:[%s12841_s26 + $0x564] ss:$36 sps:$4 sm:$0xff]  }
 0x157   : > { %4423 = vmatprep.subr.bf16.mxu0 %v11917_v38  ;;  %6088 = vmatprep.subr.bf16.mxu1 %v11920_v39  ;;  %v11938_v38 = vld [vmem:[%s12841_s26 + $0x560] ss:$36 sps:$4 sm:$0xff]   ;;  %v11945_v39 = vld [vmem:[%s12841_s26 + $0x5ac] ss:$36 sps:$4 sm:$0xff]  }
 0x158   : > { %4147 = vmatmul.mubr.bf16.gmra.mrb[16].mxu0 %v11845_v40  ;;  %5812 = vmatmul.mubr.bf16.gmra.mrb[16].mxu1 %v11845_v40  ;;  %v11947_v40 = vld [vmem:[%s12841_s26 + $0x5a8] ss:$36 sps:$4 sm:$0xff]  }
 0x159   : > { %4156 = vmatprep.mubr.bf16.mxu0 %v11852_v41  ;;  %5821 = vmatprep.mubr.bf16.mxu1 %v11852_v41  ;;  %v11948_v41 = vld [vmem:[%s12841_s26 + $0x5f4] ss:$36 sps:$4 sm:$0xff]  }
 0x15a   : > { %4424 = vmatpush1.bf16.msra.mxu0 %v11915_v42  ;;  %6089 = vmatpush1.bf16.msra.mxu1 %v11918_v43  ;;  %v11950_v42 = vld [vmem:[%s12841_s26 + $0x5f0] ss:$36 sps:$4 sm:$0xff]   ;;  %v11957_v43 = vld [vmem:[%s12841_s26 + $0x63c] ss:$36 sps:$4 sm:$0xff]  }
 0x15b   : > { %4425 = vmatprep.subr.bf16.mxu0 %v11929_v44  ;;  %6090 = vmatprep.subr.bf16.mxu1 %v11932_v45  ;;  %v11959_v44 = vld [vmem:[%s12841_s26 + $0x638] ss:$36 sps:$4 sm:$0xff]   ;;  %v11960_v45 = vld [vmem:[%s12841_s26 + $0x684] ss:$36 sps:$4 sm:$0xff]  }
 0x15e   : > { %4426 = vmatpush1.bf16.msra.mxu0 %v11927_v46  ;;  %6091 = vmatpush1.bf16.msra.mxu1 %v11930_v47  ;;  %v11962_v46 = vld [vmem:[%s12841_s26 + $0x680] ss:$36 sps:$4 sm:$0xff]   ;;  %v11969_v47 = vld [vmem:[%s12841_s26 + $0x6cc] ss:$36 sps:$4 sm:$0xff]  }
 0x15f   : > { %4427 = vmatprep.subr.bf16.mxu0 %v11941_v48  ;;  %6092 = vmatprep.subr.bf16.mxu1 %v11944_v49  ;;  %v11971_v48 = vld [vmem:[%s12841_s26 + $0x6c8] ss:$36 sps:$4 sm:$0xff]   ;;  %v11972_v49 = vld [vmem:[%s12841_s26 + $0x714] ss:$36 sps:$4 sm:$0xff]  }
 0x160   : > { %4157 = vmatmul.mubr.bf16.gmra.mrb[20].mxu0 %v11854_v50  ;;  %5822 = vmatmul.mubr.bf16.gmra.mrb[20].mxu1 %v11854_v50  ;;  %v11980_v50 = vld [vmem:[%s12841_s26 + $0x710] ss:$36 sps:$4 sm:$0xff]  }
 0x161   : > { %4166 = vmatprep.mubr.bf16.mxu0 %v11855_v51  ;;  %5831 = vmatprep.mubr.bf16.mxu1 %v11855_v51  ;;  %v11981_v51 = vld [vmem:[%s12841_s26 + $0x75c] ss:$36 sps:$4 sm:$0xff]  }
 0x162   : > { %4428 = vmatpush1.bf16.msra.mxu0 %v11939_v52  ;;  %6093 = vmatpush1.bf16.msra.mxu1 %v11942_v53  ;;  %v11983_v52 = vld [vmem:[%s12841_s26 + $0x758] ss:$36 sps:$4 sm:$0xff]   ;;  %v11990_v53 = vld [vmem:[%s12841_s26 + $0x7a4] ss:$36 sps:$4 sm:$0xff]  }
 0x163   : > { %4429 = vmatprep.subr.bf16.mxu0 %v11953_v54  ;;  %6094 = vmatprep.subr.bf16.mxu1 %v11956_v55  ;;  %v11992_v54 = vld [vmem:[%s12841_s26 + $0x7a0] ss:$36 sps:$4 sm:$0xff]   ;;  %v11993_v55 = vld [vmem:[%s12841_s26 + $0x7ec] ss:$36 sps:$4 sm:$0xff]  }
 0x166   : > { %4430 = vmatpush1.bf16.msra.mxu0 %v11951_v56  ;;  %6095 = vmatpush1.bf16.msra.mxu1 %v11954_v57  ;;  %v11995_v56 = vld [vmem:[%s12841_s26 + $0x7e8] ss:$36 sps:$4 sm:$0xff]   ;;  %v12002_v57 = vld [vmem:[%s12841_s26 + $0x834] ss:$36 sps:$4 sm:$0xff]  }
 0x167   : > { %4431 = vmatprep.subr.bf16.mxu0 %v11965_v63  ;;  %6096 = vmatprep.subr.bf16.mxu1 %v11968_v1  ;;  %v12014_v63 = vld [vmem:[%s12841_s26 + $0x5c] ss:$36 sps:$4 sm:$0xff]  }
 0x168   : > { %4167 = vmatmul.mubr.bf16.gmra.mrb[24].mxu0 %v11857_v58  ;;  %5832 = vmatmul.mubr.bf16.gmra.mrb[24].mxu1 %v11857_v58  ;;  %v12004_v58 = vld [vmem:[%s12841_s26 + $0x830] ss:$36 sps:$4 sm:$0xff]   ;;  %v12025_v1 = vld [vmem:[%s14698_s2 + $0x62c] ss:$16 sps:$4 sm:$0xff]  }
 0x169   : > { %4176 = vmatprep.mubr.bf16.mxu0 %v11864_v59  ;;  %5841 = vmatprep.mubr.bf16.mxu1 %v11864_v59  ;;  %v12007_v59 = vld [vmem:[%s12841_s26 + $0x14] ss:$36 sps:$4 sm:$0xff]  }
 0x16a   : > { %4432 = vmatpush1.bf16.msra.mxu0 %v11963_v62  ;;  %6097 = vmatpush1.bf16.msra.mxu1 %v11966_v0  ;;  %v12011_v62 = vld [vmem:[%s14698_s2 + $0x608] ss:$16 sps:$4 sm:$0xff]   ;;  %v12022_v0 = vld [vmem:[%s14698_s2 + $0x624] ss:$16 sps:$4 sm:$0xff]  }
 0x16b   : > { %4433 = vmatprep.subr.bf16.mxu0 %v11976_v5  ;;  %6098 = vmatprep.subr.bf16.mxu1 %v11979_v7  ;;  %v12037_v5 = vld [vmem:[%s14698_s2 + $0x64c] ss:$16 sps:$4 sm:$0xff]   ;;  %v12017_v7 = vld [vmem:[%s12841_s26 + $0xa4] ss:$36 sps:$4 sm:$0xff]  }
 0x16e   : > { %4434 = vmatpush1.bf16.msra.mxu0 %v11974_v4  ;;  %6099 = vmatpush1.bf16.msra.mxu1 %v11977_v6  ;;  %v12034_v4 = vld [vmem:[%s14698_s2 + $0x644] ss:$16 sps:$4 sm:$0xff]   ;;  %v12016_v6 = vld [vmem:[%s12841_s26 + $0x58] ss:$36 sps:$4 sm:$0xff]  }
 0x16f   : > { %4435 = vmatprep.subr.bf16.mxu0 %v11986_v13  ;;  %6100 = vmatprep.subr.bf16.mxu1 %v11989_v15  ;;  %v12047_v13 = vld [vmem:[%s14698_s2 + $0x668] ss:$16 sps:$4 sm:$0xff]   ;;  %v12061_v15 = vld [vmem:[%s14698_s2 + $0x68c] ss:$16 sps:$4 sm:$0xff]  }
 0x170   : > { %4177 = vmatmul.mubr.bf16.gmra.mrb[28].mxu0 %v11866_v60  ;;  %5842 = vmatmul.mubr.bf16.gmra.mrb[28].mxu1 %v11866_v60  ;;  %v12005_v60 = vld [vmem:[%s12841_s26 + $0x10] ss:$36 sps:$4 sm:$0xff]  }
 0x171   : > { %4186 = vmatprep.mubr.bf16.mxu0 %v11867_v61  ;;  %5851 = vmatprep.mubr.bf16.mxu1 %v11867_v61  ;;  %v12008_v61 = vld [vmem:[%s14698_s2 + $0x600] ss:$16 sps:$4 sm:$0xff]  }
 0x172   : > { %4436 = vmatpush1.bf16.msra.mxu0 %v11984_v12  ;;  %6101 = vmatpush1.bf16.msra.mxu1 %v11987_v14  ;;  %v12044_v12 = vld [vmem:[%s14698_s2 + $0x660] ss:$16 sps:$4 sm:$0xff]   ;;  %v12058_v14 = vld [vmem:[%s14698_s2 + $0x684] ss:$16 sps:$4 sm:$0xff]  }
 0x173   : > { %4437 = vmatprep.subr.bf16.mxu0 %v11998_v21  ;;  %6102 = vmatprep.subr.bf16.mxu1 %v12001_v23  ;;  %v12072_v21 = vld [vmem:[%s14698_s2 + $0x6ac] ss:$16 sps:$4 sm:$0xff]   ;;  %v12070_v23 = vld [vmem:[%s14698_s2 + $0x6a8] ss:$16 sps:$4 sm:$0xff]  }
 0x176   : > { %4438 = vmatpush1.bf16.msra.mxu0 %v11996_v20  ;;  %6103 = vmatpush1.bf16.msra.mxu1 %v11999_v22  ;;  %v12069_v20 = vld [vmem:[%s14698_s2 + $0x6a4] ss:$16 sps:$4 sm:$0xff]   ;;  %v12067_v22 = vld [vmem:[%s14698_s2 + $0x6a0] ss:$16 sps:$4 sm:$0xff]  }
 0x177   : > { %4740 = vmatprep.subr.bf16.mxu0 %v12010_v28  ;;  %6405 = vmatprep.subr.bf16.mxu1 %v12013_v29  ;;  %v12077_v28 = vld [vmem:[%s14698_s2 + $0x6c0] ss:$16 sps:$4 sm:$0xff]   ;;  %v12080_v29 = vld [vmem:[%s14698_s2 + $0x6c8] ss:$16 sps:$4 sm:$0xff]  }
 0x178   : > { %4187 = vmatmul.mubr.bf16.gmra.mrb[32].mxu0 %v11869_v2  ;;  %5852 = vmatmul.mubr.bf16.gmra.mrb[32].mxu1 %v11869_v2  ;;  %v12020_v2 = vld [vmem:[%s14698_s2 + $0x620] ss:$16 sps:$4 sm:$0xff]  }
 0x179   : > { %4196 = vmatprep.mubr.bf16.mxu0 %v11876_v3  ;;  %5861 = vmatprep.mubr.bf16.mxu1 %v11876_v3  ;;  %v12023_v3 = vld [vmem:[%s14698_s2 + $0x628] ss:$16 sps:$4 sm:$0xff]  }
 0x180   : > { %4197 = vmatmul.mubr.bf16.gmra.mrb[36].mxu0 %v11878_v8  ;;  %5862 = vmatmul.mubr.bf16.gmra.mrb[36].mxu1 %v11878_v8  ;;  %v12032_v8 = vld [vmem:[%s14698_s2 + $0x640] ss:$16 sps:$4 sm:$0xff]  }
 0x181   : > { %4206 = vmatprep.mubr.bf16.mxu0 %v11879_v9  ;;  %5871 = vmatprep.mubr.bf16.mxu1 %v11879_v9  ;;  %v12035_v9 = vld [vmem:[%s14698_s2 + $0x648] ss:$16 sps:$4 sm:$0xff]  }
 0x188   : > { %4207 = vmatmul.mubr.bf16.gmra.mrb[40].mxu0 %v11887_v10  ;;  %5872 = vmatmul.mubr.bf16.gmra.mrb[40].mxu1 %v11887_v10  ;;  %v12046_v10 = vld [vmem:[%s14698_s2 + $0x664] ss:$16 sps:$4 sm:$0xff]  }
 0x189   : > { %4216 = vmatprep.mubr.bf16.mxu0 %v11888_v11  ;;  %5881 = vmatprep.mubr.bf16.mxu1 %v11888_v11  ;;  %v12049_v11 = vld [vmem:[%s14698_s2 + $0x66c] ss:$16 sps:$4 sm:$0xff]  }
 0x190   : > { %4217 = vmatmul.mubr.bf16.gmra.mrb[44].mxu0 %v11890_v16  ;;  %5882 = vmatmul.mubr.bf16.gmra.mrb[44].mxu1 %v11890_v16  ;;  %v12019_v16 = vld [vmem:[%s12841_s26 + $0xa0] ss:$36 sps:$4 sm:$0xff]  }
 0x191   : > { %4226 = vmatprep.mubr.bf16.mxu0 %v11897_v17  ;;  %5891 = vmatprep.mubr.bf16.mxu1 %v11897_v17  ;;  %v12026_v17 = vld [vmem:[%s12841_s26 + $0xec] ss:$36 sps:$4 sm:$0xff]  }
 0x198   : > { %4227 = vmatmul.mubr.bf16.gmra.mrb[48].mxu0 %v11899_v18  ;;  %5892 = vmatmul.mubr.bf16.gmra.mrb[48].mxu1 %v11899_v18  ;;  %v12056_v18 = vld [vmem:[%s14698_s2 + $0x680] ss:$16 sps:$4 sm:$0xff]  }
 0x199   : > { %4236 = vmatprep.mubr.bf16.mxu0 %v11900_v19  ;;  %5901 = vmatprep.mubr.bf16.mxu1 %v11900_v19  ;;  %v12059_v19 = vld [vmem:[%s14698_s2 + $0x688] ss:$16 sps:$4 sm:$0xff]  }
 0x1a0   : > { %4237 = vmatmul.mubr.bf16.gmra.mrb[52].mxu0 %v11902_v24  ;;  %5902 = vmatmul.mubr.bf16.gmra.mrb[52].mxu1 %v11902_v24  ;;  %v12079_v24 = vld [vmem:[%s14698_s2 + $0x6c4] ss:$16 sps:$4 sm:$0xff]  }
 0x1a1   : > { %4246 = vmatprep.mubr.bf16.mxu0 %v11909_v25  ;;  %5911 = vmatprep.mubr.bf16.mxu1 %v11909_v25  ;;  %v12082_v25 = vld [vmem:[%s14698_s2 + $0x6cc] ss:$16 sps:$4 sm:$0xff]  }
 0x1a8   : > { %4247 = vmatmul.mubr.bf16.gmra.mrb[56].mxu0 %v11911_v26  ;;  %5912 = vmatmul.mubr.bf16.gmra.mrb[56].mxu1 %v11911_v26  ;;  %v12028_v26 = vld [vmem:[%s12841_s26 + $0xe8] ss:$36 sps:$4 sm:$0xff]  }
 0x1a9   : > { %4256 = vmatprep.mubr.bf16.mxu0 %v11912_v27  ;;  %5921 = vmatprep.mubr.bf16.mxu1 %v11912_v27  ;;  %v12029_v27 = vld [vmem:[%s12841_s26 + $0x134] ss:$36 sps:$4 sm:$0xff]  }
 0x1b0   : > { %4257 = vmatmul.mubr.bf16.gmra.mrb[60].mxu0 %v11914_v30  ;;  %5922 = vmatmul.mubr.bf16.gmra.mrb[60].mxu1 %v11914_v30  ;;  %v12091_v30 = vld [vmem:[%s14698_s2 + $0x6e4] ss:$16 sps:$4 sm:$0xff]  }
 0x1b1   : > { %4266 = vmatprep.mubr.bf16.mxu0 %v11921_v31  ;;  %5931 = vmatprep.mubr.bf16.mxu1 %v11921_v31  ;;  %v12094_v31 = vld [vmem:[%s14698_s2 + $0x6ec] ss:$16 sps:$4 sm:$0xff]  }
 0x1b8   : > { %4267 = vmatmul.mubr.bf16.gmra.mrb[64].mxu0 %v11923_v32  ;;  %5932 = vmatmul.mubr.bf16.gmra.mrb[64].mxu1 %v11923_v32  ;;  %v12089_v32 = vld [vmem:[%s14698_s2 + $0x6e0] ss:$16 sps:$4 sm:$0xff]  }
 0x1b9   : > { %4276 = vmatprep.mubr.bf16.mxu0 %v11924_v33  ;;  %5941 = vmatprep.mubr.bf16.mxu1 %v11924_v33  ;;  %v12092_v33 = vld [vmem:[%s14698_s2 + $0x6e8] ss:$16 sps:$4 sm:$0xff]  }
 0x1c0   : > { %4277 = vmatmul.mubr.bf16.gmra.mrb[68].mxu0 %v11926_v34  ;;  %5942 = vmatmul.mubr.bf16.gmra.mrb[68].mxu1 %v11926_v34  ;;  %v12103_v34 = vld [vmem:[%s14698_s2 + $0x704] ss:$16 sps:$4 sm:$0xff]  }
 0x1c1   : > { %4286 = vmatprep.mubr.bf16.mxu0 %v11933_v35  ;;  %5951 = vmatprep.mubr.bf16.mxu1 %v11933_v35  ;;  %v12106_v35 = vld [vmem:[%s14698_s2 + $0x70c] ss:$16 sps:$4 sm:$0xff]  }
 0x1c8   : > { %4287 = vmatmul.mubr.bf16.gmra.mrb[72].mxu0 %v11935_v36  ;;  %5952 = vmatmul.mubr.bf16.gmra.mrb[72].mxu1 %v11935_v36  ;;  %v12031_v36 = vld [vmem:[%s12841_s26 + $0x130] ss:$36 sps:$4 sm:$0xff]  }
 0x1c9   : > { %4296 = vmatprep.mubr.bf16.mxu0 %v11936_v37  ;;  %5961 = vmatprep.mubr.bf16.mxu1 %v11936_v37  ;;  %v12038_v37 = vld [vmem:[%s12841_s26 + $0x17c] ss:$36 sps:$4 sm:$0xff]  }
 0x1d0   : > { %4297 = vmatmul.mubr.bf16.gmra.mrb[76].mxu0 %v11938_v38  ;;  %5962 = vmatmul.mubr.bf16.gmra.mrb[76].mxu1 %v11938_v38  ;;  %v12101_v38 = vld [vmem:[%s14698_s2 + $0x700] ss:$16 sps:$4 sm:$0xff]  }
 0x1d1   : > { %4306 = vmatprep.mubr.bf16.mxu0 %v11945_v39  ;;  %5971 = vmatprep.mubr.bf16.mxu1 %v11945_v39  ;;  %v12104_v39 = vld [vmem:[%s14698_s2 + $0x708] ss:$16 sps:$4 sm:$0xff]  }
 0x1d8   : > { %4307 = vmatmul.mubr.bf16.gmra.mrb[80].mxu0 %v11947_v40  ;;  %5972 = vmatmul.mubr.bf16.gmra.mrb[80].mxu1 %v11947_v40  ;;  %v12115_v40 = vld [vmem:[%s14698_s2 + $0x724] ss:$16 sps:$4 sm:$0xff]  }
 0x1d9   : > { %4316 = vmatprep.mubr.bf16.mxu0 %v11948_v41  ;;  %5981 = vmatprep.mubr.bf16.mxu1 %v11948_v41  ;;  %v12118_v41 = vld [vmem:[%s14698_s2 + $0x72c] ss:$16 sps:$4 sm:$0xff]  }
 0x1e0   : > { %4317 = vmatmul.mubr.bf16.gmra.mrb[84].mxu0 %v11950_v42  ;;  %5982 = vmatmul.mubr.bf16.gmra.mrb[84].mxu1 %v11950_v42  ;;  %v12113_v42 = vld [vmem:[%s14698_s2 + $0x720] ss:$16 sps:$4 sm:$0xff]  }
 0x1e1   : > { %4326 = vmatprep.mubr.bf16.mxu0 %v11957_v43  ;;  %5991 = vmatprep.mubr.bf16.mxu1 %v11957_v43  ;;  %v12116_v43 = vld [vmem:[%s14698_s2 + $0x728] ss:$16 sps:$4 sm:$0xff]  }
 0x1e8   : > { %4327 = vmatmul.mubr.bf16.gmra.mrb[88].mxu0 %v11959_v44  ;;  %5992 = vmatmul.mubr.bf16.gmra.mrb[88].mxu1 %v11959_v44  ;;  %v12127_v44 = vld [vmem:[%s14698_s2 + $0x744] ss:$16 sps:$4 sm:$0xff]  }
 0x1e9   : > { %4336 = vmatprep.mubr.bf16.mxu0 %v11960_v45  ;;  %6001 = vmatprep.mubr.bf16.mxu1 %v11960_v45  ;;  %v12130_v45 = vld [vmem:[%s14698_s2 + $0x74c] ss:$16 sps:$4 sm:$0xff]  }
 0x1f0   : > { %4337 = vmatmul.mubr.bf16.gmra.mrb[92].mxu0 %v11962_v46  ;;  %6002 = vmatmul.mubr.bf16.gmra.mrb[92].mxu1 %v11962_v46  ;;  %v12040_v46 = vld [vmem:[%s12841_s26 + $0x178] ss:$36 sps:$4 sm:$0xff]  }
 0x1f1   : > { %4346 = vmatprep.mubr.bf16.mxu0 %v11969_v47  ;;  %6011 = vmatprep.mubr.bf16.mxu1 %v11969_v47  ;;  %v12041_v47 = vld [vmem:[%s12841_s26 + $0x1c4] ss:$36 sps:$4 sm:$0xff]  }
 0x1f8   : > { %4347 = vmatmul.mubr.bf16.gmra.mrb[96].mxu0 %v11971_v48  ;;  %6012 = vmatmul.mubr.bf16.gmra.mrb[96].mxu1 %v11971_v48  ;;  %v12125_v48 = vld [vmem:[%s14698_s2 + $0x740] ss:$16 sps:$4 sm:$0xff]  }
 0x1f9   : > { %4356 = vmatprep.mubr.bf16.mxu0 %v11972_v49  ;;  %6021 = vmatprep.mubr.bf16.mxu1 %v11972_v49  ;;  %v12128_v49 = vld [vmem:[%s14698_s2 + $0x748] ss:$16 sps:$4 sm:$0xff]  }
 0x200   : > { %4357 = vmatmul.mubr.bf16.gmra.mrb[100].mxu0 %v11980_v50  ;;  %6022 = vmatmul.mubr.bf16.gmra.mrb[100].mxu1 %v11980_v50  ;;  %v12139_v50 = vld [vmem:[%s14698_s2 + $0x764] ss:$16 sps:$4 sm:$0xff]  }
 0x201   : > { %4366 = vmatprep.mubr.bf16.mxu0 %v11981_v51  ;;  %6031 = vmatprep.mubr.bf16.mxu1 %v11981_v51  ;;  %v12142_v51 = vld [vmem:[%s14698_s2 + $0x76c] ss:$16 sps:$4 sm:$0xff]  }
 0x208   : > { %4367 = vmatmul.mubr.bf16.gmra.mrb[104].mxu0 %v11983_v52  ;;  %6032 = vmatmul.mubr.bf16.gmra.mrb[104].mxu1 %v11983_v52  ;;  %v12137_v52 = vld [vmem:[%s14698_s2 + $0x760] ss:$16 sps:$4 sm:$0xff]  }
 0x209   : > { %4376 = vmatprep.mubr.bf16.mxu0 %v11990_v53  ;;  %6041 = vmatprep.mubr.bf16.mxu1 %v11990_v53  ;;  %v12140_v53 = vld [vmem:[%s14698_s2 + $0x768] ss:$16 sps:$4 sm:$0xff]  }
 0x210   : > { %4377 = vmatmul.mubr.bf16.gmra.mrb[108].mxu0 %v11992_v54  ;;  %6042 = vmatmul.mubr.bf16.gmra.mrb[108].mxu1 %v11992_v54  ;;  %v12043_v54 = vld [vmem:[%s12841_s26 + $0x1c0] ss:$36 sps:$4 sm:$0xff]  }
 0x211   : > { %4386 = vmatprep.mubr.bf16.mxu0 %v11993_v55  ;;  %6051 = vmatprep.mubr.bf16.mxu1 %v11993_v55  ;;  %v12050_v55 = vld [vmem:[%s12841_s26 + $0x20c] ss:$36 sps:$4 sm:$0xff]  }
 0x218   : > { %4387 = vmatmul.mubr.bf16.gmra.mrb[112].mxu0 %v11995_v56  ;;  %6052 = vmatmul.mubr.bf16.gmra.mrb[112].mxu1 %v11995_v56  ;;  %v12052_v56 = vld [vmem:[%s12841_s26 + $0x208] ss:$36 sps:$4 sm:$0xff]  }
 0x219   : > { %4396 = vmatprep.mubr.bf16.mxu0 %v12002_v57  ;;  %6061 = vmatprep.mubr.bf16.mxu1 %v12002_v57  ;;  %v12053_v57 = vld [vmem:[%s12841_s26 + $0x254] ss:$36 sps:$4 sm:$0xff]  }
 0x220   : > { %4397 = vmatmul.mubr.bf16.gmra.mrb[116].mxu0 %v12004_v58  ;;  %6062 = vmatmul.mubr.bf16.gmra.mrb[116].mxu1 %v12004_v58  ;;  %v12149_v58 = vld [vmem:[%s14698_s2 + $0x780] ss:$16 sps:$4 sm:$0xff]  }
 0x221   : > { %4439 = vmatprep.mubr.bf16.mxu0 %v12007_v59  ;;  %6104 = vmatprep.mubr.bf16.mxu1 %v12007_v59  ;;  %v12151_v59 = vld [vmem:[%s14698_s2 + $0x784] ss:$16 sps:$4 sm:$0xff]  }
 0x228   : > { %4440 = vmatmul.mubr.bf16.vlgmr.msra.gmra.mrb[0].mxu0 %v12005_v60  ;;  %6105 = vmatmul.mubr.bf16.vlgmr.msra.gmra.mrb[0].mxu1 %v12005_v60  ;;  %v12152_v60 = vld [vmem:[%s14698_s2 + $0x788] ss:$16 sps:$4 sm:$0xff]  }
 0x229   : > { %4741 = vmatpush1.bf16.msra.mxu0 %v12008_v61  ;;  %6406 = vmatpush1.bf16.msra.mxu1 %v12011_v62  ;;  %v12154_v61 = vld [vmem:[%s14698_s2 + $0x78c] ss:$16 sps:$4 sm:$0xff]   ;;  %v12055_v62 = vld [vmem:[%s12841_s26 + $0x250] ss:$36 sps:$4 sm:$0xff]  }
 0x22a   : > { %4449 = vmatprep.mubr.bf16.mxu0 %v12014_v63  ;;  %6114 = vmatprep.mubr.bf16.mxu1 %v12014_v63  ;;  %v12062_v63 = vld [vmem:[%s12841_s26 + $0x29c] ss:$36 sps:$4 sm:$0xff]  }
 0x22b   : > { %4742 = vmatprep.subr.bf16.mxu0 %v12022_v0  ;;  %6407 = vmatprep.subr.bf16.mxu1 %v12025_v1  ;;  %v12160_v0 = vld [vmem:[%s14698_s2 + $0x7a0] ss:$16 sps:$4 sm:$0xff]   ;;  %v12162_v1 = vld [vmem:[%s14698_s2 + $0x7a4] ss:$16 sps:$4 sm:$0xff]  }
 0x22d   : > { %4743 = vmatpush1.bf16.msra.mxu0 %v12020_v2  ;;  %6408 = vmatpush1.bf16.msra.mxu1 %v12023_v3  ;;  %v12163_v2 = vld [vmem:[%s14698_s2 + $0x7a8] ss:$16 sps:$4 sm:$0xff]   ;;  %v12165_v3 = vld [vmem:[%s14698_s2 + $0x7ac] ss:$16 sps:$4 sm:$0xff]  }
 0x22e   : > { %4744 = vmatprep.subr.bf16.mxu0 %v12034_v4  ;;  %6409 = vmatprep.subr.bf16.mxu1 %v12037_v5  ;;  %v12064_v4 = vld [vmem:[%s12841_s26 + $0x298] ss:$36 sps:$4 sm:$0xff]   ;;  %v12065_v5 = vld [vmem:[%s12841_s26 + $0x2e4] ss:$36 sps:$4 sm:$0xff]  }
 0x230   : > { %4450 = vmatmul.mubr.bf16.gmra.mrb[4].mxu0 %v12016_v6  ;;  %6115 = vmatmul.mubr.bf16.gmra.mrb[4].mxu1 %v12016_v6  ;;  %v12073_v6 = vld [vmem:[%s12841_s26 + $0x2e0] ss:$36 sps:$4 sm:$0xff]  }
 0x231   : > { %4459 = vmatprep.mubr.bf16.mxu0 %v12017_v7  ;;  %6124 = vmatprep.mubr.bf16.mxu1 %v12017_v7  ;;  %v12074_v7 = vld [vmem:[%s12841_s26 + $0x32c] ss:$36 sps:$4 sm:$0xff]  }
 0x232   : > { %4745 = vmatpush1.bf16.msra.mxu0 %v12032_v8  ;;  %6410 = vmatpush1.bf16.msra.mxu1 %v12035_v9  ;;  %v12170_v8 = vld [vmem:[%s14698_s2 + $0x7c0] ss:$16 sps:$4 sm:$0xff]   ;;  %v12172_v9 = vld [vmem:[%s14698_s2 + $0x7c4] ss:$16 sps:$4 sm:$0xff]  }
 0x233   : > { %4746 = vmatprep.subr.bf16.mxu0 %v12046_v10  ;;  %6411 = vmatprep.subr.bf16.mxu1 %v12049_v11  ;;  %v12173_v10 = vld [vmem:[%s14698_s2 + $0x7c8] ss:$16 sps:$4 sm:$0xff]   ;;  %v12175_v11 = vld [vmem:[%s14698_s2 + $0x7cc] ss:$16 sps:$4 sm:$0xff]  }
 0x236   : > { %4747 = vmatpush1.bf16.msra.mxu0 %v12044_v12  ;;  %6412 = vmatpush1.bf16.msra.mxu1 %v12047_v13  ;;  %v12076_v12 = vld [vmem:[%s12841_s26 + $0x328] ss:$36 sps:$4 sm:$0xff]   ;;  %v12083_v13 = vld [vmem:[%s12841_s26 + $0x374] ss:$36 sps:$4 sm:$0xff]  }
 0x237   : > { %4748 = vmatprep.subr.bf16.mxu0 %v12058_v14  ;;  %6413 = vmatprep.subr.bf16.mxu1 %v12061_v15  ;;  %v12085_v14 = vld [vmem:[%s12841_s26 + $0x370] ss:$36 sps:$4 sm:$0xff]   ;;  %v12086_v15 = vld [vmem:[%s12841_s26 + $0x3bc] ss:$36 sps:$4 sm:$0xff]  }
 0x238   : > { %4460 = vmatmul.mubr.bf16.gmra.mrb[8].mxu0 %v12019_v16  ;;  %6125 = vmatmul.mubr.bf16.gmra.mrb[8].mxu1 %v12019_v16  ;;  %v12182_v16 = vld [vmem:[%s14698_s2 + $0x7e0] ss:$16 sps:$4 sm:$0xff]  }
 0x239   : > { %4469 = vmatprep.mubr.bf16.mxu0 %v12026_v17  ;;  %6134 = vmatprep.mubr.bf16.mxu1 %v12026_v17  ;;  %v12184_v17 = vld [vmem:[%s14698_s2 + $0x7e4] ss:$16 sps:$4 sm:$0xff]  }
 0x23a   : > { %4749 = vmatpush1.bf16.msra.mxu0 %v12056_v18  ;;  %6414 = vmatpush1.bf16.msra.mxu1 %v12059_v19  ;;  %v12185_v18 = vld [vmem:[%s14698_s2 + $0x7e8] ss:$16 sps:$4 sm:$0xff]   ;;  %v12187_v19 = vld [vmem:[%s14698_s2 + $0x7ec] ss:$16 sps:$4 sm:$0xff]  }
 0x23b   : > { %4750 = vmatprep.subr.bf16.mxu0 %v12069_v20  ;;  %6415 = vmatprep.subr.bf16.mxu1 %v12072_v21  ;;  %v12088_v20 = vld [vmem:[%s12841_s26 + $0x3b8] ss:$36 sps:$4 sm:$0xff]   ;;  %v12095_v21 = vld [vmem:[%s12841_s26 + $0x404] ss:$36 sps:$4 sm:$0xff]  }
 0x23e   : > { %4751 = vmatpush1.bf16.msra.mxu0 %v12067_v22  ;;  %6416 = vmatpush1.bf16.msra.mxu1 %v12070_v23  ;;  %v12097_v22 = vld [vmem:[%s12841_s26 + $0x400] ss:$36 sps:$4 sm:$0xff]   ;;  %v12098_v23 = vld [vmem:[%s12841_s26 + $0x44c] ss:$36 sps:$4 sm:$0xff]  }
 0x23f   : > { %4752 = vmatprep.subr.bf16.mxu0 %v12079_v24  ;;  %6417 = vmatprep.subr.bf16.mxu1 %v12082_v25  ;;  %v12196_v24 = vld [vmem:[%s14698_s2 + $0x804] ss:$16 sps:$4 sm:$0xff]   ;;  %v12199_v25 = vld [vmem:[%s14698_s2 + $0x80c] ss:$16 sps:$4 sm:$0xff]  }
 0x240   : > { %4470 = vmatmul.mubr.bf16.gmra.mrb[12].mxu0 %v12028_v26  ;;  %6135 = vmatmul.mubr.bf16.gmra.mrb[12].mxu1 %v12028_v26  ;;  %v12100_v26 = vld [vmem:[%s12841_s26 + $0x448] ss:$36 sps:$4 sm:$0xff]  }
 0x241   : > { %4479 = vmatprep.mubr.bf16.mxu0 %v12029_v27  ;;  %6144 = vmatprep.mubr.bf16.mxu1 %v12029_v27  ;;  %v12107_v27 = vld [vmem:[%s12841_s26 + $0x494] ss:$36 sps:$4 sm:$0xff]  }
 0x242   : > { %4753 = vmatpush1.bf16.msra.mxu0 %v12077_v28  ;;  %6418 = vmatpush1.bf16.msra.mxu1 %v12080_v29  ;;  %v12109_v28 = vld [vmem:[%s12841_s26 + $0x490] ss:$36 sps:$4 sm:$0xff]   ;;  %v12110_v29 = vld [vmem:[%s12841_s26 + $0x4dc] ss:$36 sps:$4 sm:$0xff]  }
 0x243   : > { %4754 = vmatprep.subr.bf16.mxu0 %v12091_v30  ;;  %6419 = vmatprep.subr.bf16.mxu1 %v12094_v31  ;;  %v12112_v30 = vld [vmem:[%s12841_s26 + $0x4d8] ss:$36 sps:$4 sm:$0xff]   ;;  %v12119_v31 = vld [vmem:[%s12841_s26 + $0x524] ss:$36 sps:$4 sm:$0xff]  }
 0x246   : > { %4755 = vmatpush1.bf16.msra.mxu0 %v12089_v32  ;;  %6420 = vmatpush1.bf16.msra.mxu1 %v12092_v33  ;;  %v12121_v32 = vld [vmem:[%s12841_s26 + $0x520] ss:$36 sps:$4 sm:$0xff]   ;;  %v12122_v33 = vld [vmem:[%s12841_s26 + $0x56c] ss:$36 sps:$4 sm:$0xff]  }
 0x247   : > { %4756 = vmatprep.subr.bf16.mxu0 %v12103_v34  ;;  %6421 = vmatprep.subr.bf16.mxu1 %v12106_v35  ;;  %v12124_v34 = vld [vmem:[%s12841_s26 + $0x568] ss:$36 sps:$4 sm:$0xff]   ;;  %v12131_v35 = vld [vmem:[%s12841_s26 + $0x5b4] ss:$36 sps:$4 sm:$0xff]  }
 0x248   : > { %4480 = vmatmul.mubr.bf16.gmra.mrb[16].mxu0 %v12031_v36  ;;  %6145 = vmatmul.mubr.bf16.gmra.mrb[16].mxu1 %v12031_v36  ;;  %v12133_v36 = vld [vmem:[%s12841_s26 + $0x5b0] ss:$36 sps:$4 sm:$0xff]  }
 0x249   : > { %4489 = vmatprep.mubr.bf16.mxu0 %v12038_v37  ;;  %6154 = vmatprep.mubr.bf16.mxu1 %v12038_v37  ;;  %v12134_v37 = vld [vmem:[%s12841_s26 + $0x5fc] ss:$36 sps:$4 sm:$0xff]  }
 0x24a   : > { %4757 = vmatpush1.bf16.msra.mxu0 %v12101_v38  ;;  %6422 = vmatpush1.bf16.msra.mxu1 %v12104_v39  ;;  %v12136_v38 = vld [vmem:[%s12841_s26 + $0x5f8] ss:$36 sps:$4 sm:$0xff]   ;;  %v12143_v39 = vld [vmem:[%s12841_s26 + $0x644] ss:$36 sps:$4 sm:$0xff]  }
 0x24b   : > { %4758 = vmatprep.subr.bf16.mxu0 %v12115_v40  ;;  %6423 = vmatprep.subr.bf16.mxu1 %v12118_v41  ;;  %v12145_v40 = vld [vmem:[%s12841_s26 + $0x640] ss:$36 sps:$4 sm:$0xff]   ;;  %v12146_v41 = vld [vmem:[%s12841_s26 + $0x68c] ss:$36 sps:$4 sm:$0xff]  }
 0x24e   : > { %4759 = vmatpush1.bf16.msra.mxu0 %v12113_v42  ;;  %6424 = vmatpush1.bf16.msra.mxu1 %v12116_v43  ;;  %v12148_v42 = vld [vmem:[%s12841_s26 + $0x688] ss:$36 sps:$4 sm:$0xff]   ;;  %v12155_v43 = vld [vmem:[%s12841_s26 + $0x6d4] ss:$36 sps:$4 sm:$0xff]  }
 0x24f   : > { %4760 = vmatprep.subr.bf16.mxu0 %v12127_v44  ;;  %6425 = vmatprep.subr.bf16.mxu1 %v12130_v45  ;;  %v12157_v44 = vld [vmem:[%s12841_s26 + $0x6d0] ss:$36 sps:$4 sm:$0xff]   ;;  %v12158_v45 = vld [vmem:[%s12841_s26 + $0x71c] ss:$36 sps:$4 sm:$0xff]  }
 0x250   : > { %4490 = vmatmul.mubr.bf16.gmra.mrb[20].mxu0 %v12040_v46  ;;  %6155 = vmatmul.mubr.bf16.gmra.mrb[20].mxu1 %v12040_v46  ;;  %v12166_v46 = vld [vmem:[%s12841_s26 + $0x718] ss:$36 sps:$4 sm:$0xff]  }
 0x251   : > { %4499 = vmatprep.mubr.bf16.mxu0 %v12041_v47  ;;  %6164 = vmatprep.mubr.bf16.mxu1 %v12041_v47  ;;  %v12167_v47 = vld [vmem:[%s12841_s26 + $0x764] ss:$36 sps:$4 sm:$0xff]  }
 0x252   : > { %4761 = vmatpush1.bf16.msra.mxu0 %v12125_v48  ;;  %6426 = vmatpush1.bf16.msra.mxu1 %v12128_v49  ;;  %v12169_v48 = vld [vmem:[%s12841_s26 + $0x760] ss:$36 sps:$4 sm:$0xff]   ;;  %v12176_v49 = vld [vmem:[%s12841_s26 + $0x7ac] ss:$36 sps:$4 sm:$0xff]  }
 0x253   : > { %4762 = vmatprep.subr.bf16.mxu0 %v12139_v50  ;;  %6427 = vmatprep.subr.bf16.mxu1 %v12142_v51  ;;  %v12178_v50 = vld [vmem:[%s12841_s26 + $0x7a8] ss:$36 sps:$4 sm:$0xff]   ;;  %v12179_v51 = vld [vmem:[%s12841_s26 + $0x7f4] ss:$36 sps:$4 sm:$0xff]  }
 0x256   : > { %4763 = vmatpush1.bf16.msra.mxu0 %v12137_v52  ;;  %6428 = vmatpush1.bf16.msra.mxu1 %v12140_v53  ;;  %v12181_v52 = vld [vmem:[%s12841_s26 + $0x7f0] ss:$36 sps:$4 sm:$0xff]   ;;  %v12188_v53 = vld [vmem:[%s12841_s26 + $0x83c] ss:$36 sps:$4 sm:$0xff]  }
 0x257   : > { %4764 = vmatprep.subr.bf16.mxu0 %v12151_v59  ;;  %6429 = vmatprep.subr.bf16.mxu1 %v12154_v61  ;;  %v12200_v59 = vld [vmem:[%s12841_s26 + $0x64] ss:$36 sps:$4 sm:$0xff]   ;;  %v12229_v61 = vld [vmem:[%s14698_s2 + $0x82c] ss:$16 sps:$4 sm:$0xff]  }
 0x258   : > { %4500 = vmatmul.mubr.bf16.gmra.mrb[24].mxu0 %v12043_v54  ;;  %6165 = vmatmul.mubr.bf16.gmra.mrb[24].mxu1 %v12043_v54  ;;  %v12190_v54 = vld [vmem:[%s12841_s26 + $0x838] ss:$36 sps:$4 sm:$0xff]  }
 0x259   : > { %4509 = vmatprep.mubr.bf16.mxu0 %v12050_v55  ;;  %6174 = vmatprep.mubr.bf16.mxu1 %v12050_v55  ;;  %v12193_v55 = vld [vmem:[%s12841_s26 + $0x1c] ss:$36 sps:$4 sm:$0xff]  }
 0x25a   : > { %4765 = vmatpush1.bf16.msra.mxu0 %v12149_v58  ;;  %6430 = vmatpush1.bf16.msra.mxu1 %v12152_v60  ;;  %v12197_v58 = vld [vmem:[%s14698_s2 + $0x808] ss:$16 sps:$4 sm:$0xff]   ;;  %v12226_v60 = vld [vmem:[%s14698_s2 + $0x824] ss:$16 sps:$4 sm:$0xff]  }
 0x25b   : > { %4766 = vmatprep.subr.bf16.mxu0 %v12162_v1  ;;  %6431 = vmatprep.subr.bf16.mxu1 %v12165_v3  ;;  %v12256_v1 = vld [vmem:[%s14698_s2 + $0x84c] ss:$16 sps:$4 sm:$0xff]  }
 0x25c   : > { %v12203_v3 = vld [vmem:[%s12841_s26 + $0xac] ss:$36 sps:$4 sm:$0xff]  }
 0x25e   : > { %4767 = vmatpush1.bf16.msra.mxu0 %v12160_v0  ;;  %6432 = vmatpush1.bf16.msra.mxu1 %v12163_v2  ;;  %v12253_v0 = vld [vmem:[%s14698_s2 + $0x844] ss:$16 sps:$4 sm:$0xff]  }
 0x25f   : > { %4768 = vmatprep.subr.bf16.mxu0 %v12172_v9  ;;  %6433 = vmatprep.subr.bf16.mxu1 %v12175_v11  ;;  %v12202_v2 = vld [vmem:[%s12841_s26 + $0x60] ss:$36 sps:$4 sm:$0xff]  }
 0x260   : > { %4510 = vmatmul.mubr.bf16.gmra.mrb[28].mxu0 %v12052_v56  ;;  %6175 = vmatmul.mubr.bf16.gmra.mrb[28].mxu1 %v12052_v56  ;;  %v12191_v56 = vld [vmem:[%s12841_s26 + $0x18] ss:$36 sps:$4 sm:$0xff]   ;;  %v12212_v11 = vld [vmem:[%s12841_s26 + $0x184] ss:$36 sps:$4 sm:$0xff]  }
 0x261   : > { %4519 = vmatprep.mubr.bf16.mxu0 %v12053_v57  ;;  %6184 = vmatprep.mubr.bf16.mxu1 %v12053_v57  ;;  %v12194_v57 = vld [vmem:[%s14698_s2 + $0x800] ss:$16 sps:$4 sm:$0xff]  }
 0x262   : > { %4769 = vmatpush1.bf16.msra.mxu0 %v12170_v8  ;;  %6434 = vmatpush1.bf16.msra.mxu1 %v12173_v10  ;;  %v12208_v8 = vld [vmem:[%s12841_s26 + $0xf0] ss:$36 sps:$4 sm:$0xff]   ;;  %v12209_v9 = vld [vmem:[%s12841_s26 + $0x13c] ss:$36 sps:$4 sm:$0xff]  }
 0x263   : > { %4770 = vmatprep.subr.bf16.mxu0 %v12184_v17  ;;  %6435 = vmatprep.subr.bf16.mxu1 %v12187_v19  ;;  %v12211_v10 = vld [vmem:[%s12841_s26 + $0x138] ss:$36 sps:$4 sm:$0xff]   ;;  %v936_v19 = vld [vmem:[%s14698_s2 + $0x868] sm:$0xff] }
 0x264   : > { %v12221_v17 = vld [vmem:[%s12841_s26 + $0x25c] ss:$36 sps:$4 sm:$0xff]  }
 0x266   : > { %4771 = vmatpush1.bf16.msra.mxu0 %v12182_v16  ;;  %6436 = vmatpush1.bf16.msra.mxu1 %v12185_v18  ;;  %v12220_v16 = vld [vmem:[%s12841_s26 + $0x210] ss:$36 sps:$4 sm:$0xff]   ;;  %v935_v18 = vld [vmem:[%s14698_s2 + $0x860] sm:$0xff] }
 0x267   : > { %5073 = vmatprep.subr.bf16.mxu0 %v12196_v24  ;;  %6738 = vmatprep.subr.bf16.mxu1 %v12199_v25  ;;  %v12223_v25 = vld [vmem:[%s12841_s26 + $0x258] ss:$36 sps:$4 sm:$0xff]  }
 0x268   : > { %4520 = vmatmul.mubr.bf16.gmra.mrb[32].mxu0 %v12055_v62  ;;  %6185 = vmatmul.mubr.bf16.gmra.mrb[32].mxu1 %v12055_v62  ;;  %v12224_v62 = vld [vmem:[%s14698_s2 + $0x820] ss:$16 sps:$4 sm:$0xff]  }
 0x269   : > { %4529 = vmatprep.mubr.bf16.mxu0 %v12062_v63  ;;  %6194 = vmatprep.mubr.bf16.mxu1 %v12062_v63  ;;  %v12227_v63 = vld [vmem:[%s14698_s2 + $0x828] ss:$16 sps:$4 sm:$0xff]  }
 0x270   : > { %4530 = vmatmul.mubr.bf16.gmra.mrb[36].mxu0 %v12064_v4  ;;  %6195 = vmatmul.mubr.bf16.gmra.mrb[36].mxu1 %v12064_v4  ;;  %v12251_v4 = vld [vmem:[%s14698_s2 + $0x840] ss:$16 sps:$4 sm:$0xff]  }
 0x271   : > { %4539 = vmatprep.mubr.bf16.mxu0 %v12065_v5  ;;  %6204 = vmatprep.mubr.bf16.mxu1 %v12065_v5  ;;  %v12254_v5 = vld [vmem:[%s14698_s2 + $0x848] ss:$16 sps:$4 sm:$0xff]  }
 0x278   : > { %4540 = vmatmul.mubr.bf16.gmra.mrb[40].mxu0 %v12073_v6  ;;  %6205 = vmatmul.mubr.bf16.gmra.mrb[40].mxu1 %v12073_v6  ;;  %v12205_v6 = vld [vmem:[%s12841_s26 + $0xa8] ss:$36 sps:$4 sm:$0xff]  }
 0x279   : > { %4549 = vmatprep.mubr.bf16.mxu0 %v12074_v7  ;;  %6214 = vmatprep.mubr.bf16.mxu1 %v12074_v7  ;;  %v12206_v7 = vld [vmem:[%s12841_s26 + $0xf4] ss:$36 sps:$4 sm:$0xff]  }
 0x280   : > { %4550 = vmatmul.mubr.bf16.gmra.mrb[44].mxu0 %v12076_v12  ;;  %6215 = vmatmul.mubr.bf16.gmra.mrb[44].mxu1 %v12076_v12  ;;  %v12214_v12 = vld [vmem:[%s12841_s26 + $0x180] ss:$36 sps:$4 sm:$0xff]  }
 0x281   : > { %4559 = vmatprep.mubr.bf16.mxu0 %v12083_v13  ;;  %6224 = vmatprep.mubr.bf16.mxu1 %v12083_v13  ;;  %v12215_v13 = vld [vmem:[%s12841_s26 + $0x1cc] ss:$36 sps:$4 sm:$0xff]  }
 0x288   : > { %4560 = vmatmul.mubr.bf16.gmra.mrb[48].mxu0 %v12085_v14  ;;  %6225 = vmatmul.mubr.bf16.gmra.mrb[48].mxu1 %v12085_v14  ;;  %v12217_v14 = vld [vmem:[%s12841_s26 + $0x1c8] ss:$36 sps:$4 sm:$0xff]  }
 0x289   : > { %4569 = vmatprep.mubr.bf16.mxu0 %v12086_v15  ;;  %6234 = vmatprep.mubr.bf16.mxu1 %v12086_v15  ;;  %v12218_v15 = vld [vmem:[%s12841_s26 + $0x214] ss:$36 sps:$4 sm:$0xff]  }
 0x290   : > { %4570 = vmatmul.mubr.bf16.gmra.mrb[52].mxu0 %v12088_v20  ;;  %6235 = vmatmul.mubr.bf16.gmra.mrb[52].mxu1 %v12088_v20  ;;  %v10128_v20 = vcombine.high %v935_v18, %v935_v18 }
 0x291   : > { %4579 = vmatprep.mubr.bf16.mxu0 %v12095_v21  ;;  %6244 = vmatprep.mubr.bf16.mxu1 %v12095_v21  ;;  %v10130_v21 = vcombine.high %v936_v19, %v936_v19 }
 0x298   : > { %4580 = vmatmul.mubr.bf16.gmra.mrb[56].mxu0 %v12097_v22  ;;  %6245 = vmatmul.mubr.bf16.gmra.mrb[56].mxu1 %v12097_v22  ;;  %v10127_v22 = vcombine.low %v935_v18, %v935_v18  ;;  %v12333_v18 = vld [vmem:[%s14700_s4 + $0x20] ss:$16 sps:$4 sm:$0xff]  }
 0x299   : > { %4589 = vmatprep.mubr.bf16.mxu0 %v12098_v23  ;;  %6254 = vmatprep.mubr.bf16.mxu1 %v12098_v23  ;;  %v10129_v23 = vcombine.low %v936_v19, %v936_v19  ;;  %v12335_v19 = vld [vmem:[%s14700_s4 + $0x24] ss:$16 sps:$4 sm:$0xff]  }
 0x29a   : > { %v3730_v24 = vsel %vm3728_vm0, %v10127_v22, 0  ;;  %v12311_v22 = vld [vmem:[%s12841_s26 + $0x260] ss:$36 sps:$4 sm:$0xff]  }
 0x2a0   : > { %4590 = vmatmul.mubr.bf16.gmra.mrb[60].mxu0 %v12100_v26  ;;  %6255 = vmatmul.mubr.bf16.gmra.mrb[60].mxu1 %v12100_v26  ;;  %v3736_v26 = vsel %vm3728_vm0, %v10129_v23, 0  ;;  %v12312_v23 = vld [vmem:[%s12841_s26 + $0x2a8] ss:$36 sps:$4 sm:$0xff]  }
 0x2a1   : > { %4599 = vmatprep.mubr.bf16.mxu0 %v12107_v27  ;;  %6264 = vmatprep.mubr.bf16.mxu1 %v12107_v27  ;;  %v12230_v27 = vld [vmem:[%s12841_s26 + $0x2a4] ss:$36 sps:$4 sm:$0xff]  }
 0x2a8   : > { %4600 = vmatmul.mubr.bf16.gmra.mrb[64].mxu0 %v12109_v28  ;;  %6265 = vmatmul.mubr.bf16.gmra.mrb[64].mxu1 %v12109_v28  ;;  %v12232_v28 = vld [vmem:[%s12841_s26 + $0x2a0] ss:$36 sps:$4 sm:$0xff]  }
 0x2a9   : > { %4609 = vmatprep.mubr.bf16.mxu0 %v12110_v29  ;;  %6274 = vmatprep.mubr.bf16.mxu1 %v12110_v29  ;;  %v12233_v29 = vld [vmem:[%s12841_s26 + $0x2ec] ss:$36 sps:$4 sm:$0xff]  }
 0x2b0   : > { %4610 = vmatmul.mubr.bf16.gmra.mrb[68].mxu0 %v12112_v30  ;;  %6275 = vmatmul.mubr.bf16.gmra.mrb[68].mxu1 %v12112_v30  ;;  %v12235_v30 = vld [vmem:[%s12841_s26 + $0x2e8] ss:$36 sps:$4 sm:$0xff]  }
 0x2b1   : > { %4619 = vmatprep.mubr.bf16.mxu0 %v12119_v31  ;;  %6284 = vmatprep.mubr.bf16.mxu1 %v12119_v31  ;;  %v12236_v31 = vld [vmem:[%s12841_s26 + $0x334] ss:$36 sps:$4 sm:$0xff]  }
 0x2b8   : > { %4620 = vmatmul.mubr.bf16.gmra.mrb[72].mxu0 %v12121_v32  ;;  %6285 = vmatmul.mubr.bf16.gmra.mrb[72].mxu1 %v12121_v32  ;;  %v12238_v32 = vld [vmem:[%s12841_s26 + $0x330] ss:$36 sps:$4 sm:$0xff]  }
 0x2b9   : > { %4629 = vmatprep.mubr.bf16.mxu0 %v12122_v33  ;;  %6294 = vmatprep.mubr.bf16.mxu1 %v12122_v33  ;;  %v12239_v33 = vld [vmem:[%s12841_s26 + $0x37c] ss:$36 sps:$4 sm:$0xff]  }
 0x2c0   : > { %4630 = vmatmul.mubr.bf16.gmra.mrb[76].mxu0 %v12124_v34  ;;  %6295 = vmatmul.mubr.bf16.gmra.mrb[76].mxu1 %v12124_v34  ;;  %v12241_v34 = vld [vmem:[%s12841_s26 + $0x378] ss:$36 sps:$4 sm:$0xff]  }
 0x2c1   : > { %4639 = vmatprep.mubr.bf16.mxu0 %v12131_v35  ;;  %6304 = vmatprep.mubr.bf16.mxu1 %v12131_v35  ;;  %v12242_v35 = vld [vmem:[%s12841_s26 + $0x3c4] ss:$36 sps:$4 sm:$0xff]  }
 0x2c8   : > { %4640 = vmatmul.mubr.bf16.gmra.mrb[80].mxu0 %v12133_v36  ;;  %6305 = vmatmul.mubr.bf16.gmra.mrb[80].mxu1 %v12133_v36  ;;  %v12244_v36 = vld [vmem:[%s12841_s26 + $0x3c0] ss:$36 sps:$4 sm:$0xff]  }
 0x2c9   : > { %4649 = vmatprep.mubr.bf16.mxu0 %v12134_v37  ;;  %6314 = vmatprep.mubr.bf16.mxu1 %v12134_v37  ;;  %v12245_v37 = vld [vmem:[%s12841_s26 + $0x40c] ss:$36 sps:$4 sm:$0xff]  }
 0x2d0   : > { %4650 = vmatmul.mubr.bf16.gmra.mrb[84].mxu0 %v12136_v38  ;;  %6315 = vmatmul.mubr.bf16.gmra.mrb[84].mxu1 %v12136_v38  ;;  %v12247_v38 = vld [vmem:[%s12841_s26 + $0x408] ss:$36 sps:$4 sm:$0xff]  }
 0x2d1   : > { %4659 = vmatprep.mubr.bf16.mxu0 %v12143_v39  ;;  %6324 = vmatprep.mubr.bf16.mxu1 %v12143_v39  ;;  %v12248_v39 = vld [vmem:[%s12841_s26 + $0x454] ss:$36 sps:$4 sm:$0xff]  }
 0x2d8   : > { %4660 = vmatmul.mubr.bf16.gmra.mrb[88].mxu0 %v12145_v40  ;;  %6325 = vmatmul.mubr.bf16.gmra.mrb[88].mxu1 %v12145_v40  ;;  %v12250_v40 = vld [vmem:[%s12841_s26 + $0x450] ss:$36 sps:$4 sm:$0xff]  }
 0x2d9   : > { %4669 = vmatprep.mubr.bf16.mxu0 %v12146_v41  ;;  %6334 = vmatprep.mubr.bf16.mxu1 %v12146_v41  ;;  %v12257_v41 = vld [vmem:[%s12841_s26 + $0x49c] ss:$36 sps:$4 sm:$0xff]  }
 0x2e0   : > { %4670 = vmatmul.mubr.bf16.gmra.mrb[92].mxu0 %v12148_v42  ;;  %6335 = vmatmul.mubr.bf16.gmra.mrb[92].mxu1 %v12148_v42  ;;  %v12259_v42 = vld [vmem:[%s12841_s26 + $0x498] ss:$36 sps:$4 sm:$0xff]  }
 0x2e1   : > { %4679 = vmatprep.mubr.bf16.mxu0 %v12155_v43  ;;  %6344 = vmatprep.mubr.bf16.mxu1 %v12155_v43  ;;  %v12260_v43 = vld [vmem:[%s12841_s26 + $0x4e4] ss:$36 sps:$4 sm:$0xff]  }
 0x2e8   : > { %4680 = vmatmul.mubr.bf16.gmra.mrb[96].mxu0 %v12157_v44  ;;  %6345 = vmatmul.mubr.bf16.gmra.mrb[96].mxu1 %v12157_v44  ;;  %v12262_v44 = vld [vmem:[%s12841_s26 + $0x4e0] ss:$36 sps:$4 sm:$0xff]  }
 0x2e9   : > { %4689 = vmatprep.mubr.bf16.mxu0 %v12158_v45  ;;  %6354 = vmatprep.mubr.bf16.mxu1 %v12158_v45  ;;  %v12263_v45 = vld [vmem:[%s12841_s26 + $0x52c] ss:$36 sps:$4 sm:$0xff]  }
 0x2f0   : > { %4690 = vmatmul.mubr.bf16.gmra.mrb[100].mxu0 %v12166_v46  ;;  %6355 = vmatmul.mubr.bf16.gmra.mrb[100].mxu1 %v12166_v46  ;;  %v12265_v46 = vld [vmem:[%s12841_s26 + $0x528] ss:$36 sps:$4 sm:$0xff]  }
 0x2f1   : > { %4699 = vmatprep.mubr.bf16.mxu0 %v12167_v47  ;;  %6364 = vmatprep.mubr.bf16.mxu1 %v12167_v47  ;;  %v12266_v47 = vld [vmem:[%s12841_s26 + $0x574] ss:$36 sps:$4 sm:$0xff]  }
 0x2f8   : > { %4700 = vmatmul.mubr.bf16.gmra.mrb[104].mxu0 %v12169_v48  ;;  %6365 = vmatmul.mubr.bf16.gmra.mrb[104].mxu1 %v12169_v48  ;;  %v12268_v48 = vld [vmem:[%s12841_s26 + $0x570] ss:$36 sps:$4 sm:$0xff]  }
 0x2f9   : > { %4709 = vmatprep.mubr.bf16.mxu0 %v12176_v49  ;;  %6374 = vmatprep.mubr.bf16.mxu1 %v12176_v49  ;;  %v12269_v49 = vld [vmem:[%s12841_s26 + $0x5bc] ss:$36 sps:$4 sm:$0xff]  }
 0x300   : > { %4710 = vmatmul.mubr.bf16.gmra.mrb[108].mxu0 %v12178_v50  ;;  %6375 = vmatmul.mubr.bf16.gmra.mrb[108].mxu1 %v12178_v50  ;;  %v12271_v50 = vld [vmem:[%s12841_s26 + $0x5b8] ss:$36 sps:$4 sm:$0xff]  }
 0x301   : > { %4719 = vmatprep.mubr.bf16.mxu0 %v12179_v51  ;;  %6384 = vmatprep.mubr.bf16.mxu1 %v12179_v51  ;;  %v12272_v51 = vld [vmem:[%s12841_s26 + $0x604] ss:$36 sps:$4 sm:$0xff]  }
 0x308   : > { %4720 = vmatmul.mubr.bf16.gmra.mrb[112].mxu0 %v12181_v52  ;;  %6385 = vmatmul.mubr.bf16.gmra.mrb[112].mxu1 %v12181_v52  ;;  %v12274_v52 = vld [vmem:[%s12841_s26 + $0x600] ss:$36 sps:$4 sm:$0xff]  }
 0x309   : > { %4729 = vmatprep.mubr.bf16.mxu0 %v12188_v53  ;;  %6394 = vmatprep.mubr.bf16.mxu1 %v12188_v53  ;;  %v12275_v53 = vld [vmem:[%s12841_s26 + $0x64c] ss:$36 sps:$4 sm:$0xff]  }
 0x310   : > { %4730 = vmatmul.mubr.bf16.gmra.mrb[116].mxu0 %v12190_v54  ;;  %6395 = vmatmul.mubr.bf16.gmra.mrb[116].mxu1 %v12190_v54  ;;  %v12277_v54 = vld [vmem:[%s12841_s26 + $0x648] ss:$36 sps:$4 sm:$0xff]  }
 0x311   : > { %4772 = vmatprep.mubr.bf16.mxu0 %v12193_v55  ;;  %6437 = vmatprep.mubr.bf16.mxu1 %v12193_v55  ;;  %v12278_v55 = vld [vmem:[%s12841_s26 + $0x694] ss:$36 sps:$4 sm:$0xff]  }
 0x318   : > { %4773 = vmatmul.mubr.bf16.vlgmr.msra.gmra.mrb[0].mxu0 %v12191_v56  ;;  %6438 = vmatmul.mubr.bf16.vlgmr.msra.gmra.mrb[0].mxu1 %v12191_v56  ;;  %v12280_v56 = vld [vmem:[%s12841_s26 + $0x690] ss:$36 sps:$4 sm:$0xff]  }
 0x319   : > { %5074 = vmatpush1.bf16.msra.mxu0 %v12194_v57  ;;  %6739 = vmatpush1.bf16.msra.mxu1 %v12197_v58  ;;  %v12285_v57 = vld [vmem:[%s12841_s26 + $0x6dc] ss:$36 sps:$4 sm:$0xff]  }
 0x31a   : > { %4782 = vmatprep.mubr.bf16.mxu0 %v12200_v59  ;;  %6447 = vmatprep.mubr.bf16.mxu1 %v12200_v59  ;;  %v12287_v58 = vld [vmem:[%s12841_s26 + $0x6d8] ss:$36 sps:$4 sm:$0xff]   ;;  %v12288_v59 = vld [vmem:[%s12841_s26 + $0x724] ss:$36 sps:$4 sm:$0xff]  }
 0x31b   : > { %5075 = vmatprep.subr.bf16.mxu0 %v12226_v60  ;;  %6740 = vmatprep.subr.bf16.mxu1 %v12229_v61  ;;  %v12290_v60 = vld [vmem:[%s12841_s26 + $0x720] ss:$36 sps:$4 sm:$0xff]   ;;  %v12291_v61 = vld [vmem:[%s12841_s26 + $0x76c] ss:$36 sps:$4 sm:$0xff]  }
 0x31d   : > { %5076 = vmatpush1.bf16.msra.mxu0 %v12224_v62  ;;  %6741 = vmatpush1.bf16.msra.mxu1 %v12227_v63  ;;  %v12293_v62 = vld [vmem:[%s12841_s26 + $0x768] ss:$36 sps:$4 sm:$0xff]   ;;  %v12294_v63 = vld [vmem:[%s12841_s26 + $0x7b4] ss:$36 sps:$4 sm:$0xff]  }
 0x31e   : > { %5077 = vmatprep.subr.bf16.mxu0 %v12253_v0  ;;  %6742 = vmatprep.subr.bf16.mxu1 %v12256_v1  ;;  %v12296_v0 = vld [vmem:[%s12841_s26 + $0x7b0] ss:$36 sps:$4 sm:$0xff]   ;;  %v12297_v1 = vld [vmem:[%s12841_s26 + $0x7fc] ss:$36 sps:$4 sm:$0xff]  }
 0x320   : > { %4783 = vmatmul.mubr.bf16.gmra.mrb[4].mxu0 %v12202_v2  ;;  %6448 = vmatmul.mubr.bf16.gmra.mrb[4].mxu1 %v12202_v2  ;;  %v12299_v2 = vld [vmem:[%s12841_s26 + $0x7f8] ss:$36 sps:$4 sm:$0xff]  }
 0x321   : > { %4792 = vmatprep.mubr.bf16.mxu0 %v12203_v3  ;;  %6457 = vmatprep.mubr.bf16.mxu1 %v12203_v3  ;;  %v12300_v3 = vld [vmem:[%s12841_s26 + $0x844] ss:$36 sps:$4 sm:$0xff]  }
 0x322   : > { %5078 = vmatpush1.bf16.msra.mxu0 %v12251_v4  ;;  %6743 = vmatpush1.bf16.msra.mxu1 %v12254_v5  ;;  %v12302_v4 = vld [vmem:[%s12841_s26 + $0x840] ss:$36 sps:$4 sm:$0xff]   ;;  %v12638_v5 = vmov 0  }
 0x323   : > { %10131 = vmatprep.subr.msk.bf16.mxu0 %vm3728_vm0, %v10128_v20  ;;  %10162 = vmatprep.subr.msk.bf16.mxu1 %vm3728_vm0, %v10130_v21  ;;  %v12336_v20 = vld [vmem:[%s14700_s4 + $0x28] ss:$16 sps:$4 sm:$0xff]   ;;  %v12338_v21 = vld [vmem:[%s14700_s4 + $0x2c] ss:$16 sps:$4 sm:$0xff]  }
 0x326   : > { %5080 = vmatpush1.bf16.msra.mxu0 %v3730_v24  ;;  %6745 = vmatpush1.bf16.msra.mxu1 %v3736_v26  ;;  %v12341_v24 = vld [vmem:[%s14700_s4 + $0x40] ss:$16 sps:$4 sm:$0xff]   ;;  %v12344_v26 = vld [vmem:[%s14700_s4 + $0x48] ss:$16 sps:$4 sm:$0xff]  }
 0x328   : > { %4793 = vmatmul.mubr.bf16.gmra.mrb[8].mxu0 %v12205_v6  ;;  %6458 = vmatmul.mubr.bf16.gmra.mrb[8].mxu1 %v12205_v6  ;;  %v12303_v6 = vld [vmem:[%s12841_s26 + $0x20] ss:$36 sps:$4 sm:$0xff]  }
 0x329   : > { %4802 = vmatprep.mubr.bf16.mxu0 %v12206_v7  ;;  %6467 = vmatprep.mubr.bf16.mxu1 %v12206_v7  ;;  %v12304_v7 = vld [vmem:[%s12841_s26 + $0x68] ss:$36 sps:$4 sm:$0xff]  }
 0x330   : > { %4803 = vmatmul.mubr.bf16.gmra.mrb[12].mxu0 %v12208_v8  ;;  %6468 = vmatmul.mubr.bf16.gmra.mrb[12].mxu1 %v12208_v8  ;;  %v12305_v8 = vld [vmem:[%s12841_s26 + $0xb0] ss:$36 sps:$4 sm:$0xff]  }
 0x331   : > { %4812 = vmatprep.mubr.bf16.mxu0 %v12209_v9  ;;  %6477 = vmatprep.mubr.bf16.mxu1 %v12209_v9  ;;  %v12306_v9 = vld [vmem:[%s12841_s26 + $0xf8] ss:$36 sps:$4 sm:$0xff]  }
 0x338   : > { %4813 = vmatmul.mubr.bf16.gmra.mrb[16].mxu0 %v12211_v10  ;;  %6478 = vmatmul.mubr.bf16.gmra.mrb[16].mxu1 %v12211_v10  ;;  %v12307_v10 = vld [vmem:[%s12841_s26 + $0x140] ss:$36 sps:$4 sm:$0xff]  }
 0x339   : > { %4822 = vmatprep.mubr.bf16.mxu0 %v12212_v11  ;;  %6487 = vmatprep.mubr.bf16.mxu1 %v12212_v11  ;;  %v12308_v11 = vld [vmem:[%s12841_s26 + $0x188] ss:$36 sps:$4 sm:$0xff]  }
 0x340   : > { %4823 = vmatmul.mubr.bf16.gmra.mrb[20].mxu0 %v12214_v12  ;;  %6488 = vmatmul.mubr.bf16.gmra.mrb[20].mxu1 %v12214_v12  ;;  %v12325_v12 = vld [vmem:[%s14700_s4] ss:$16 sps:$4 sm:$0xff]  }
 0x341   : > { %4832 = vmatprep.mubr.bf16.mxu0 %v12215_v13  ;;  %6497 = vmatprep.mubr.bf16.mxu1 %v12215_v13  ;;  %v12327_v13 = vld [vmem:[%s14700_s4 + $0x4] ss:$16 sps:$4 sm:$0xff]  }
 0x342   : > { %8761 = vmatprep.subr.bf16.mxu0 %v12327_v13  ;;  %v12413_v13 = vld [vmem:[%s14700_s4 + $0x1a4] ss:$16 sps:$4 sm:$0xff]  }
 0x348   : > { %4833 = vmatmul.mubr.bf16.gmra.mrb[24].mxu0 %v12217_v14  ;;  %6498 = vmatmul.mubr.bf16.gmra.mrb[24].mxu1 %v12217_v14  ;;  %v12328_v14 = vld [vmem:[%s14700_s4 + $0x8] ss:$16 sps:$4 sm:$0xff]  }
 0x349   : > { %4842 = vmatprep.mubr.bf16.mxu0 %v12218_v15  ;;  %6507 = vmatprep.mubr.bf16.mxu1 %v12218_v15  ;;  %v12330_v15 = vld [vmem:[%s14700_s4 + $0xc] ss:$16 sps:$4 sm:$0xff]  }
 0x34a   : > { %9010 = vmatprep.subr.bf16.mxu1 %v12330_v15  ;;  %v12411_v15 = vld [vmem:[%s14700_s4 + $0x1a0] ss:$16 sps:$4 sm:$0xff]  }
 0x350   : > { %4843 = vmatmul.mubr.bf16.gmra.mrb[28].mxu0 %v12220_v16  ;;  %6508 = vmatmul.mubr.bf16.gmra.mrb[28].mxu1 %v12220_v16  ;;  %v12309_v16 = vld [vmem:[%s12841_s26 + $0x1d0] ss:$36 sps:$4 sm:$0xff]  }
 0x351   : > { %4852 = vmatprep.mubr.bf16.mxu0 %v12221_v17  ;;  %6517 = vmatprep.mubr.bf16.mxu1 %v12221_v17  ;;  %v12310_v17 = vld [vmem:[%s12841_s26 + $0x218] ss:$36 sps:$4 sm:$0xff]  }
 0x358   : > { %4853 = vmatmul.mubr.bf16.gmra.mrb[32].mxu0 %v12223_v25  ;;  %6518 = vmatmul.mubr.bf16.gmra.mrb[32].mxu1 %v12223_v25  ;;  %v12343_v25 = vld [vmem:[%s14700_s4 + $0x44] ss:$16 sps:$4 sm:$0xff]  }
 0x359   : > { %4862 = vmatprep.mubr.bf16.mxu0 %v12230_v27  ;;  %6527 = vmatprep.mubr.bf16.mxu1 %v12230_v27  ;;  %v12346_v27 = vld [vmem:[%s14700_s4 + $0x4c] ss:$16 sps:$4 sm:$0xff]  }
 0x360   : > { %4863 = vmatmul.mubr.bf16.gmra.mrb[36].mxu0 %v12232_v28  ;;  %6528 = vmatmul.mubr.bf16.gmra.mrb[36].mxu1 %v12232_v28  ;;  %v12313_v28 = vld [vmem:[%s12841_s26 + $0x2f0] ss:$36 sps:$4 sm:$0xff]  }
 0x361   : > { %4872 = vmatprep.mubr.bf16.mxu0 %v12233_v29  ;;  %6537 = vmatprep.mubr.bf16.mxu1 %v12233_v29  ;;  %v12314_v29 = vld [vmem:[%s12841_s26 + $0x338] ss:$36 sps:$4 sm:$0xff]  }
 0x368   : > { %4873 = vmatmul.mubr.bf16.gmra.mrb[40].mxu0 %v12235_v30  ;;  %6538 = vmatmul.mubr.bf16.gmra.mrb[40].mxu1 %v12235_v30  ;;  %v12315_v30 = vld [vmem:[%s12841_s26 + $0x380] ss:$36 sps:$4 sm:$0xff]  }
 0x369   : > { %4882 = vmatprep.mubr.bf16.mxu0 %v12236_v31  ;;  %6547 = vmatprep.mubr.bf16.mxu1 %v12236_v31  ;;  %v12351_v31 = vld [vmem:[%s14700_s4 + $0x64] ss:$16 sps:$4 sm:$0xff]  }
 0x370   : > { %4883 = vmatmul.mubr.bf16.gmra.mrb[44].mxu0 %v12238_v32  ;;  %6548 = vmatmul.mubr.bf16.gmra.mrb[44].mxu1 %v12238_v32  ;;  %v12354_v32 = vld [vmem:[%s14700_s4 + $0x6c] ss:$16 sps:$4 sm:$0xff]  }
 0x371   : > { %4892 = vmatprep.mubr.bf16.mxu0 %v12239_v33  ;;  %6557 = vmatprep.mubr.bf16.mxu1 %v12239_v33  ;;  %v12349_v33 = vld [vmem:[%s14700_s4 + $0x60] ss:$16 sps:$4 sm:$0xff]  }
 0x378   : > { %4893 = vmatmul.mubr.bf16.gmra.mrb[48].mxu0 %v12241_v34  ;;  %6558 = vmatmul.mubr.bf16.gmra.mrb[48].mxu1 %v12241_v34  ;;  %v12352_v34 = vld [vmem:[%s14700_s4 + $0x68] ss:$16 sps:$4 sm:$0xff]  }
 0x379   : > { %4902 = vmatprep.mubr.bf16.mxu0 %v12242_v35  ;;  %6567 = vmatprep.mubr.bf16.mxu1 %v12242_v35  ;;  %v12358_v35 = vld [vmem:[%s14700_s4 + $0x84] ss:$16 sps:$4 sm:$0xff]  }
 0x380   : > { %4903 = vmatmul.mubr.bf16.gmra.mrb[52].mxu0 %v12244_v36  ;;  %6568 = vmatmul.mubr.bf16.gmra.mrb[52].mxu1 %v12244_v36  ;;  %v12361_v36 = vld [vmem:[%s14700_s4 + $0x8c] ss:$16 sps:$4 sm:$0xff]  }
 0x381   : > { %4912 = vmatprep.mubr.bf16.mxu0 %v12245_v37  ;;  %6577 = vmatprep.mubr.bf16.mxu1 %v12245_v37  ;;  %v12356_v37 = vld [vmem:[%s14700_s4 + $0x80] ss:$16 sps:$4 sm:$0xff]  }
 0x388   : > { %4913 = vmatmul.mubr.bf16.gmra.mrb[56].mxu0 %v12247_v38  ;;  %6578 = vmatmul.mubr.bf16.gmra.mrb[56].mxu1 %v12247_v38  ;;  %v12359_v38 = vld [vmem:[%s14700_s4 + $0x88] ss:$16 sps:$4 sm:$0xff]  }
 0x389   : > { %4922 = vmatprep.mubr.bf16.mxu0 %v12248_v39  ;;  %6587 = vmatprep.mubr.bf16.mxu1 %v12248_v39  ;;  %v12316_v39 = vld [vmem:[%s12841_s26 + $0x3c8] ss:$36 sps:$4 sm:$0xff]  }
 0x390   : > { %4923 = vmatmul.mubr.bf16.gmra.mrb[60].mxu0 %v12250_v40  ;;  %6588 = vmatmul.mubr.bf16.gmra.mrb[60].mxu1 %v12250_v40  ;;  %v12364_v40 = vld [vmem:[%s14700_s4 + $0xa4] ss:$16 sps:$4 sm:$0xff]  }
 0x391   : > { %4932 = vmatprep.mubr.bf16.mxu0 %v12257_v41  ;;  %6597 = vmatprep.mubr.bf16.mxu1 %v12257_v41  ;;  %v12367_v41 = vld [vmem:[%s14700_s4 + $0xac] ss:$16 sps:$4 sm:$0xff]  }
 0x398   : > { %4933 = vmatmul.mubr.bf16.gmra.mrb[64].mxu0 %v12259_v42  ;;  %6598 = vmatmul.mubr.bf16.gmra.mrb[64].mxu1 %v12259_v42  ;;  %v12362_v42 = vld [vmem:[%s14700_s4 + $0xa0] ss:$16 sps:$4 sm:$0xff]  }
 0x399   : > { %4942 = vmatprep.mubr.bf16.mxu0 %v12260_v43  ;;  %6607 = vmatprep.mubr.bf16.mxu1 %v12260_v43  ;;  %v12365_v43 = vld [vmem:[%s14700_s4 + $0xa8] ss:$16 sps:$4 sm:$0xff]  }
 0x3a0   : > { %4943 = vmatmul.mubr.bf16.gmra.mrb[68].mxu0 %v12262_v44  ;;  %6608 = vmatmul.mubr.bf16.gmra.mrb[68].mxu1 %v12262_v44  ;;  %v12371_v44 = vld [vmem:[%s14700_s4 + $0xc4] ss:$16 sps:$4 sm:$0xff]  }
 0x3a1   : > { %4952 = vmatprep.mubr.bf16.mxu0 %v12263_v45  ;;  %6617 = vmatprep.mubr.bf16.mxu1 %v12263_v45  ;;  %v12374_v45 = vld [vmem:[%s14700_s4 + $0xcc] ss:$16 sps:$4 sm:$0xff]  }
 0x3a8   : > { %4953 = vmatmul.mubr.bf16.gmra.mrb[72].mxu0 %v12265_v46  ;;  %6618 = vmatmul.mubr.bf16.gmra.mrb[72].mxu1 %v12265_v46  ;;  %v12369_v46 = vld [vmem:[%s14700_s4 + $0xc0] ss:$16 sps:$4 sm:$0xff]  }
 0x3a9   : > { %4962 = vmatprep.mubr.bf16.mxu0 %v12266_v47  ;;  %6627 = vmatprep.mubr.bf16.mxu1 %v12266_v47  ;;  %v12372_v47 = vld [vmem:[%s14700_s4 + $0xc8] ss:$16 sps:$4 sm:$0xff]  }
 0x3b0   : > { %4963 = vmatmul.mubr.bf16.gmra.mrb[76].mxu0 %v12268_v48  ;;  %6628 = vmatmul.mubr.bf16.gmra.mrb[76].mxu1 %v12268_v48  ;;  %v12317_v48 = vld [vmem:[%s12841_s26 + $0x410] ss:$36 sps:$4 sm:$0xff]  }
 0x3b1   : > { %4972 = vmatprep.mubr.bf16.mxu0 %v12269_v49  ;;  %6637 = vmatprep.mubr.bf16.mxu1 %v12269_v49  ;;  %v12377_v49 = vld [vmem:[%s14700_s4 + $0xe4] ss:$16 sps:$4 sm:$0xff]  }
 0x3b8   : > { %4973 = vmatmul.mubr.bf16.gmra.mrb[80].mxu0 %v12271_v50  ;;  %6638 = vmatmul.mubr.bf16.gmra.mrb[80].mxu1 %v12271_v50  ;;  %v12380_v50 = vld [vmem:[%s14700_s4 + $0xec] ss:$16 sps:$4 sm:$0xff]  }
 0x3b9   : > { %4982 = vmatprep.mubr.bf16.mxu0 %v12272_v51  ;;  %6647 = vmatprep.mubr.bf16.mxu1 %v12272_v51  ;;  %v12375_v51 = vld [vmem:[%s14700_s4 + $0xe0] ss:$16 sps:$4 sm:$0xff]  }
 0x3c0   : > { %4983 = vmatmul.mubr.bf16.gmra.mrb[84].mxu0 %v12274_v52  ;;  %6648 = vmatmul.mubr.bf16.gmra.mrb[84].mxu1 %v12274_v52  ;;  %v12378_v52 = vld [vmem:[%s14700_s4 + $0xe8] ss:$16 sps:$4 sm:$0xff]  }
 0x3c1   : > { %4992 = vmatprep.mubr.bf16.mxu0 %v12275_v53  ;;  %6657 = vmatprep.mubr.bf16.mxu1 %v12275_v53  ;;  %v12383_v53 = vld [vmem:[%s14700_s4 + $0x104] ss:$16 sps:$4 sm:$0xff]  }
 0x3c8   : > { %4993 = vmatmul.mubr.bf16.gmra.mrb[88].mxu0 %v12277_v54  ;;  %6658 = vmatmul.mubr.bf16.gmra.mrb[88].mxu1 %v12277_v54  ;;  %v12386_v54 = vld [vmem:[%s14700_s4 + $0x10c] ss:$16 sps:$4 sm:$0xff]  }
 0x3c9   : > { %5002 = vmatprep.mubr.bf16.mxu0 %v12278_v55  ;;  %6667 = vmatprep.mubr.bf16.mxu1 %v12278_v55  ;;  %v12381_v55 = vld [vmem:[%s14700_s4 + $0x100] ss:$16 sps:$4 sm:$0xff]  }
 0x3d0   : > { %5003 = vmatmul.mubr.bf16.gmra.mrb[92].mxu0 %v12280_v56  ;;  %6668 = vmatmul.mubr.bf16.gmra.mrb[92].mxu1 %v12280_v56  ;;  %v12384_v56 = vld [vmem:[%s14700_s4 + $0x108] ss:$16 sps:$4 sm:$0xff]  }
 0x3d1   : > { %5012 = vmatprep.mubr.bf16.mxu0 %v12285_v57  ;;  %6677 = vmatprep.mubr.bf16.mxu1 %v12285_v57  ;;  %v12318_v57 = vld [vmem:[%s12841_s26 + $0x458] ss:$36 sps:$4 sm:$0xff]  }
 0x3d8   : > { %5013 = vmatmul.mubr.bf16.gmra.mrb[96].mxu0 %v12287_v58  ;;  %6678 = vmatmul.mubr.bf16.gmra.mrb[96].mxu1 %v12287_v58  ;;  %v12389_v58 = vld [vmem:[%s14700_s4 + $0x124] ss:$16 sps:$4 sm:$0xff]  }
 0x3d9   : > { %5022 = vmatprep.mubr.bf16.mxu0 %v12288_v59  ;;  %6687 = vmatprep.mubr.bf16.mxu1 %v12288_v59  ;;  %v12392_v59 = vld [vmem:[%s14700_s4 + $0x12c] ss:$16 sps:$4 sm:$0xff]  }
 0x3e0   : > { %5023 = vmatmul.mubr.bf16.gmra.mrb[100].mxu0 %v12290_v60  ;;  %6688 = vmatmul.mubr.bf16.gmra.mrb[100].mxu1 %v12290_v60  ;;  %v12387_v60 = vld [vmem:[%s14700_s4 + $0x120] ss:$16 sps:$4 sm:$0xff]  }
 0x3e1   : > { %5032 = vmatprep.mubr.bf16.mxu0 %v12291_v61  ;;  %6697 = vmatprep.mubr.bf16.mxu1 %v12291_v61  ;;  %v12390_v61 = vld [vmem:[%s14700_s4 + $0x128] ss:$16 sps:$4 sm:$0xff]  }
 0x3e8   : > { %5033 = vmatmul.mubr.bf16.gmra.mrb[104].mxu0 %v12293_v62  ;;  %6698 = vmatmul.mubr.bf16.gmra.mrb[104].mxu1 %v12293_v62  ;;  %v12395_v62 = vld [vmem:[%s14700_s4 + $0x144] ss:$16 sps:$4 sm:$0xff]  }
 0x3e9   : > { %5042 = vmatprep.mubr.bf16.mxu0 %v12294_v63  ;;  %6707 = vmatprep.mubr.bf16.mxu1 %v12294_v63  ;;  %v12398_v63 = vld [vmem:[%s14700_s4 + $0x14c] ss:$16 sps:$4 sm:$0xff]  }
 0x3f0   : > { %5043 = vmatmul.mubr.bf16.gmra.mrb[108].mxu0 %v12296_v0  ;;  %6708 = vmatmul.mubr.bf16.gmra.mrb[108].mxu1 %v12296_v0  ;;  %v12393_v0 = vld [vmem:[%s14700_s4 + $0x140] ss:$16 sps:$4 sm:$0xff]  }
 0x3f1   : > { %5052 = vmatprep.mubr.bf16.mxu0 %v12297_v1  ;;  %6717 = vmatprep.mubr.bf16.mxu1 %v12297_v1  ;;  %v12396_v1 = vld [vmem:[%s14700_s4 + $0x148] ss:$16 sps:$4 sm:$0xff]  }
 0x3f8   : > { %5053 = vmatmul.mubr.bf16.gmra.mrb[112].mxu0 %v12299_v2  ;;  %6718 = vmatmul.mubr.bf16.gmra.mrb[112].mxu1 %v12299_v2  ;;  %v12319_v2 = vld [vmem:[%s12841_s26 + $0x4a0] ss:$36 sps:$4 sm:$0xff]  }
 0x3f9   : > { %5062 = vmatprep.mubr.bf16.mxu0 %v12300_v3  ;;  %6727 = vmatprep.mubr.bf16.mxu1 %v12300_v3  ;;  %v12401_v3 = vld [vmem:[%s14700_s4 + $0x164] ss:$16 sps:$4 sm:$0xff]  }
 0x400   : > { %5063 = vmatmul.mubr.bf16.gmra.mrb[116].mxu0 %v12302_v4  ;;  %6728 = vmatmul.mubr.bf16.gmra.mrb[116].mxu1 %v12302_v4  ;;  %v12404_v4 = vld [vmem:[%s14700_s4 + $0x16c] ss:$16 sps:$4 sm:$0xff]  }
 0x401   : > { %5105 = vmatprep.mubr.bf16.mxu0 %v12638_v5  ;;  %6770 = vmatprep.mubr.bf16.mxu1 %v12638_v5 }
 0x408   : > { %10132 = vmatmul.mubr.msk.bf16.vlgmr.msra.gmra.mrb[0].mxu0 %vm3637_vm1, %v12303_v6  ;;  %10163 = vmatmul.mubr.msk.bf16.vlgmr.msra.gmra.mrb[0].mxu1 %vm3637_vm1, %v12303_v6  ;;  %v12399_v6 = vld [vmem:[%s14700_s4 + $0x160] ss:$16 sps:$4 sm:$0xff]  }
 0x409   : > { %5115 = vmatprep.mubr.bf16.mxu0 %v12638_v5  ;;  %6780 = vmatprep.mubr.bf16.mxu1 %v12638_v5 }
 0x40a   : > { %8762 = vmatpush1.bf16.msra.mxu0 %v12325_v12  ;;  %9011 = vmatpush1.bf16.msra.mxu1 %v12328_v14  ;;  %v12320_v12 = vld [vmem:[%s12841_s26 + $0x4e8] ss:$36 sps:$4 sm:$0xff]  }
 0x40b   : > { %8763 = vmatprep.subr.bf16.mxu0 %v12335_v19  ;;  %9012 = vmatprep.subr.bf16.mxu1 %v12338_v21  ;;  %v12416_v14 = vld [vmem:[%s14700_s4 + $0x1ac] ss:$16 sps:$4 sm:$0xff]   ;;  %v12417_v19 = vld [vmem:[%s14700_s4 + $0x1c0] ss:$16 sps:$4 sm:$0xff]  }
 0x40c   : > { %v12321_v21 = vld [vmem:[%s12841_s26 + $0x530] ss:$36 sps:$4 sm:$0xff]  }
 0x40e   : > { %8764 = vmatpush1.bf16.msra.mxu0 %v12333_v18  ;;  %9013 = vmatpush1.bf16.msra.mxu1 %v12336_v20  ;;  %v12422_v18 = vld [vmem:[%s14700_s4 + $0x1cc] ss:$16 sps:$4 sm:$0xff]   ;;  %v12420_v20 = vld [vmem:[%s14700_s4 + $0x1c8] ss:$16 sps:$4 sm:$0xff]  }
 0x40f   : > { %8765 = vmatprep.subr.bf16.mxu0 %v12343_v25  ;;  %9014 = vmatprep.subr.bf16.mxu1 %v12346_v27  ;;  %v12426_v25 = vld [vmem:[%s14700_s4 + $0x1e8] ss:$16 sps:$4 sm:$0xff]   ;;  %v12323_v27 = vld [vmem:[%s12841_s26 + $0x5c0] ss:$36 sps:$4 sm:$0xff]  }
 0x410   : > { %10133 = vmatmul.mubr.msk.bf16.gmra.mrb[4].mxu0 %vm3637_vm1, %v12304_v7  ;;  %10164 = vmatmul.mubr.msk.bf16.gmra.mrb[4].mxu1 %vm3637_vm1, %v12304_v7  ;;  %v12402_v7 = vld [vmem:[%s14700_s4 + $0x168] ss:$16 sps:$4 sm:$0xff]  }
 0x411   : > { %5125 = vmatprep.mubr.bf16.mxu0 %v12638_v5  ;;  %6790 = vmatprep.mubr.bf16.mxu1 %v12638_v5 }
 0x412   : > { %8766 = vmatpush1.bf16.msra.mxu0 %v12341_v24  ;;  %9015 = vmatpush1.bf16.msra.mxu1 %v12344_v26  ;;  %v12423_v24 = vld [vmem:[%s14700_s4 + $0x1e0] ss:$16 sps:$4 sm:$0xff]   ;;  %v12322_v26 = vld [vmem:[%s12841_s26 + $0x578] ss:$36 sps:$4 sm:$0xff]  }
 0x413   : > { %8767 = vmatprep.subr.bf16.mxu0 %v12351_v31  ;;  %9016 = vmatprep.subr.bf16.mxu1 %v12354_v32  ;;  %v12339_v31 = vld [vmem:[%s12841_s26 + $0x6e0] ss:$36 sps:$4 sm:$0xff]   ;;  %v12340_v32 = vld [vmem:[%s12841_s26 + $0x728] ss:$36 sps:$4 sm:$0xff]  }
 0x416   : > { %8768 = vmatpush1.bf16.msra.mxu0 %v12349_v33  ;;  %9017 = vmatpush1.bf16.msra.mxu1 %v12352_v34  ;;  %v12347_v33 = vld [vmem:[%s12841_s26 + $0x770] ss:$36 sps:$4 sm:$0xff]  }
 0x417   : > { %8769 = vmatprep.subr.bf16.mxu0 %v12358_v35  ;;  %9018 = vmatprep.subr.bf16.mxu1 %v12361_v36 }
 0x418   : > { %10134 = vmatmul.mubr.msk.bf16.gmra.mrb[8].mxu0 %vm3637_vm1, %v12305_v8  ;;  %10165 = vmatmul.mubr.msk.bf16.gmra.mrb[8].mxu1 %vm3637_vm1, %v12305_v8  ;;  %v12407_v8 = vld [vmem:[%s14700_s4 + $0x184] ss:$16 sps:$4 sm:$0xff]  }
 0x419   : > { %5135 = vmatprep.mubr.bf16.mxu0 %v12638_v5  ;;  %6800 = vmatprep.mubr.bf16.mxu1 %v12638_v5 }
 0x41a   : > { %8770 = vmatpush1.bf16.msra.mxu0 %v12356_v37  ;;  %9019 = vmatpush1.bf16.msra.mxu1 %v12359_v38  ;;  %v12348_v38 = vld [vmem:[%s12841_s26 + $0x7b8] ss:$36 sps:$4 sm:$0xff]  }
 0x41b   : > { %8771 = vmatprep.subr.bf16.mxu0 %v12364_v40  ;;  %9020 = vmatprep.subr.bf16.mxu1 %v12367_v41 }
 0x41e   : > { %8772 = vmatpush1.bf16.msra.mxu0 %v12362_v42  ;;  %9021 = vmatpush1.bf16.msra.mxu1 %v12365_v43  ;;  %v14091_v43 = vld [vmem:[%s14699_s3] ss:$0 sm:$0xff] }
 0x41f   : > { %8773 = vmatprep.subr.bf16.mxu0 %v12371_v44  ;;  %9022 = vmatprep.subr.bf16.mxu1 %v12374_v45 }
 0x420   : > { %10135 = vmatmul.mubr.msk.bf16.gmra.mrb[12].mxu0 %vm3637_vm1, %v12306_v9  ;;  %10166 = vmatmul.mubr.msk.bf16.gmra.mrb[12].mxu1 %vm3637_vm1, %v12306_v9  ;;  %v12410_v9 = vld [vmem:[%s14700_s4 + $0x18c] ss:$16 sps:$4 sm:$0xff]  }
 0x421   : > { %5145 = vmatprep.mubr.bf16.mxu0 %v12638_v5  ;;  %6810 = vmatprep.mubr.bf16.mxu1 %v12638_v5 }
 0x422   : > { %8774 = vmatpush1.bf16.msra.mxu0 %v12369_v46  ;;  %9023 = vmatpush1.bf16.msra.mxu1 %v12372_v47 }
 0x423   : > { %8775 = vmatprep.subr.bf16.mxu0 %v12377_v49  ;;  %9024 = vmatprep.subr.bf16.mxu1 %v12380_v50 }
 0x426   : > { %8776 = vmatpush1.bf16.msra.mxu0 %v12375_v51  ;;  %9025 = vmatpush1.bf16.msra.mxu1 %v12378_v52 }
 0x427   : > { %8777 = vmatprep.subr.bf16.mxu0 %v12383_v53  ;;  %9026 = vmatprep.subr.bf16.mxu1 %v12386_v54 }
 0x428   : > { %10136 = vmatmul.mubr.msk.bf16.gmra.mrb[16].mxu0 %vm3637_vm1, %v12307_v10  ;;  %10167 = vmatmul.mubr.msk.bf16.gmra.mrb[16].mxu1 %vm3637_vm1, %v12307_v10  ;;  %v12405_v10 = vld [vmem:[%s14700_s4 + $0x180] ss:$16 sps:$4 sm:$0xff]  }
 0x429   : > { %5155 = vmatprep.mubr.bf16.mxu0 %v12638_v5  ;;  %6820 = vmatprep.mubr.bf16.mxu1 %v12638_v5 }
 0x42a   : > { %8778 = vmatpush1.bf16.msra.mxu0 %v12381_v55  ;;  %9027 = vmatpush1.bf16.msra.mxu1 %v12384_v56 }
 0x42b   : > { %8779 = vmatprep.subr.bf16.mxu0 %v12389_v58  ;;  %9028 = vmatprep.subr.bf16.mxu1 %v12392_v59 }
 0x42e   : > { %8780 = vmatpush1.bf16.msra.mxu0 %v12387_v60  ;;  %9029 = vmatpush1.bf16.msra.mxu1 %v12390_v61 }
 0x42f   : > { %8781 = vmatprep.subr.bf16.mxu0 %v12395_v62  ;;  %9030 = vmatprep.subr.bf16.mxu1 %v12398_v63 }
 0x430   : > { %10137 = vmatmul.mubr.msk.bf16.gmra.mrb[20].mxu0 %vm3637_vm1, %v12308_v11  ;;  %10168 = vmatmul.mubr.msk.bf16.gmra.mrb[20].mxu1 %vm3637_vm1, %v12308_v11  ;;  %v12408_v11 = vld [vmem:[%s14700_s4 + $0x188] ss:$16 sps:$4 sm:$0xff]  }
 0x431   : > { %5165 = vmatprep.mubr.bf16.mxu0 %v12638_v5  ;;  %6830 = vmatprep.mubr.bf16.mxu1 %v12638_v5 }
 0x432   : > { %8782 = vmatpush1.bf16.msra.mxu0 %v12393_v0  ;;  %9031 = vmatpush1.bf16.msra.mxu1 %v12396_v1 }
 0x433   : > { %8783 = vmatprep.subr.bf16.mxu0 %v12401_v3  ;;  %9032 = vmatprep.subr.bf16.mxu1 %v12404_v4 }
 0x436   : > { %8784 = vmatpush1.bf16.msra.mxu0 %v12399_v6  ;;  %9033 = vmatpush1.bf16.msra.mxu1 %v12402_v7 }
 0x437   : > { %8785 = vmatprep.subr.bf16.mxu0 %v12407_v8  ;;  %9034 = vmatprep.subr.bf16.mxu1 %v12410_v9 }
 0x438   : > { %10138 = vmatmul.mubr.msk.bf16.gmra.mrb[24].mxu0 %vm3637_vm1, %v12309_v16  ;;  %10169 = vmatmul.mubr.msk.bf16.gmra.mrb[24].mxu1 %vm3637_vm1, %v12309_v16  ;;  %v12414_v16 = vld [vmem:[%s14700_s4 + $0x1a8] ss:$16 sps:$4 sm:$0xff]  }
 0x439   : > { %5175 = vmatprep.mubr.bf16.mxu0 %v12638_v5  ;;  %6840 = vmatprep.mubr.bf16.mxu1 %v12638_v5 }
 0x43a   : > { %8786 = vmatpush1.bf16.msra.mxu0 %v12405_v10  ;;  %9035 = vmatpush1.bf16.msra.mxu1 %v12408_v11 }
 0x43b   : > { %8787 = vmatprep.subr.bf16.mxu0 %v12413_v13  ;;  %9036 = vmatprep.subr.bf16.mxu1 %v12416_v14  ;;  %v12368_v13 = vld [vmem:[%s12841_s26 + $0x848] ss:$36 sps:$4 sm:$0xff]  }
 0x43e   : > { %8788 = vmatpush1.bf16.msra.mxu0 %v12411_v15  ;;  %9037 = vmatpush1.bf16.msra.mxu1 %v12414_v16 }
 0x43f   : > { %9038 = vmatprep.subr.bf16.mxu1 %v12422_v18 }
 0x440   : > { %10139 = vmatmul.mubr.msk.bf16.gmra.mrb[28].mxu0 %vm3637_vm1, %v12310_v17  ;;  %10170 = vmatmul.mubr.msk.bf16.gmra.mrb[28].mxu1 %vm3637_vm1, %v12310_v17  ;;  %v12419_v17 = vld [vmem:[%s14700_s4 + $0x1c4] ss:$16 sps:$4 sm:$0xff]  }
 0x441   : > { %5185 = vmatprep.mubr.bf16.mxu0 %v12638_v5  ;;  %6850 = vmatprep.mubr.bf16.mxu1 %v12638_v5 }
 0x442   : > { %8789 = vmatprep.subr.bf16.mxu0 %v12419_v17  ;;  %9039 = vmatpush1.bf16.msra.mxu1 %v12420_v20 }
 0x443   : > { %8790 = vmatpush1.bf16.msra.mxu0 %v12417_v19 }
 0x448   : > { %10140 = vmatmul.mubr.msk.bf16.gmra.mrb[32].mxu0 %vm3637_vm1, %v12311_v22  ;;  %10171 = vmatmul.mubr.msk.bf16.gmra.mrb[32].mxu1 %vm3637_vm1, %v12311_v22  ;;  %v12425_v22 = vld [vmem:[%s14700_s4 + $0x1e4] ss:$16 sps:$4 sm:$0xff]  }
 0x449   : > { %5195 = vmatprep.mubr.bf16.mxu0 %v12638_v5  ;;  %6860 = vmatprep.mubr.bf16.mxu1 %v12638_v5 }
 0x44a   : > { %8791 = vmatprep.subr.bf16.mxu0 %v12425_v22 }
 0x44b   : > { %8792 = vmatpush1.bf16.msra.mxu0 %v12423_v24 }
 0x450   : > { %10141 = vmatmul.mubr.msk.bf16.gmra.mrb[36].mxu0 %vm3637_vm1, %v12312_v23  ;;  %10172 = vmatmul.mubr.msk.bf16.gmra.mrb[36].mxu1 %vm3637_vm1, %v12312_v23  ;;  %v12428_v23 = vld [vmem:[%s14700_s4 + $0x1ec] ss:$16 sps:$4 sm:$0xff]  }
 0x451   : > { %5205 = vmatprep.mubr.bf16.mxu0 %v12638_v5  ;;  %6870 = vmatprep.mubr.bf16.mxu1 %v12638_v5 }
 0x452   : > { %9040 = vmatprep.subr.bf16.mxu1 %v12428_v23 }
 0x453   : > { %9041 = vmatpush1.bf16.msra.mxu1 %v12426_v25 }
 0x458   : > { %10142 = vmatmul.mubr.msk.bf16.gmra.mrb[40].mxu0 %vm3637_vm1, %v12313_v28  ;;  %10173 = vmatmul.mubr.msk.bf16.gmra.mrb[40].mxu1 %vm3637_vm1, %v12313_v28  ;;  %v12324_v28 = vld [vmem:[%s12841_s26 + $0x608] ss:$36 sps:$4 sm:$0xff]  }
 0x459   : > { %5215 = vmatprep.mubr.bf16.mxu0 %v12638_v5  ;;  %6880 = vmatprep.mubr.bf16.mxu1 %v12638_v5 }
 0x460   : > { %10143 = vmatmul.mubr.msk.bf16.gmra.mrb[44].mxu0 %vm3637_vm1, %v12314_v29  ;;  %10174 = vmatmul.mubr.msk.bf16.gmra.mrb[44].mxu1 %vm3637_vm1, %v12314_v29  ;;  %v12331_v29 = vld [vmem:[%s12841_s26 + $0x650] ss:$36 sps:$4 sm:$0xff]  }
 0x461   : > { %5225 = vmatprep.mubr.bf16.mxu0 %v12638_v5  ;;  %6890 = vmatprep.mubr.bf16.mxu1 %v12638_v5 }
 0x468   : > { %10144 = vmatmul.mubr.msk.bf16.gmra.mrb[48].mxu0 %vm3637_vm1, %v12315_v30  ;;  %10175 = vmatmul.mubr.msk.bf16.gmra.mrb[48].mxu1 %vm3637_vm1, %v12315_v30  ;;  %v12332_v30 = vld [vmem:[%s12841_s26 + $0x698] ss:$36 sps:$4 sm:$0xff]  }
 0x469   : > { %5235 = vmatprep.mubr.bf16.mxu0 %v12638_v5  ;;  %6900 = vmatprep.mubr.bf16.mxu1 %v12638_v5 }
 0x470   : > { %10145 = vmatmul.mubr.msk.bf16.gmra.mrb[52].mxu0 %vm3637_vm1, %v12316_v39  ;;  %10176 = vmatmul.mubr.msk.bf16.gmra.mrb[52].mxu1 %vm3637_vm1, %v12316_v39 }
 0x471   : > { %5245 = vmatprep.mubr.bf16.mxu0 %v12638_v5  ;;  %6910 = vmatprep.mubr.bf16.mxu1 %v12638_v5 }
 0x478   : > { %10146 = vmatmul.mubr.msk.bf16.gmra.mrb[56].mxu0 %vm3637_vm1, %v12317_v48  ;;  %10177 = vmatmul.mubr.msk.bf16.gmra.mrb[56].mxu1 %vm3637_vm1, %v12317_v48 }
 0x479   : > { %5255 = vmatprep.mubr.bf16.mxu0 %v12638_v5  ;;  %6920 = vmatprep.mubr.bf16.mxu1 %v12638_v5 }
 0x480   : > { %10147 = vmatmul.mubr.msk.bf16.gmra.mrb[60].mxu0 %vm3637_vm1, %v12318_v57  ;;  %10178 = vmatmul.mubr.msk.bf16.gmra.mrb[60].mxu1 %vm3637_vm1, %v12318_v57  ;;  %v12355_v57 = vld [vmem:[%s12841_s26 + $0x800] ss:$36 sps:$4 sm:$0xff]   ;;  %s353_s26 = smul.u32 10, %s12698_s12 }
 0x481   : > { %5265 = vmatprep.mubr.bf16.mxu0 %v12638_v5  ;;  %6930 = vmatprep.mubr.bf16.mxu1 %v12638_v5 }
 0x482   : > { %p354_p4 = scmp.lt.s32.totalorder %s353_s26, 19 }
 0x484   : > { %s14709_s26 = smov (!%p354_p4, %s353_s26), 19 }
 0x485   : > { %s10391_s18 = sshll.u32 %s14709_s26, 5 }
 0x486   : > { %s14565_s23 = scalar_lea.vmem %s14697_s1, %s10391_s18 }
 0x488   : > { %10148 = vmatmul.mubr.msk.bf16.gmra.mrb[64].mxu0 %vm3637_vm1, %v12319_v2  ;;  %10179 = vmatmul.mubr.msk.bf16.gmra.mrb[64].mxu1 %vm3637_vm1, %v12319_v2 }
 0x489   : > { %5275 = vmatprep.mubr.bf16.mxu0 %v12638_v5  ;;  %6940 = vmatprep.mubr.bf16.mxu1 %v12638_v5 }
 0x490   : > { %10149 = vmatmul.mubr.msk.bf16.gmra.mrb[68].mxu0 %vm3637_vm1, %v12320_v12  ;;  %10180 = vmatmul.mubr.msk.bf16.gmra.mrb[68].mxu1 %vm3637_vm1, %v12320_v12 }
 0x491   : > { %5285 = vmatprep.mubr.bf16.mxu0 %v12638_v5  ;;  %6950 = vmatprep.mubr.bf16.mxu1 %v12638_v5 }
 0x498   : > { %10150 = vmatmul.mubr.msk.bf16.gmra.mrb[72].mxu0 %vm3637_vm1, %v12321_v21  ;;  %10181 = vmatmul.mubr.msk.bf16.gmra.mrb[72].mxu1 %vm3637_vm1, %v12321_v21 }
 0x499   : > { %5295 = vmatprep.mubr.bf16.mxu0 %v12638_v5  ;;  %6960 = vmatprep.mubr.bf16.mxu1 %v12638_v5 }
 0x4a0   : > { %10151 = vmatmul.mubr.msk.bf16.gmra.mrb[76].mxu0 %vm3637_vm1, %v12322_v26  ;;  %10182 = vmatmul.mubr.msk.bf16.gmra.mrb[76].mxu1 %vm3637_vm1, %v12322_v26 }
 0x4a1   : > { %5305 = vmatprep.mubr.bf16.mxu0 %v12638_v5  ;;  %6970 = vmatprep.mubr.bf16.mxu1 %v12638_v5 }
 0x4a8   : > { %10152 = vmatmul.mubr.msk.bf16.gmra.mrb[80].mxu0 %vm3637_vm1, %v12323_v27  ;;  %10183 = vmatmul.mubr.msk.bf16.gmra.mrb[80].mxu1 %vm3637_vm1, %v12323_v27 }
 0x4a9   : > { %5315 = vmatprep.mubr.bf16.mxu0 %v12638_v5  ;;  %6980 = vmatprep.mubr.bf16.mxu1 %v12638_v5 }
 0x4b0   : > { %10153 = vmatmul.mubr.msk.bf16.gmra.mrb[84].mxu0 %vm3637_vm1, %v12324_v28  ;;  %10184 = vmatmul.mubr.msk.bf16.gmra.mrb[84].mxu1 %vm3637_vm1, %v12324_v28 }
 0x4b1   : > { %5325 = vmatprep.mubr.bf16.mxu0 %v12638_v5  ;;  %6990 = vmatprep.mubr.bf16.mxu1 %v12638_v5 }
 0x4b8   : > { %10154 = vmatmul.mubr.msk.bf16.gmra.mrb[88].mxu0 %vm3637_vm1, %v12331_v29  ;;  %10185 = vmatmul.mubr.msk.bf16.gmra.mrb[88].mxu1 %vm3637_vm1, %v12331_v29 }
 0x4b9   : > { %5335 = vmatprep.mubr.bf16.mxu0 %v12638_v5  ;;  %7000 = vmatprep.mubr.bf16.mxu1 %v12638_v5 }
 0x4c0   : > { %10155 = vmatmul.mubr.msk.bf16.gmra.mrb[92].mxu0 %vm3637_vm1, %v12332_v30  ;;  %10186 = vmatmul.mubr.msk.bf16.gmra.mrb[92].mxu1 %vm3637_vm1, %v12332_v30 }
 0x4c1   : > { %5345 = vmatprep.mubr.bf16.mxu0 %v12638_v5  ;;  %7010 = vmatprep.mubr.bf16.mxu1 %v12638_v5 }
 0x4c8   : > { %10156 = vmatmul.mubr.msk.bf16.gmra.mrb[96].mxu0 %vm3637_vm1, %v12339_v31  ;;  %10187 = vmatmul.mubr.msk.bf16.gmra.mrb[96].mxu1 %vm3637_vm1, %v12339_v31 }
 0x4c9   : > { %5355 = vmatprep.mubr.bf16.mxu0 %v12638_v5  ;;  %7020 = vmatprep.mubr.bf16.mxu1 %v12638_v5 }
 0x4d0   : > { %10157 = vmatmul.mubr.msk.bf16.gmra.mrb[100].mxu0 %vm3637_vm1, %v12340_v32  ;;  %10188 = vmatmul.mubr.msk.bf16.gmra.mrb[100].mxu1 %vm3637_vm1, %v12340_v32 }
 0x4d1   : > { %5365 = vmatprep.mubr.bf16.mxu0 %v12638_v5  ;;  %7030 = vmatprep.mubr.bf16.mxu1 %v12638_v5 }
 0x4d8   : > { %10158 = vmatmul.mubr.msk.bf16.gmra.mrb[104].mxu0 %vm3637_vm1, %v12347_v33  ;;  %10189 = vmatmul.mubr.msk.bf16.gmra.mrb[104].mxu1 %vm3637_vm1, %v12347_v33 }
 0x4d9   : > { %5375 = vmatprep.mubr.bf16.mxu0 %v12638_v5  ;;  %7040 = vmatprep.mubr.bf16.mxu1 %v12638_v5 }
 0x4db   : > { %v5107_v34 = vpop.f32.mrb[0].mxu0  ;;  %v6772_v35 = vpop.f32.mrb[0].mxu1 }
 0x4dc   : > { %v5109_v36 = vpop.f32.mrb[1].mxu0  ;;  %v6774_v37 = vpop.f32.mrb[1].mxu1 }
 0x4dd   : > { %v7071_v39 = vmax.f32 %v5107_v34, %v5109_v36  ;;  %v7131_v40 = vmax.f32 %v6772_v35, %v6774_v37  ;;  %v5111_v41 = vpop.f32.mrb[2].mxu0  ;;  %v6776_v42 = vpop.f32.mrb[2].mxu1 }
 0x4de   : > { %v5113_v44 = vpop.f32.mrb[3].mxu0  ;;  %v6778_v45 = vpop.f32.mrb[3].mxu1 }
 0x4df   : > { %v7191_v46 = vmax.f32 %v7071_v39, %v7131_v40  ;;  %v7072_v47 = vmax.f32 %v5111_v41, %v5113_v44  ;;  %v7132_v48 = vmax.f32 %v6776_v42, %v6778_v45 }
 0x4e0   : > { %10159 = vmatmul.mubr.msk.bf16.gmra.mrb[108].mxu0 %vm3637_vm1, %v12348_v38  ;;  %10190 = vmatmul.mubr.msk.bf16.gmra.mrb[108].mxu1 %vm3637_vm1, %v12348_v38 }
 0x4e1   : > { %v7258_v49 = vadd.f32 %v14091_v43, %v7191_v46  ;;  %v7192_v50 = vmax.f32 %v7072_v47, %v7132_v48  ;;  %5385 = vmatprep.mubr.bf16.mxu0 %v12638_v5  ;;  %7050 = vmatprep.mubr.bf16.mxu1 %v12638_v5 }
 0x4e3   : > { %v7318_v51 = vmax.f32 %v7258_v49, 0.0  ;;  %v7259_v52 = vadd.f32 %v14091_v43, %v7192_v50  ;;  %v5117_v53 = vpop.f32.mrb[4].mxu0  ;;  %v6782_v54 = vpop.f32.mrb[4].mxu1 }
 0x4e4   : > { %v5119_v55 = vpop.f32.mrb[5].mxu0  ;;  %v6784_v56 = vpop.f32.mrb[5].mxu1 }
 0x4e5   : > { %7378 = vst [vmem:[#allocation2] sm:$0xff] %v7318_v51  ;;  %v7319_v58 = vmax.f32 %v7259_v52, 0.0  ;;  %v7073_v59 = vmax.f32 %v5117_v53, %v5119_v55  ;;  %v7133_v60 = vmax.f32 %v6782_v54, %v6784_v56  ;;  %v5121_v61 = vpop.f32.mrb[6].mxu0  ;;  %v6786_v62 = vpop.f32.mrb[6].mxu1 }
 0x4e6   : > { %v5123_v63 = vpop.f32.mrb[7].mxu0  ;;  %v6788_v0 = vpop.f32.mrb[7].mxu1 }
 0x4e7   : > { %7379 = vst [vmem:[#allocation2 + $0x8] sm:$0xff] %v7319_v58  ;;  %v7193_v1 = vmax.f32 %v7073_v59, %v7133_v60  ;;  %v7074_v2 = vmax.f32 %v5121_v61, %v5123_v63  ;;  %v7134_v3 = vmax.f32 %v6786_v62, %v6788_v0 }
 0x4e8   : > { %10160 = vmatmul.mubr.msk.bf16.gmra.mrb[112].mxu0 %vm3637_vm1, %v12355_v57  ;;  %10191 = vmatmul.mubr.msk.bf16.gmra.mrb[112].mxu1 %vm3637_vm1, %v12355_v57 }
 0x4e9   : > { %v7260_v4 = vadd.f32 %v14091_v43, %v7193_v1  ;;  %v7194_v6 = vmax.f32 %v7074_v2, %v7134_v3  ;;  %5395 = vmatprep.mubr.bf16.mxu0 %v12638_v5  ;;  %7060 = vmatprep.mubr.bf16.mxu1 %v12638_v5 }
 0x4eb   : > { %v7320_v7 = vmax.f32 %v7260_v4, 0.0  ;;  %v7261_v8 = vadd.f32 %v14091_v43, %v7194_v6  ;;  %v5127_v9 = vpop.f32.mrb[8].mxu0  ;;  %v6792_v10 = vpop.f32.mrb[8].mxu1 }
 0x4ec   : > { %v5129_v11 = vpop.f32.mrb[9].mxu0  ;;  %v6794_v12 = vpop.f32.mrb[9].mxu1 }
 0x4ed   : > { %7380 = vst [vmem:[#allocation2 + $0x10] sm:$0xff] %v7320_v7  ;;  %v7321_v14 = vmax.f32 %v7261_v8, 0.0  ;;  %v7075_v15 = vmax.f32 %v5127_v9, %v5129_v11  ;;  %v7135_v16 = vmax.f32 %v6792_v10, %v6794_v12  ;;  %v5131_v17 = vpop.f32.mrb[10].mxu0  ;;  %v6796_v18 = vpop.f32.mrb[10].mxu1 }
 0x4ee   : > { %v5133_v19 = vpop.f32.mrb[11].mxu0  ;;  %v6798_v20 = vpop.f32.mrb[11].mxu1 }
 0x4ef   : > { %7381 = vst [vmem:[#allocation2 + $0x18] sm:$0xff] %v7321_v14  ;;  %v7195_v21 = vmax.f32 %v7075_v15, %v7135_v16  ;;  %v7076_v22 = vmax.f32 %v5131_v17, %v5133_v19  ;;  %v7136_v5 = vmax.f32 %v6796_v18, %v6798_v20 }
 0x4f0   : > { %10161 = vmatmul.mubr.msk.bf16.gmra.mrb[116].mxu0 %vm3637_vm1, %v12368_v13  ;;  %10192 = vmatmul.mubr.msk.bf16.gmra.mrb[116].mxu1 %vm3637_vm1, %v12368_v13 }
 0x4f1   : > { %v7262_v23 = vadd.f32 %v14091_v43, %v7195_v21  ;;  %v7196_v24 = vmax.f32 %v7076_v22, %v7136_v5 }
 0x4f3   : > { %v7322_v25 = vmax.f32 %v7262_v23, 0.0  ;;  %v7263_v26 = vadd.f32 %v14091_v43, %v7196_v24  ;;  %v5137_v27 = vpop.f32.mrb[12].mxu0  ;;  %v6802_v28 = vpop.f32.mrb[12].mxu1 }
 0x4f4   : > { %v5139_v29 = vpop.f32.mrb[13].mxu0  ;;  %v6804_v30 = vpop.f32.mrb[13].mxu1 }
 0x4f5   : > { %7382 = vst [vmem:[#allocation2 + $0x20] sm:$0xff] %v7322_v25  ;;  %v7323_v31 = vmax.f32 %v7263_v26, 0.0  ;;  %v7077_v32 = vmax.f32 %v5137_v27, %v5139_v29  ;;  %v7137_v33 = vmax.f32 %v6802_v28, %v6804_v30  ;;  %v5141_v34 = vpop.f32.mrb[14].mxu0  ;;  %v6806_v35 = vpop.f32.mrb[14].mxu1 }
 0x4f6   : > { %v5143_v36 = vpop.f32.mrb[15].mxu0  ;;  %v6808_v37 = vpop.f32.mrb[15].mxu1 }
 0x4f7   : > { %7383 = vst [vmem:[#allocation2 + $0x28] sm:$0xff] %v7323_v31  ;;  %v7197_v38 = vmax.f32 %v7077_v32, %v7137_v33  ;;  %v7078_v39 = vmax.f32 %v5141_v34, %v5143_v36  ;;  %v7138_v40 = vmax.f32 %v6806_v35, %v6808_v37 }
 0x4f9   : > { %v7264_v41 = vadd.f32 %v14091_v43, %v7197_v38  ;;  %v7198_v42 = vmax.f32 %v7078_v39, %v7138_v40 }
 0x4fb   : > { %v7324_v44 = vmax.f32 %v7264_v41, 0.0  ;;  %v7265_v45 = vadd.f32 %v14091_v43, %v7198_v42  ;;  %v5147_v46 = vpop.f32.mrb[16].mxu0  ;;  %v6812_v47 = vpop.f32.mrb[16].mxu1 }
 0x4fc   : > { %v5149_v48 = vpop.f32.mrb[17].mxu0  ;;  %v6814_v49 = vpop.f32.mrb[17].mxu1 }
 0x4fd   : > { %7384 = vst [vmem:[#allocation2 + $0x30] sm:$0xff] %v7324_v44  ;;  %v7325_v50 = vmax.f32 %v7265_v45, 0.0  ;;  %v7079_v51 = vmax.f32 %v5147_v46, %v5149_v48  ;;  %v7139_v52 = vmax.f32 %v6812_v47, %v6814_v49  ;;  %v5151_v53 = vpop.f32.mrb[18].mxu0  ;;  %v6816_v54 = vpop.f32.mrb[18].mxu1 }
 0x4fe   : > { %v5153_v55 = vpop.f32.mrb[19].mxu0  ;;  %v6818_v56 = vpop.f32.mrb[19].mxu1  ;;  %v7458_v46 = vld [vmem:[#allocation2 + $0x1] ss:$6 sm:$0xff] }
 0x4ff   : > { %7385 = vst [vmem:[#allocation2 + $0x38] sm:$0xff] %v7325_v50  ;;  %v7199_v57 = vmax.f32 %v7079_v51, %v7139_v52  ;;  %v7080_v58 = vmax.f32 %v5151_v53, %v5153_v55  ;;  %v7140_v59 = vmax.f32 %v6816_v54, %v6818_v56  ;;  %v7438_v55 = vld [vmem:[#allocation2] ss:$6 sm:$0xff] }
 0x501   : > { %v7266_v60 = vadd.f32 %v14091_v43, %v7199_v57  ;;  %v7200_v61 = vmax.f32 %v7080_v58, %v7140_v59 }
 0x503   : > { %v7326_v62 = vmax.f32 %v7266_v60, 0.0  ;;  %v7267_v63 = vadd.f32 %v14091_v43, %v7200_v61  ;;  %v5157_v0 = vpop.f32.mrb[20].mxu0  ;;  %v6822_v1 = vpop.f32.mrb[20].mxu1 }
 0x504   : > { %v5159_v2 = vpop.f32.mrb[21].mxu0  ;;  %v6824_v3 = vpop.f32.mrb[21].mxu1 }
 0x505   : > { %7386 = vst [vmem:[#allocation2 + $0x40] sm:$0xff] %v7326_v62  ;;  %v7327_v4 = vmax.f32 %v7267_v63, 0.0  ;;  %v7081_v6 = vmax.f32 %v5157_v0, %v5159_v2  ;;  %v7141_v7 = vmax.f32 %v6822_v1, %v6824_v3  ;;  %v5161_v8 = vpop.f32.mrb[22].mxu0  ;;  %v6826_v9 = vpop.f32.mrb[22].mxu1 }
 0x506   : > { %v5163_v10 = vpop.f32.mrb[23].mxu0  ;;  %v6828_v11 = vpop.f32.mrb[23].mxu1 }
 0x507   : > { %7387 = vst [vmem:[#allocation2 + $0x48] sm:$0xff] %v7327_v4  ;;  %v7201_v12 = vmax.f32 %v7081_v6, %v7141_v7  ;;  %v7082_v13 = vmax.f32 %v5161_v8, %v5163_v10  ;;  %v7142_v14 = vmax.f32 %v6826_v9, %v6828_v11 }
 0x509   : > { %v7268_v15 = vadd.f32 %v14091_v43, %v7201_v12  ;;  %v7202_v16 = vmax.f32 %v7082_v13, %v7142_v14  ;;  %v12431_v12 = vld [vmem:[%s14700_s4 + $0x204] ss:$16 sps:$4 sm:$0xff]   ;;  %v12434_v13 = vld [vmem:[%s14700_s4 + $0x20c] ss:$16 sps:$4 sm:$0xff]  }
 0x50a   : > { %8844 = vmatprep.subr.bf16.mxu0 %v12431_v12  ;;  %9093 = vmatprep.subr.bf16.mxu1 %v12434_v13  ;;  %v12461_v13 = vld [vmem:[%s14700_s4 + $0x2a4] ss:$16 sps:$4 sm:$0xff]  }
 0x50b   : > { %v7328_v17 = vmax.f32 %v7268_v15, 0.0  ;;  %v7269_v18 = vadd.f32 %v14091_v43, %v7202_v16  ;;  %v5167_v19 = vpop.f32.mrb[24].mxu0  ;;  %v6832_v20 = vpop.f32.mrb[24].mxu1  ;;  %v12429_v16 = vld [vmem:[%s14700_s4 + $0x200] ss:$16 sps:$4 sm:$0xff]  }
 0x50c   : > { %v5169_v21 = vpop.f32.mrb[25].mxu0  ;;  %v6834_v22 = vpop.f32.mrb[25].mxu1 }
 0x50d   : > { %7388 = vst [vmem:[#allocation2 + $0x50] sm:$0xff] %v7328_v17  ;;  %v7329_v5 = vmax.f32 %v7269_v18, 0.0  ;;  %v7083_v23 = vmax.f32 %v5167_v19, %v5169_v21  ;;  %v7143_v24 = vmax.f32 %v6832_v20, %v6834_v22  ;;  %v5171_v25 = vpop.f32.mrb[26].mxu0  ;;  %v6836_v26 = vpop.f32.mrb[26].mxu1  ;;  %v12432_v17 = vld [vmem:[%s14700_s4 + $0x208] ss:$16 sps:$4 sm:$0xff]  }
 0x50e   : > { %v5173_v27 = vpop.f32.mrb[27].mxu0  ;;  %v6838_v28 = vpop.f32.mrb[27].mxu1 }
 0x50f   : > { %7389 = vst [vmem:[#allocation2 + $0x58] sm:$0xff] %v7329_v5  ;;  %v7203_v29 = vmax.f32 %v7083_v23, %v7143_v24  ;;  %v7084_v30 = vmax.f32 %v5171_v25, %v5173_v27  ;;  %v7144_v31 = vmax.f32 %v6836_v26, %v6838_v28  ;;  %v12437_v23 = vld [vmem:[%s14700_s4 + $0x224] ss:$16 sps:$4 sm:$0xff]   ;;  %v12440_v24 = vld [vmem:[%s14700_s4 + $0x22c] ss:$16 sps:$4 sm:$0xff]  }
 0x511   : > { %v7270_v32 = vadd.f32 %v14091_v43, %v7203_v29  ;;  %v7204_v33 = vmax.f32 %v7084_v30, %v7144_v31  ;;  %v12435_v30 = vld [vmem:[%s14700_s4 + $0x220] ss:$16 sps:$4 sm:$0xff]  }
 0x513   : > { %v7330_v34 = vmax.f32 %v7270_v32, 0.0  ;;  %v7271_v35 = vadd.f32 %v14091_v43, %v7204_v33  ;;  %v5177_v36 = vpop.f32.mrb[28].mxu0  ;;  %v6842_v37 = vpop.f32.mrb[28].mxu1  ;;  %v12438_v33 = vld [vmem:[%s14700_s4 + $0x228] ss:$16 sps:$4 sm:$0xff]  }
 0x514   : > { %v5179_v38 = vpop.f32.mrb[29].mxu0  ;;  %v6844_v39 = vpop.f32.mrb[29].mxu1 }
 0x515   : > { %7390 = vst [vmem:[#allocation2 + $0x60] sm:$0xff] %v7330_v34  ;;  %v7331_v40 = vmax.f32 %v7271_v35, 0.0  ;;  %v7085_v41 = vmax.f32 %v5177_v36, %v5179_v38  ;;  %v7145_v42 = vmax.f32 %v6842_v37, %v6844_v39  ;;  %v5181_v44 = vpop.f32.mrb[30].mxu0  ;;  %v6846_v45 = vpop.f32.mrb[30].mxu1  ;;  %v12443_v37 = vld [vmem:[%s14700_s4 + $0x244] ss:$16 sps:$4 sm:$0xff]  }
 0x516   : > { %v5183_v47 = vpop.f32.mrb[31].mxu0  ;;  %v6848_v48 = vpop.f32.mrb[31].mxu1  ;;  %v7460_v49 = vld [vmem:[#allocation2 + $0x31] ss:$6 sm:$0xff]  ;;  %v7440_v50 = vld [vmem:[#allocation2 + $0x30] ss:$6 sm:$0xff] }
 0x517   : > { %7391 = vst [vmem:[#allocation2 + $0x68] sm:$0xff] %v7331_v40  ;;  %v7205_v51 = vmax.f32 %v7085_v41, %v7145_v42  ;;  %v7086_v52 = vmax.f32 %v5181_v44, %v5183_v47  ;;  %v7146_v53 = vmax.f32 %v6846_v45, %v6848_v48  ;;  %v7558_v54 = vpack.c.bf16 %v7460_v49, %v7458_v46  ;;  %v12446_v38 = vld [vmem:[%s14700_s4 + $0x24c] ss:$16 sps:$4 sm:$0xff]   ;;  %v12441_v41 = vld [vmem:[%s14700_s4 + $0x240] ss:$16 sps:$4 sm:$0xff]  }
 0x518   : > { %v7557_v56 = vpack.c.bf16 %v7440_v50, %v7438_v55  ;;  %v12444_v42 = vld [vmem:[%s14700_s4 + $0x248] ss:$16 sps:$4 sm:$0xff]   ;;  %v12449_v50 = vld [vmem:[%s14700_s4 + $0x264] ss:$16 sps:$4 sm:$0xff]  }
 0x519   : > { %v7272_v57 = vadd.f32 %v14091_v43, %v7205_v51  ;;  %v7206_v58 = vmax.f32 %v7086_v52, %v7146_v53  ;;  %8793 = vmatprep.mubr.bf16.mxu0 %v7558_v54  ;;  %9042 = vmatprep.mubr.bf16.mxu1 %v7558_v54  ;;  %v12452_v51 = vld [vmem:[%s14700_s4 + $0x26c] ss:$16 sps:$4 sm:$0xff]  }
 0x51a   : > { %8794 = vmatmul.mubr.bf16.vlgmr.msra.gmra.mrb[120].mxu0 %v7557_v56  ;;  %9043 = vmatmul.mubr.bf16.vlgmr.msra.gmra.mrb[120].mxu1 %v7557_v56 }
 0x51b   : > { %v7332_v59 = vmax.f32 %v7272_v57, 0.0  ;;  %v7273_v60 = vadd.f32 %v14091_v43, %v7206_v58  ;;  %v5187_v61 = vpop.f32.mrb[32].mxu0  ;;  %v6852_v62 = vpop.f32.mrb[32].mxu1  ;;  %8845 = vmatpush1.bf16.msra.mxu0 %v12429_v16  ;;  %9094 = vmatpush1.bf16.msra.mxu1 %v12432_v17  ;;  %v12447_v57 = vld [vmem:[%s14700_s4 + $0x260] ss:$16 sps:$4 sm:$0xff]  }
 0x51c   : > { %v5189_v63 = vpop.f32.mrb[33].mxu0  ;;  %v6854_v0 = vpop.f32.mrb[33].mxu1  ;;  %8846 = vmatprep.subr.bf16.mxu0 %v12437_v23  ;;  %9095 = vmatprep.subr.bf16.mxu1 %v12440_v24 }
 0x51d   : > { %7392 = vst [vmem:[#allocation2 + $0x70] sm:$0xff] %v7332_v59  ;;  %v7333_v1 = vmax.f32 %v7273_v60, 0.0  ;;  %v7087_v2 = vmax.f32 %v5187_v61, %v5189_v63  ;;  %v7147_v3 = vmax.f32 %v6852_v62, %v6854_v0  ;;  %v5191_v4 = vpop.f32.mrb[34].mxu0  ;;  %v6856_v6 = vpop.f32.mrb[34].mxu1  ;;  %v12450_v63 = vld [vmem:[%s14700_s4 + $0x268] ss:$16 sps:$4 sm:$0xff]  }
 0x51e   : > { %v5193_v7 = vpop.f32.mrb[35].mxu0  ;;  %v6858_v8 = vpop.f32.mrb[35].mxu1  ;;  %v12455_v0 = vld [vmem:[%s14700_s4 + $0x284] ss:$16 sps:$4 sm:$0xff]  }
 0x51f   : > { %7393 = vst [vmem:[#allocation2 + $0x78] sm:$0xff] %v7333_v1  ;;  %v7207_v9 = vmax.f32 %v7087_v2, %v7147_v3  ;;  %v7088_v10 = vmax.f32 %v5191_v4, %v5193_v7  ;;  %v7148_v11 = vmax.f32 %v6856_v6, %v6858_v8  ;;  %8847 = vmatpush1.bf16.msra.mxu0 %v12435_v30  ;;  %v12458_v1 = vld [vmem:[%s14700_s4 + $0x28c] ss:$16 sps:$4 sm:$0xff]   ;;  %v12453_v4 = vld [vmem:[%s14700_s4 + $0x280] ss:$16 sps:$4 sm:$0xff]  }
 0x520   : > { %9096 = vmatpush1.bf16.msra.mxu1 %v12438_v33  ;;  %8848 = vmatprep.subr.bf16.mxu0 %v12443_v37  ;;  %v12456_v6 = vld [vmem:[%s14700_s4 + $0x288] ss:$16 sps:$4 sm:$0xff]   ;;  %v12465_v30 = vld [vmem:[%s14700_s4 + $0x2c0] ss:$16 sps:$4 sm:$0xff]  }
 0x521   : > { %v7274_v14 = vadd.f32 %v14091_v43, %v7207_v9  ;;  %v7208_v15 = vmax.f32 %v7088_v10, %v7148_v11  ;;  %9097 = vmatprep.subr.bf16.mxu1 %v12446_v38  ;;  %v12473_v38 = vld [vmem:[%s14700_s4 + $0x2e4] ss:$16 sps:$4 sm:$0xff]  }
 0x523   : > { %v7334_v18 = vmax.f32 %v7274_v14, 0.0  ;;  %v7275_v19 = vadd.f32 %v14091_v43, %v7208_v15  ;;  %v5197_v20 = vpop.f32.mrb[36].mxu0  ;;  %v6862_v21 = vpop.f32.mrb[36].mxu1  ;;  %8849 = vmatpush1.bf16.msra.mxu0 %v12441_v41  ;;  %v12464_v14 = vld [vmem:[%s14700_s4 + $0x2ac] ss:$16 sps:$4 sm:$0xff]  }
 0x524   : > { %v5199_v22 = vpop.f32.mrb[37].mxu0  ;;  %v6864_v5 = vpop.f32.mrb[37].mxu1  ;;  %9098 = vmatpush1.bf16.msra.mxu1 %v12444_v42  ;;  %8850 = vmatprep.subr.bf16.mxu0 %v12449_v50 }
 0x525   : > { %7394 = vst [vmem:[#allocation2 + $0x80] sm:$0xff] %v7334_v18  ;;  %v7335_v25 = vmax.f32 %v7275_v19, 0.0  ;;  %v7089_v26 = vmax.f32 %v5197_v20, %v5199_v22  ;;  %v7149_v27 = vmax.f32 %v6862_v21, %v6864_v5  ;;  %v5201_v28 = vpop.f32.mrb[38].mxu0  ;;  %v6866_v29 = vpop.f32.mrb[38].mxu1  ;;  %9099 = vmatprep.subr.bf16.mxu1 %v12452_v51  ;;  %v12459_v20 = vld [vmem:[%s14700_s4 + $0x2a0] ss:$16 sps:$4 sm:$0xff]  }
 0x526   : > { %v5203_v31 = vpop.f32.mrb[39].mxu0  ;;  %v6868_v32 = vpop.f32.mrb[39].mxu1  ;;  %v12462_v5 = vld [vmem:[%s14700_s4 + $0x2a8] ss:$16 sps:$4 sm:$0xff]  }
 0x527   : > { %7395 = vst [vmem:[#allocation2 + $0x88] sm:$0xff] %v7335_v25  ;;  %v7209_v34 = vmax.f32 %v7089_v26, %v7149_v27  ;;  %v7090_v35 = vmax.f32 %v5201_v28, %v5203_v31  ;;  %v7150_v36 = vmax.f32 %v6866_v29, %v6868_v32  ;;  %8851 = vmatpush1.bf16.msra.mxu0 %v12447_v57  ;;  %v12467_v26 = vld [vmem:[%s14700_s4 + $0x2c4] ss:$16 sps:$4 sm:$0xff]   ;;  %v12470_v27 = vld [vmem:[%s14700_s4 + $0x2cc] ss:$16 sps:$4 sm:$0xff]  }
 0x528   : > { %9100 = vmatpush1.bf16.msra.mxu1 %v12450_v63  ;;  %8852 = vmatprep.subr.bf16.mxu0 %v12455_v0  ;;  %v12468_v31 = vld [vmem:[%s14700_s4 + $0x2c8] ss:$16 sps:$4 sm:$0xff]   ;;  %v12477_v57 = vld [vmem:[%s14700_s4 + $0x300] ss:$16 sps:$4 sm:$0xff]  }
 0x529   : > { %v7276_v39 = vadd.f32 %v14091_v43, %v7209_v34  ;;  %v7210_v40 = vmax.f32 %v7090_v35, %v7150_v36  ;;  %9101 = vmatprep.subr.bf16.mxu1 %v12458_v1 }
 0x52b   : > { %v7336_v44 = vmax.f32 %v7276_v39, 0.0  ;;  %v7277_v45 = vadd.f32 %v14091_v43, %v7210_v40  ;;  %v5207_v46 = vpop.f32.mrb[40].mxu0  ;;  %v6872_v47 = vpop.f32.mrb[40].mxu1  ;;  %8853 = vmatpush1.bf16.msra.mxu0 %v12453_v4  ;;  %v12476_v39 = vld [vmem:[%s14700_s4 + $0x2ec] ss:$16 sps:$4 sm:$0xff]  }
 0x52c   : > { %v5209_v48 = vpop.f32.mrb[41].mxu0  ;;  %v6874_v49 = vpop.f32.mrb[41].mxu1  ;;  %9102 = vmatpush1.bf16.msra.mxu1 %v12456_v6  ;;  %8854 = vmatprep.subr.bf16.mxu0 %v12461_v13 }
 0x52d   : > { %7396 = vst [vmem:[#allocation2 + $0x90] sm:$0xff] %v7336_v44  ;;  %v7337_v52 = vmax.f32 %v7277_v45, 0.0  ;;  %v7091_v53 = vmax.f32 %v5207_v46, %v5209_v48  ;;  %v7151_v54 = vmax.f32 %v6872_v47, %v6874_v49  ;;  %v5211_v55 = vpop.f32.mrb[42].mxu0  ;;  %v6876_v56 = vpop.f32.mrb[42].mxu1  ;;  %9103 = vmatprep.subr.bf16.mxu1 %v12464_v14  ;;  %v12471_v46 = vld [vmem:[%s14700_s4 + $0x2e0] ss:$16 sps:$4 sm:$0xff]  }
 0x52e   : > { %v5213_v58 = vpop.f32.mrb[43].mxu0  ;;  %v6878_v59 = vpop.f32.mrb[43].mxu1  ;;  %v12474_v49 = vld [vmem:[%s14700_s4 + $0x2e8] ss:$16 sps:$4 sm:$0xff]  }
 0x52f   : > { %7397 = vst [vmem:[#allocation2 + $0x98] sm:$0xff] %v7337_v52  ;;  %v7211_v60 = vmax.f32 %v7091_v53, %v7151_v54  ;;  %v7092_v61 = vmax.f32 %v5211_v55, %v5213_v58  ;;  %v7152_v62 = vmax.f32 %v6876_v56, %v6878_v59  ;;  %8855 = vmatpush1.bf16.msra.mxu0 %v12459_v20  ;;  %v12479_v53 = vld [vmem:[%s14700_s4 + $0x304] ss:$16 sps:$4 sm:$0xff]   ;;  %v12482_v54 = vld [vmem:[%s14700_s4 + $0x30c] ss:$16 sps:$4 sm:$0xff]  }
 0x530   : > { %9104 = vmatpush1.bf16.msra.mxu1 %v12462_v5  ;;  %8856 = vmatprep.subr.bf16.mxu0 %v12467_v26  ;;  %v12480_v58 = vld [vmem:[%s14700_s4 + $0x308] ss:$16 sps:$4 sm:$0xff]   ;;  %v12494_v5 = vld [vmem:[%s14700_s4 + $0x34c] ss:$16 sps:$4 sm:$0xff]  }
 0x531   : > { %v7278_v2 = vadd.f32 %v14091_v43, %v7211_v60  ;;  %v7212_v3 = vmax.f32 %v7092_v61, %v7152_v62  ;;  %9105 = vmatprep.subr.bf16.mxu1 %v12470_v27  ;;  %v7462_v1 = vld [vmem:[#allocation2 + $0x61] ss:$6 sm:$0xff] }
 0x532   : > { %v12486_v20 = vld [vmem:[%s14700_s4 + $0x328] ss:$16 sps:$4 sm:$0xff]  }
 0x533   : > { %v7338_v7 = vmax.f32 %v7278_v2, 0.0  ;;  %v7279_v8 = vadd.f32 %v14091_v43, %v7212_v3  ;;  %v5217_v9 = vpop.f32.mrb[44].mxu0  ;;  %v6882_v10 = vpop.f32.mrb[44].mxu1  ;;  %8857 = vmatpush1.bf16.msra.mxu0 %v12465_v30  ;;  %v12485_v2 = vld [vmem:[%s14700_s4 + $0x324] ss:$16 sps:$4 sm:$0xff]  }
 0x534   : > { %v5219_v11 = vpop.f32.mrb[45].mxu0  ;;  %v6884_v12 = vpop.f32.mrb[45].mxu1  ;;  %9106 = vmatpush1.bf16.msra.mxu1 %v12468_v31  ;;  %8858 = vmatprep.subr.bf16.mxu0 %v12473_v38  ;;  %v12488_v3 = vld [vmem:[%s14700_s4 + $0x32c] ss:$16 sps:$4 sm:$0xff]   ;;  %v12492_v30 = vld [vmem:[%s14700_s4 + $0x348] ss:$16 sps:$4 sm:$0xff]  }
 0x535   : > { %7398 = vst [vmem:[#allocation2 + $0xa0] sm:$0xff] %v7338_v7  ;;  %v7339_v15 = vmax.f32 %v7279_v8, 0.0  ;;  %v7093_v16 = vmax.f32 %v5217_v9, %v5219_v11  ;;  %v7153_v17 = vmax.f32 %v6882_v10, %v6884_v12  ;;  %v5221_v18 = vpop.f32.mrb[46].mxu0  ;;  %v6886_v19 = vpop.f32.mrb[46].mxu1  ;;  %9107 = vmatprep.subr.bf16.mxu1 %v12476_v39  ;;  %v12483_v10 = vld [vmem:[%s14700_s4 + $0x320] ss:$16 sps:$4 sm:$0xff]  }
 0x536   : > { %v5223_v21 = vpop.f32.mrb[47].mxu0  ;;  %v6888_v22 = vpop.f32.mrb[47].mxu1 }
 0x537   : > { %7399 = vst [vmem:[#allocation2 + $0xa8] sm:$0xff] %v7339_v15  ;;  %v7213_v23 = vmax.f32 %v7093_v16, %v7153_v17  ;;  %v7094_v24 = vmax.f32 %v5221_v18, %v5223_v21  ;;  %v7154_v25 = vmax.f32 %v6886_v19, %v6888_v22  ;;  %8859 = vmatpush1.bf16.msra.mxu0 %v12471_v46  ;;  %v7442_v19 = vld [vmem:[#allocation2 + $0x60] ss:$6 sm:$0xff] }
 0x538   : > { %9108 = vmatpush1.bf16.msra.mxu1 %v12474_v49  ;;  %8860 = vmatprep.subr.bf16.mxu0 %v12479_v53  ;;  %v12491_v22 = vld [vmem:[%s14700_s4 + $0x344] ss:$16 sps:$4 sm:$0xff]   ;;  %v12501_v49 = vld [vmem:[%s14700_s4 + $0x380] ss:$16 sps:$4 sm:$0xff]  }
 0x539   : > { %v7280_v28 = vadd.f32 %v14091_v43, %v7213_v23  ;;  %v7214_v29 = vmax.f32 %v7094_v24, %v7154_v25  ;;  %9109 = vmatprep.subr.bf16.mxu1 %v12482_v54  ;;  %v12489_v25 = vld [vmem:[%s14700_s4 + $0x340] ss:$16 sps:$4 sm:$0xff]   ;;  %v12509_v53 = vld [vmem:[%s14700_s4 + $0x3a4] ss:$16 sps:$4 sm:$0xff]  }
 0x53b   : > { %v7340_v32 = vmax.f32 %v7280_v28, 0.0  ;;  %v7281_v33 = vadd.f32 %v14091_v43, %v7214_v29  ;;  %v5227_v34 = vpop.f32.mrb[48].mxu0  ;;  %v6892_v35 = vpop.f32.mrb[48].mxu1  ;;  %8861 = vmatpush1.bf16.msra.mxu0 %v12477_v57 }
 0x53c   : > { %v5229_v36 = vpop.f32.mrb[49].mxu0  ;;  %v6894_v37 = vpop.f32.mrb[49].mxu1  ;;  %9110 = vmatpush1.bf16.msra.mxu1 %v12480_v58  ;;  %8862 = vmatprep.subr.bf16.mxu0 %v12485_v2  ;;  %v12504_v58 = vld [vmem:[%s14700_s4 + $0x388] ss:$16 sps:$4 sm:$0xff]  }
 0x53d   : > { %7400 = vst [vmem:[#allocation2 + $0xb0] sm:$0xff] %v7340_v32  ;;  %v7341_v40 = vmax.f32 %v7281_v33, 0.0  ;;  %v7095_v41 = vmax.f32 %v5227_v34, %v5229_v36  ;;  %v7155_v42 = vmax.f32 %v6892_v35, %v6894_v37  ;;  %v5231_v44 = vpop.f32.mrb[50].mxu0  ;;  %v6896_v45 = vpop.f32.mrb[50].mxu1  ;;  %9111 = vmatprep.subr.bf16.mxu1 %v12488_v3  ;;  %v12497_v33 = vld [vmem:[%s14700_s4 + $0x364] ss:$16 sps:$4 sm:$0xff]  }
 0x53e   : > { %v5233_v47 = vpop.f32.mrb[51].mxu0  ;;  %v6898_v48 = vpop.f32.mrb[51].mxu1  ;;  %v12500_v34 = vld [vmem:[%s14700_s4 + $0x36c] ss:$16 sps:$4 sm:$0xff]  }
 0x53f   : > { %7401 = vst [vmem:[#allocation2 + $0xb8] sm:$0xff] %v7341_v40  ;;  %v7215_v50 = vmax.f32 %v7095_v41, %v7155_v42  ;;  %v7096_v51 = vmax.f32 %v5231_v44, %v5233_v47  ;;  %v7156_v52 = vmax.f32 %v6896_v45, %v6898_v48  ;;  %8863 = vmatpush1.bf16.msra.mxu0 %v12483_v10  ;;  %v12495_v40 = vld [vmem:[%s14700_s4 + $0x360] ss:$16 sps:$4 sm:$0xff]   ;;  %v12498_v47 = vld [vmem:[%s14700_s4 + $0x368] ss:$16 sps:$4 sm:$0xff]  }
 0x540   : > { %9112 = vmatpush1.bf16.msra.mxu1 %v12486_v20  ;;  %8864 = vmatprep.subr.bf16.mxu0 %v12491_v22  ;;  %v12503_v48 = vld [vmem:[%s14700_s4 + $0x384] ss:$16 sps:$4 sm:$0xff]   ;;  %v12510_v10 = vld [vmem:[%s14700_s4 + $0x3a8] ss:$16 sps:$4 sm:$0xff]  }
 0x541   : > { %v7282_v55 = vadd.f32 %v14091_v43, %v7215_v50  ;;  %v7216_v56 = vmax.f32 %v7096_v51, %v7156_v52  ;;  %9113 = vmatprep.subr.bf16.mxu1 %v12494_v5  ;;  %v12506_v50 = vld [vmem:[%s14700_s4 + $0x38c] ss:$16 sps:$4 sm:$0xff]   ;;  %v12516_v20 = vld [vmem:[%s14700_s4 + $0x3c8] ss:$16 sps:$4 sm:$0xff]   ;;  %v12519_v5 = vld [vmem:[%s14700_s4 + $0x3e0] ss:$16 sps:$4 sm:$0xff]  }
 0x543   : > { %v7342_v59 = vmax.f32 %v7282_v55, 0.0  ;;  %v7283_v60 = vadd.f32 %v14091_v43, %v7216_v56  ;;  %v5237_v61 = vpop.f32.mrb[52].mxu0  ;;  %v6902_v62 = vpop.f32.mrb[52].mxu1  ;;  %8865 = vmatpush1.bf16.msra.mxu0 %v12489_v25 }
 0x544   : > { %v5239_v63 = vpop.f32.mrb[53].mxu0  ;;  %v6904_v0 = vpop.f32.mrb[53].mxu1  ;;  %8866 = vmatprep.subr.bf16.mxu0 %v12497_v33  ;;  %9114 = vmatpush1.bf16.msra.mxu1 %v12492_v30 }
 0x545   : > { %7402 = vst [vmem:[#allocation2 + $0xc0] sm:$0xff] %v7342_v59  ;;  %v7343_v4 = vmax.f32 %v7283_v60, 0.0  ;;  %v7097_v6 = vmax.f32 %v5237_v61, %v5239_v63  ;;  %v7157_v7 = vmax.f32 %v6902_v62, %v6904_v0  ;;  %v5241_v8 = vpop.f32.mrb[54].mxu0  ;;  %v6906_v9 = vpop.f32.mrb[54].mxu1  ;;  %9115 = vmatprep.subr.bf16.mxu1 %v12500_v34  ;;  %v12507_v61 = vld [vmem:[%s14700_s4 + $0x3a0] ss:$16 sps:$4 sm:$0xff]  }
 0x546   : > { %v5243_v11 = vpop.f32.mrb[55].mxu0  ;;  %v6908_v12 = vpop.f32.mrb[55].mxu1  ;;  %v7464_v13 = vld [vmem:[#allocation2 + $0x91] ss:$6 sm:$0xff]  ;;  %v7444_v14 = vld [vmem:[#allocation2 + $0x90] ss:$6 sm:$0xff] }
 0x547   : > { %7403 = vst [vmem:[#allocation2 + $0xc8] sm:$0xff] %v7343_v4  ;;  %v7217_v15 = vmax.f32 %v7097_v6, %v7157_v7  ;;  %v7098_v16 = vmax.f32 %v5241_v8, %v5243_v11  ;;  %v7158_v17 = vmax.f32 %v6906_v9, %v6908_v12  ;;  %v7564_v18 = vpack.c.bf16 %v7464_v13, %v7462_v1  ;;  %v12512_v62 = vld [vmem:[%s14700_s4 + $0x3ac] ss:$16 sps:$4 sm:$0xff]   ;;  %v12515_v11 = vld [vmem:[%s14700_s4 + $0x3c4] ss:$16 sps:$4 sm:$0xff]  }
 0x548   : > { %v7563_v21 = vpack.c.bf16 %v7444_v14, %v7442_v19  ;;  %8867 = vmatpush1.bf16.msra.mxu0 %v12495_v40  ;;  %9116 = vmatpush1.bf16.msra.mxu1 %v12498_v47  ;;  %v12518_v12 = vld [vmem:[%s14700_s4 + $0x3cc] ss:$16 sps:$4 sm:$0xff]  }
 0x549   : > { %v7284_v23 = vadd.f32 %v14091_v43, %v7217_v15  ;;  %v7218_v24 = vmax.f32 %v7098_v16, %v7158_v17  ;;  %8803 = vmatprep.mubr.bf16.mxu0 %v7564_v18  ;;  %9052 = vmatprep.mubr.bf16.mxu1 %v7564_v18  ;;  %v12513_v15 = vld [vmem:[%s14700_s4 + $0x3c0] ss:$16 sps:$4 sm:$0xff]  }
 0x54a   : > { %8804 = vmatmul.mubr.bf16.gmra.mrb[124].mxu0 %v7563_v21  ;;  %9053 = vmatmul.mubr.bf16.gmra.mrb[124].mxu1 %v7563_v21 }
 0x54b   : > { %v7344_v26 = vmax.f32 %v7284_v23, 0.0  ;;  %v7285_v27 = vadd.f32 %v14091_v43, %v7218_v24  ;;  %v5247_v28 = vpop.f32.mrb[56].mxu0  ;;  %v6912_v29 = vpop.f32.mrb[56].mxu1  ;;  %8868 = vmatprep.subr.bf16.mxu0 %v12503_v48  ;;  %9117 = vmatprep.subr.bf16.mxu1 %v12506_v50  ;;  %v12521_v23 = vld [vmem:[%s14700_s4 + $0x3e4] ss:$16 sps:$4 sm:$0xff]  }
 0x54c   : > { %v5249_v31 = vpop.f32.mrb[57].mxu0  ;;  %v6914_v32 = vpop.f32.mrb[57].mxu1  ;;  %8869 = vmatpush1.bf16.msra.mxu0 %v12501_v49  ;;  %9118 = vmatpush1.bf16.msra.mxu1 %v12504_v58 }
 0x54d   : > { %7404 = vst [vmem:[#allocation2 + $0xd0] sm:$0xff] %v7344_v26  ;;  %v7345_v35 = vmax.f32 %v7285_v27, 0.0  ;;  %v7099_v36 = vmax.f32 %v5247_v28, %v5249_v31  ;;  %v7159_v37 = vmax.f32 %v6912_v29, %v6914_v32  ;;  %v5251_v38 = vpop.f32.mrb[58].mxu0  ;;  %v6916_v39 = vpop.f32.mrb[58].mxu1  ;;  %8870 = vmatprep.subr.bf16.mxu0 %v12509_v53  ;;  %9119 = vmatprep.subr.bf16.mxu1 %v12512_v62  ;;  %v12524_v29 = vld [vmem:[%s14700_s4 + $0x3ec] ss:$16 sps:$4 sm:$0xff]  }
 0x54e   : > { %v5253_v41 = vpop.f32.mrb[59].mxu0  ;;  %v6918_v42 = vpop.f32.mrb[59].mxu1 }
 0x54f   : > { %7405 = vst [vmem:[#allocation2 + $0xd8] sm:$0xff] %v7345_v35  ;;  %v7219_v44 = vmax.f32 %v7099_v36, %v7159_v37  ;;  %v7100_v45 = vmax.f32 %v5251_v38, %v5253_v41  ;;  %v7160_v46 = vmax.f32 %v6916_v39, %v6918_v42  ;;  %v12522_v35 = vld [vmem:[%s14700_s4 + $0x3e8] ss:$16 sps:$4 sm:$0xff]   ;;  %v12527_v36 = vld [vmem:[%s14700_s4 + $0x404] ss:$16 sps:$4 sm:$0xff]  }
 0x550   : > { %8871 = vmatpush1.bf16.msra.mxu0 %v12507_v61  ;;  %9120 = vmatpush1.bf16.msra.mxu1 %v12510_v10  ;;  %v12530_v37 = vld [vmem:[%s14700_s4 + $0x40c] ss:$16 sps:$4 sm:$0xff]  }
 0x551   : > { %v7286_v51 = vadd.f32 %v14091_v43, %v7219_v44  ;;  %v7220_v52 = vmax.f32 %v7100_v45, %v7160_v46  ;;  %8872 = vmatprep.subr.bf16.mxu0 %v12515_v11  ;;  %9121 = vmatprep.subr.bf16.mxu1 %v12518_v12 }
 0x553   : > { %v7346_v54 = vmax.f32 %v7286_v51, 0.0  ;;  %v7287_v55 = vadd.f32 %v14091_v43, %v7220_v52  ;;  %v5257_v56 = vpop.f32.mrb[60].mxu0  ;;  %v6922_v57 = vpop.f32.mrb[60].mxu1 }
 0x554   : > { %v5259_v59 = vpop.f32.mrb[61].mxu0  ;;  %v6924_v60 = vpop.f32.mrb[61].mxu1  ;;  %8873 = vmatpush1.bf16.msra.mxu0 %v12513_v15  ;;  %9122 = vmatpush1.bf16.msra.mxu1 %v12516_v20 }
 0x555   : > { %7406 = vst [vmem:[#allocation2 + $0xe0] sm:$0xff] %v7346_v54  ;;  %v7347_v63 = vmax.f32 %v7287_v55, 0.0  ;;  %v7101_v0 = vmax.f32 %v5257_v56, %v5259_v59  ;;  %v7161_v1 = vmax.f32 %v6922_v57, %v6924_v60  ;;  %v5261_v2 = vpop.f32.mrb[62].mxu0  ;;  %v6926_v3 = vpop.f32.mrb[62].mxu1  ;;  %8874 = vmatprep.subr.bf16.mxu0 %v12521_v23  ;;  %9123 = vmatprep.subr.bf16.mxu1 %v12524_v29  ;;  %v14341_v60 = vld [vmem:[%s14699_s3] ss:$0 sm:$0xff] }
 0x556   : > { %v5263_v4 = vpop.f32.mrb[63].mxu0  ;;  %v6928_v6 = vpop.f32.mrb[63].mxu1 }
 0x557   : > { %7407 = vst [vmem:[#allocation2 + $0xe8] sm:$0xff] %v7347_v63  ;;  %v7221_v7 = vmax.f32 %v7101_v0, %v7161_v1  ;;  %v7102_v8 = vmax.f32 %v5261_v2, %v5263_v4  ;;  %v7162_v9 = vmax.f32 %v6926_v3, %v6928_v6 }
 0x558   : > { %8875 = vmatpush1.bf16.msra.mxu0 %v12519_v5  ;;  %9124 = vmatpush1.bf16.msra.mxu1 %v12522_v35 }
 0x559   : > { %v7288_v13 = vadd.f32 %v14091_v43, %v7221_v7  ;;  %v7222_v14 = vmax.f32 %v7102_v8, %v7162_v9  ;;  %8927 = vmatprep.subr.bf16.mxu0 %v12527_v36  ;;  %9176 = vmatprep.subr.bf16.mxu1 %v12530_v37 }
 0x55b   : > { %v7348_v16 = vmax.f32 %v7288_v13, 0.0  ;;  %v7289_v17 = vadd.f32 %v14091_v43, %v7222_v14  ;;  %v5267_v18 = vpop.f32.mrb[64].mxu0  ;;  %v6932_v19 = vpop.f32.mrb[64].mxu1 }
 0x55c   : > { %v5269_v21 = vpop.f32.mrb[65].mxu0  ;;  %v6934_v22 = vpop.f32.mrb[65].mxu1 }
 0x55d   : > { %7408 = vst [vmem:[#allocation2 + $0xf0] sm:$0xff] %v7348_v16  ;;  %v7349_v24 = vmax.f32 %v7289_v17, 0.0  ;;  %v7103_v25 = vmax.f32 %v5267_v18, %v5269_v21  ;;  %v7163_v26 = vmax.f32 %v6932_v19, %v6934_v22  ;;  %v5271_v27 = vpop.f32.mrb[66].mxu0  ;;  %v6936_v28 = vpop.f32.mrb[66].mxu1 }
 0x55e   : > { %v5273_v30 = vpop.f32.mrb[67].mxu0  ;;  %v6938_v31 = vpop.f32.mrb[67].mxu1 }
 0x55f   : > { %7409 = vst [vmem:[#allocation2 + $0xf8] sm:$0xff] %v7349_v24  ;;  %v7223_v32 = vmax.f32 %v7103_v25, %v7163_v26  ;;  %v7104_v33 = vmax.f32 %v5271_v27, %v5273_v30  ;;  %v7164_v34 = vmax.f32 %v6936_v28, %v6938_v31  ;;  %v7466_v24 = vld [vmem:[#allocation2 + $0xc1] ss:$6 sm:$0xff] }
 0x561   : > { %v7290_v38 = vadd.f32 %v14091_v43, %v7223_v32  ;;  %v7224_v39 = vmax.f32 %v7104_v33, %v7164_v34  ;;  %v7446_v33 = vld [vmem:[#allocation2 + $0xc0] ss:$6 sm:$0xff] }
 0x563   : > { %v7350_v40 = vmax.f32 %v7290_v38, 0.0  ;;  %v7291_v41 = vadd.f32 %v14091_v43, %v7224_v39  ;;  %v5277_v42 = vpop.f32.mrb[68].mxu0  ;;  %v6942_v44 = vpop.f32.mrb[68].mxu1 }
 0x564   : > { %v5279_v45 = vpop.f32.mrb[69].mxu0  ;;  %v6944_v46 = vpop.f32.mrb[69].mxu1 }
 0x565   : > { %7410 = vst [vmem:[#allocation2 + $0x100] sm:$0xff] %v7350_v40  ;;  %v7351_v47 = vmax.f32 %v7291_v41, 0.0  ;;  %v7105_v48 = vmax.f32 %v5277_v42, %v5279_v45  ;;  %v7165_v49 = vmax.f32 %v6942_v44, %v6944_v46  ;;  %v5281_v50 = vpop.f32.mrb[70].mxu0  ;;  %v6946_v51 = vpop.f32.mrb[70].mxu1 }
 0x566   : > { %v5283_v52 = vpop.f32.mrb[71].mxu0  ;;  %v6948_v53 = vpop.f32.mrb[71].mxu1 }
 0x567   : > { %7411 = vst [vmem:[#allocation2 + $0x108] sm:$0xff] %v7351_v47  ;;  %v7225_v54 = vmax.f32 %v7105_v48, %v7165_v49  ;;  %v7106_v55 = vmax.f32 %v5281_v50, %v5283_v52  ;;  %v7166_v56 = vmax.f32 %v6946_v51, %v6948_v53 }
 0x569   : > { %v7292_v57 = vadd.f32 %v14091_v43, %v7225_v54  ;;  %v7226_v58 = vmax.f32 %v7106_v55, %v7166_v56 }
 0x56b   : > { %v7352_v59 = vmax.f32 %v7292_v57, 0.0  ;;  %v7293_v61 = vadd.f32 %v14341_v60, %v7226_v58  ;;  %v5287_v62 = vpop.f32.mrb[72].mxu0  ;;  %v6952_v63 = vpop.f32.mrb[72].mxu1 }
 0x56c   : > { %v5289_v0 = vpop.f32.mrb[73].mxu0  ;;  %v6954_v1 = vpop.f32.mrb[73].mxu1 }
 0x56d   : > { %7412 = vst [vmem:[#allocation2 + $0x110] sm:$0xff] %v7352_v59  ;;  %v7353_v2 = vmax.f32 %v7293_v61, 0.0  ;;  %v7107_v3 = vmax.f32 %v5287_v62, %v5289_v0  ;;  %v7167_v4 = vmax.f32 %v6952_v63, %v6954_v1  ;;  %v5291_v6 = vpop.f32.mrb[74].mxu0  ;;  %v6956_v7 = vpop.f32.mrb[74].mxu1 }
 0x56e   : > { %v5293_v43 = vpop.f32.mrb[75].mxu0  ;;  %v6958_v8 = vpop.f32.mrb[75].mxu1 }
 0x56f   : > { %7413 = vst [vmem:[#allocation2 + $0x118] sm:$0xff] %v7353_v2  ;;  %v7227_v9 = vmax.f32 %v7107_v3, %v7167_v4  ;;  %v7108_v10 = vmax.f32 %v5291_v6, %v5293_v43  ;;  %v7168_v11 = vmax.f32 %v6956_v7, %v6958_v8 }
 0x571   : > { %v7294_v12 = vadd.f32 %v14341_v60, %v7227_v9  ;;  %v7228_v13 = vmax.f32 %v7108_v10, %v7168_v11 }
 0x573   : > { %v7354_v14 = vmax.f32 %v7294_v12, 0.0  ;;  %v7295_v15 = vadd.f32 %v14341_v60, %v7228_v13  ;;  %v5297_v16 = vpop.f32.mrb[76].mxu0  ;;  %v6962_v17 = vpop.f32.mrb[76].mxu1 }
 0x574   : > { %v5299_v18 = vpop.f32.mrb[77].mxu0  ;;  %v6964_v19 = vpop.f32.mrb[77].mxu1 }
 0x575   : > { %7414 = vst [vmem:[#allocation2 + $0x120] sm:$0xff] %v7354_v14  ;;  %v7355_v20 = vmax.f32 %v7295_v15, 0.0  ;;  %v7109_v21 = vmax.f32 %v5297_v16, %v5299_v18  ;;  %v7169_v22 = vmax.f32 %v6962_v17, %v6964_v19  ;;  %v5301_v5 = vpop.f32.mrb[78].mxu0  ;;  %v6966_v23 = vpop.f32.mrb[78].mxu1 }
 0x576   : > { %v5303_v25 = vpop.f32.mrb[79].mxu0  ;;  %v6968_v26 = vpop.f32.mrb[79].mxu1  ;;  %v7468_v27 = vld [vmem:[#allocation2 + $0xf1] ss:$6 sm:$0xff]  ;;  %v7448_v28 = vld [vmem:[#allocation2 + $0xf0] ss:$6 sm:$0xff] }
 0x577   : > { %7415 = vst [vmem:[#allocation2 + $0x128] sm:$0xff] %v7355_v20  ;;  %v7229_v29 = vmax.f32 %v7109_v21, %v7169_v22  ;;  %v7110_v30 = vmax.f32 %v5301_v5, %v5303_v25  ;;  %v7170_v31 = vmax.f32 %v6966_v23, %v6968_v26  ;;  %v7570_v32 = vpack.c.bf16 %v7468_v27, %v7466_v24 }
 0x578   : > { %v7569_v34 = vpack.c.bf16 %v7448_v28, %v7446_v33 }
 0x579   : > { %v7296_v35 = vadd.f32 %v14341_v60, %v7229_v29  ;;  %v7230_v36 = vmax.f32 %v7110_v30, %v7170_v31  ;;  %8813 = vmatprep.mubr.bf16.mxu0 %v7570_v32  ;;  %9062 = vmatprep.mubr.bf16.mxu1 %v7570_v32 }
 0x57a   : > { %8814 = vmatmul.mubr.bf16.gmra.mrb[128].mxu0 %v7569_v34  ;;  %9063 = vmatmul.mubr.bf16.gmra.mrb[128].mxu1 %v7569_v34 }
 0x57b   : > { %v7356_v37 = vmax.f32 %v7296_v35, 0.0  ;;  %v7297_v38 = vadd.f32 %v14341_v60, %v7230_v36  ;;  %v5307_v39 = vpop.f32.mrb[80].mxu0  ;;  %v6972_v40 = vpop.f32.mrb[80].mxu1 }
 0x57c   : > { %v5309_v41 = vpop.f32.mrb[81].mxu0  ;;  %v6974_v42 = vpop.f32.mrb[81].mxu1 }
 0x57d   : > { %7416 = vst [vmem:[#allocation2 + $0x130] sm:$0xff] %v7356_v37  ;;  %v7357_v44 = vmax.f32 %v7297_v38, 0.0  ;;  %v7111_v45 = vmax.f32 %v5307_v39, %v5309_v41  ;;  %v7171_v46 = vmax.f32 %v6972_v40, %v6974_v42  ;;  %v5311_v47 = vpop.f32.mrb[82].mxu0  ;;  %v6976_v48 = vpop.f32.mrb[82].mxu1 }
 0x57e   : > { %v5313_v49 = vpop.f32.mrb[83].mxu0  ;;  %v6978_v50 = vpop.f32.mrb[83].mxu1 }
 0x57f   : > { %7417 = vst [vmem:[#allocation2 + $0x138] sm:$0xff] %v7357_v44  ;;  %v7231_v51 = vmax.f32 %v7111_v45, %v7171_v46  ;;  %v7112_v52 = vmax.f32 %v5311_v47, %v5313_v49  ;;  %v7172_v53 = vmax.f32 %v6976_v48, %v6978_v50 }
 0x581   : > { %v7298_v54 = vadd.f32 %v14341_v60, %v7231_v51  ;;  %v7232_v55 = vmax.f32 %v7112_v52, %v7172_v53 }
 0x583   : > { %v7358_v56 = vmax.f32 %v7298_v54, 0.0  ;;  %v7299_v57 = vadd.f32 %v14341_v60, %v7232_v55  ;;  %v5317_v58 = vpop.f32.mrb[84].mxu0  ;;  %v6982_v59 = vpop.f32.mrb[84].mxu1 }
 0x584   : > { %v5319_v61 = vpop.f32.mrb[85].mxu0  ;;  %v6984_v62 = vpop.f32.mrb[85].mxu1 }
 0x585   : > { %7418 = vst [vmem:[#allocation2 + $0x140] sm:$0xff] %v7358_v56  ;;  %v7359_v63 = vmax.f32 %v7299_v57, 0.0  ;;  %v7113_v0 = vmax.f32 %v5317_v58, %v5319_v61  ;;  %v7173_v1 = vmax.f32 %v6982_v59, %v6984_v62  ;;  %v5321_v2 = vpop.f32.mrb[86].mxu0  ;;  %v6986_v3 = vpop.f32.mrb[86].mxu1 }
 0x586   : > { %v5323_v4 = vpop.f32.mrb[87].mxu0  ;;  %v6988_v6 = vpop.f32.mrb[87].mxu1 }
 0x587   : > { %7419 = vst [vmem:[#allocation2 + $0x148] sm:$0xff] %v7359_v63  ;;  %v7233_v7 = vmax.f32 %v7113_v0, %v7173_v1  ;;  %v7114_v43 = vmax.f32 %v5321_v2, %v5323_v4  ;;  %v7174_v8 = vmax.f32 %v6986_v3, %v6988_v6 }
 0x589   : > { %v7300_v9 = vadd.f32 %v14341_v60, %v7233_v7  ;;  %v7234_v10 = vmax.f32 %v7114_v43, %v7174_v8 }
 0x58b   : > { %v7360_v11 = vmax.f32 %v7300_v9, 0.0  ;;  %v7301_v12 = vadd.f32 %v14341_v60, %v7234_v10  ;;  %v5327_v13 = vpop.f32.mrb[88].mxu0  ;;  %v6992_v14 = vpop.f32.mrb[88].mxu1 }
 0x58c   : > { %v5329_v15 = vpop.f32.mrb[89].mxu0  ;;  %v6994_v16 = vpop.f32.mrb[89].mxu1 }
 0x58d   : > { %7420 = vst [vmem:[#allocation2 + $0x150] sm:$0xff] %v7360_v11  ;;  %v7361_v17 = vmax.f32 %v7301_v12, 0.0  ;;  %v7115_v18 = vmax.f32 %v5327_v13, %v5329_v15  ;;  %v7175_v19 = vmax.f32 %v6992_v14, %v6994_v16  ;;  %v5331_v20 = vpop.f32.mrb[90].mxu0  ;;  %v6996_v21 = vpop.f32.mrb[90].mxu1 }
 0x58e   : > { %v5333_v22 = vpop.f32.mrb[91].mxu0  ;;  %v6998_v5 = vpop.f32.mrb[91].mxu1  ;;  %v7470_v13 = vld [vmem:[#allocation2 + $0x121] ss:$6 sm:$0xff] }
 0x58f   : > { %7421 = vst [vmem:[#allocation2 + $0x158] sm:$0xff] %v7361_v17  ;;  %v7235_v23 = vmax.f32 %v7115_v18, %v7175_v19  ;;  %v7116_v24 = vmax.f32 %v5331_v20, %v5333_v22  ;;  %v7176_v25 = vmax.f32 %v6996_v21, %v6998_v5  ;;  %v7450_v22 = vld [vmem:[#allocation2 + $0x120] ss:$6 sm:$0xff] }
 0x591   : > { %v7302_v26 = vadd.f32 %v14341_v60, %v7235_v23  ;;  %v7236_v27 = vmax.f32 %v7116_v24, %v7176_v25 }
 0x593   : > { %v7362_v28 = vmax.f32 %v7302_v26, 0.0  ;;  %v7303_v29 = vadd.f32 %v14341_v60, %v7236_v27  ;;  %v5337_v30 = vpop.f32.mrb[92].mxu0  ;;  %v7002_v31 = vpop.f32.mrb[92].mxu1 }
 0x594   : > { %v5339_v32 = vpop.f32.mrb[93].mxu0  ;;  %v7004_v33 = vpop.f32.mrb[93].mxu1 }
 0x595   : > { %7422 = vst [vmem:[#allocation2 + $0x160] sm:$0xff] %v7362_v28  ;;  %v7363_v34 = vmax.f32 %v7303_v29, 0.0  ;;  %v7117_v35 = vmax.f32 %v5337_v30, %v5339_v32  ;;  %v7177_v36 = vmax.f32 %v7002_v31, %v7004_v33  ;;  %v5341_v37 = vpop.f32.mrb[94].mxu0  ;;  %v7006_v38 = vpop.f32.mrb[94].mxu1 }
 0x596   : > { %v5343_v39 = vpop.f32.mrb[95].mxu0  ;;  %v7008_v40 = vpop.f32.mrb[95].mxu1 }
 0x597   : > { %7423 = vst [vmem:[#allocation2 + $0x168] sm:$0xff] %v7363_v34  ;;  %v7237_v41 = vmax.f32 %v7117_v35, %v7177_v36  ;;  %v7118_v42 = vmax.f32 %v5341_v37, %v5343_v39  ;;  %v7178_v44 = vmax.f32 %v7006_v38, %v7008_v40 }
 0x599   : > { %v7304_v45 = vadd.f32 %v14341_v60, %v7237_v41  ;;  %v7238_v46 = vmax.f32 %v7118_v42, %v7178_v44 }
 0x59b   : > { %v7364_v47 = vmax.f32 %v7304_v45, 0.0  ;;  %v7305_v48 = vadd.f32 %v14341_v60, %v7238_v46  ;;  %v5347_v49 = vpop.f32.mrb[96].mxu0  ;;  %v7012_v50 = vpop.f32.mrb[96].mxu1 }
 0x59c   : > { %v5349_v51 = vpop.f32.mrb[97].mxu0  ;;  %v7014_v52 = vpop.f32.mrb[97].mxu1 }
 0x59d   : > { %7424 = vst [vmem:[#allocation2 + $0x170] sm:$0xff] %v7364_v47  ;;  %v7365_v53 = vmax.f32 %v7305_v48, 0.0  ;;  %v7119_v54 = vmax.f32 %v5347_v49, %v5349_v51  ;;  %v7179_v55 = vmax.f32 %v7012_v50, %v7014_v52  ;;  %v5351_v56 = vpop.f32.mrb[98].mxu0  ;;  %v7016_v57 = vpop.f32.mrb[98].mxu1 }
 0x59e   : > { %v5353_v58 = vpop.f32.mrb[99].mxu0  ;;  %v7018_v59 = vpop.f32.mrb[99].mxu1 }
 0x59f   : > { %7425 = vst [vmem:[#allocation2 + $0x178] sm:$0xff] %v7365_v53  ;;  %v7239_v61 = vmax.f32 %v7119_v54, %v7179_v55  ;;  %v7120_v62 = vmax.f32 %v5351_v56, %v5353_v58  ;;  %v7180_v63 = vmax.f32 %v7016_v57, %v7018_v59 }
 0x5a1   : > { %v7306_v0 = vadd.f32 %v14341_v60, %v7239_v61  ;;  %v7240_v1 = vmax.f32 %v7120_v62, %v7180_v63 }
 0x5a3   : > { %v7366_v2 = vmax.f32 %v7306_v0, 0.0  ;;  %v7307_v3 = vadd.f32 %v14341_v60, %v7240_v1  ;;  %v5357_v4 = vpop.f32.mrb[100].mxu0  ;;  %v7022_v6 = vpop.f32.mrb[100].mxu1 }
 0x5a4   : > { %v5359_v7 = vpop.f32.mrb[101].mxu0  ;;  %v7024_v43 = vpop.f32.mrb[101].mxu1 }
 0x5a5   : > { %7426 = vst [vmem:[#allocation2 + $0x180] sm:$0xff] %v7366_v2  ;;  %v7367_v8 = vmax.f32 %v7307_v3, 0.0  ;;  %v7121_v9 = vmax.f32 %v5357_v4, %v5359_v7  ;;  %v7181_v10 = vmax.f32 %v7022_v6, %v7024_v43  ;;  %v5361_v11 = vpop.f32.mrb[102].mxu0  ;;  %v7026_v12 = vpop.f32.mrb[102].mxu1 }
 0x5a6   : > { %v5363_v14 = vpop.f32.mrb[103].mxu0  ;;  %v7028_v15 = vpop.f32.mrb[103].mxu1  ;;  %v7472_v16 = vld [vmem:[#allocation2 + $0x151] ss:$6 sm:$0xff]  ;;  %v7452_v17 = vld [vmem:[#allocation2 + $0x150] ss:$6 sm:$0xff] }
 0x5a7   : > { %7427 = vst [vmem:[#allocation2 + $0x188] sm:$0xff] %v7367_v8  ;;  %v7241_v18 = vmax.f32 %v7121_v9, %v7181_v10  ;;  %v7122_v19 = vmax.f32 %v5361_v11, %v5363_v14  ;;  %v7182_v20 = vmax.f32 %v7026_v12, %v7028_v15  ;;  %v7576_v21 = vpack.c.bf16 %v7472_v16, %v7470_v13 }
 0x5a8   : > { %v7575_v5 = vpack.c.bf16 %v7452_v17, %v7450_v22 }
 0x5a9   : > { %v7308_v23 = vadd.f32 %v14341_v60, %v7241_v18  ;;  %v7242_v24 = vmax.f32 %v7122_v19, %v7182_v20  ;;  %8823 = vmatprep.mubr.bf16.mxu0 %v7576_v21  ;;  %9072 = vmatprep.mubr.bf16.mxu1 %v7576_v21 }
 0x5aa   : > { %8824 = vmatmul.mubr.bf16.gmra.mrb[132].mxu0 %v7575_v5  ;;  %9073 = vmatmul.mubr.bf16.gmra.mrb[132].mxu1 %v7575_v5 }
 0x5ab   : > { %v7368_v25 = vmax.f32 %v7308_v23, 0.0  ;;  %v7309_v26 = vadd.f32 %v14341_v60, %v7242_v24  ;;  %v5367_v27 = vpop.f32.mrb[104].mxu0  ;;  %v7032_v28 = vpop.f32.mrb[104].mxu1 }
 0x5ac   : > { %v5369_v29 = vpop.f32.mrb[105].mxu0  ;;  %v7034_v30 = vpop.f32.mrb[105].mxu1 }
 0x5ad   : > { %7428 = vst [vmem:[#allocation2 + $0x190] sm:$0xff] %v7368_v25  ;;  %v7369_v31 = vmax.f32 %v7309_v26, 0.0  ;;  %v7123_v32 = vmax.f32 %v5367_v27, %v5369_v29  ;;  %v7183_v33 = vmax.f32 %v7032_v28, %v7034_v30  ;;  %v5371_v34 = vpop.f32.mrb[106].mxu0  ;;  %v7036_v35 = vpop.f32.mrb[106].mxu1 }
 0x5ae   : > { %v5373_v36 = vpop.f32.mrb[107].mxu0  ;;  %v7038_v37 = vpop.f32.mrb[107].mxu1 }
 0x5af   : > { %7429 = vst [vmem:[#allocation2 + $0x198] sm:$0xff] %v7369_v31  ;;  %v7243_v38 = vmax.f32 %v7123_v32, %v7183_v33  ;;  %v7124_v39 = vmax.f32 %v5371_v34, %v5373_v36  ;;  %v7184_v40 = vmax.f32 %v7036_v35, %v7038_v37 }
 0x5b1   : > { %v7310_v41 = vadd.f32 %v14341_v60, %v7243_v38  ;;  %v7244_v42 = vmax.f32 %v7124_v39, %v7184_v40  ;;  %v7500_v38 = vld [vmem:[#allocation2 + $0x33] ss:$6 sm:$0xff] }
 0x5b3   : > { %v7370_v44 = vmax.f32 %v7310_v41, 0.0  ;;  %v7311_v45 = vadd.f32 %v14341_v60, %v7244_v42  ;;  %v5377_v46 = vpop.f32.mrb[108].mxu0  ;;  %v7042_v47 = vpop.f32.mrb[108].mxu1 }
 0x5b4   : > { %v5379_v48 = vpop.f32.mrb[109].mxu0  ;;  %v7044_v49 = vpop.f32.mrb[109].mxu1 }
 0x5b5   : > { %7430 = vst [vmem:[#allocation2 + $0x1a0] sm:$0xff] %v7370_v44  ;;  %v7371_v50 = vmax.f32 %v7311_v45, 0.0  ;;  %v7125_v51 = vmax.f32 %v5377_v46, %v5379_v48  ;;  %v7185_v52 = vmax.f32 %v7042_v47, %v7044_v49  ;;  %v5381_v53 = vpop.f32.mrb[110].mxu0  ;;  %v7046_v54 = vpop.f32.mrb[110].mxu1  ;;  %v7498_v45 = vld [vmem:[#allocation2 + $0x3] ss:$6 sm:$0xff] }
 0x5b6   : > { %v5383_v55 = vpop.f32.mrb[111].mxu0  ;;  %v7048_v56 = vpop.f32.mrb[111].mxu1  ;;  %v7560_v46 = vpack.c.bf16 %v7500_v38, %v7498_v45  ;;  %v7480_v47 = vld [vmem:[#allocation2 + $0x32] ss:$6 sm:$0xff]  ;;  %v7538_v45 = vld [vmem:[#allocation2 + $0x5] ss:$6 sm:$0xff] }
 0x5b7   : > { %7431 = vst [vmem:[#allocation2 + $0x1a8] sm:$0xff] %v7371_v50  ;;  %v7245_v57 = vmax.f32 %v7125_v51, %v7185_v52  ;;  %v7126_v58 = vmax.f32 %v5381_v53, %v5383_v55  ;;  %v7186_v59 = vmax.f32 %v7046_v54, %v7048_v56  ;;  %v12525_v48 = vld [vmem:[%s14700_s4 + $0x400] ss:$16 sps:$4 sm:$0xff]   ;;  %v12528_v49 = vld [vmem:[%s14700_s4 + $0x408] ss:$16 sps:$4 sm:$0xff]  }
 0x5b8   : > { %v7504_v50 = vld [vmem:[#allocation2 + $0x93] ss:$6 sm:$0xff]  ;;  %v7502_v52 = vld [vmem:[#allocation2 + $0x63] ss:$6 sm:$0xff] }
 0x5b9   : > { %v7312_v61 = vadd.f32 %v14341_v60, %v7245_v57  ;;  %v7246_v62 = vmax.f32 %v7126_v58, %v7186_v59  ;;  %v12533_v53 = vld [vmem:[%s14700_s4 + $0x424] ss:$16 sps:$4 sm:$0xff]   ;;  %v12536_v54 = vld [vmem:[%s14700_s4 + $0x42c] ss:$16 sps:$4 sm:$0xff]   ;;  %v7566_v55 = vpack.c.bf16 %v7504_v50, %v7502_v52  ;;  %v12531_v56 = vld [vmem:[%s14700_s4 + $0x420] ss:$16 sps:$4 sm:$0xff]  }
 0x5ba   : > { %v12534_v57 = vld [vmem:[%s14700_s4 + $0x428] ss:$16 sps:$4 sm:$0xff]   ;;  %v12539_v58 = vld [vmem:[%s14700_s4 + $0x444] ss:$16 sps:$4 sm:$0xff]   ;;  %v12542_v59 = vld [vmem:[%s14700_s4 + $0x44c] ss:$16 sps:$4 sm:$0xff]  }
 0x5bb   : > { %v7372_v63 = vmax.f32 %v7312_v61, 0.0  ;;  %v7313_v0 = vadd.f32 %v14341_v60, %v7246_v62  ;;  %v5387_v1 = vpop.f32.mrb[112].mxu0  ;;  %v7052_v2 = vpop.f32.mrb[112].mxu1  ;;  %v7484_v61 = vld [vmem:[#allocation2 + $0x92] ss:$6 sm:$0xff] }
 0x5bc   : > { %v5389_v3 = vpop.f32.mrb[113].mxu0  ;;  %v7054_v4 = vpop.f32.mrb[113].mxu1  ;;  %v7482_v62 = vld [vmem:[#allocation2 + $0x62] ss:$6 sm:$0xff] }
 0x5bd   : > { %7432 = vst [vmem:[#allocation2 + $0x1b0] sm:$0xff] %v7372_v63  ;;  %v7373_v6 = vmax.f32 %v7313_v0, 0.0  ;;  %v7127_v7 = vmax.f32 %v5387_v1, %v5389_v3  ;;  %v7187_v43 = vmax.f32 %v7052_v2, %v7054_v4  ;;  %v5391_v8 = vpop.f32.mrb[114].mxu0  ;;  %v7056_v9 = vpop.f32.mrb[114].mxu1  ;;  %v12537_v63 = vld [vmem:[%s14700_s4 + $0x440] ss:$16 sps:$4 sm:$0xff]   ;;  %v7565_v2 = vpack.c.bf16 %v7484_v61, %v7482_v62 }
 0x5be   : > { %v5393_v10 = vpop.f32.mrb[115].mxu0  ;;  %v7058_v11 = vpop.f32.mrb[115].mxu1  ;;  %v7474_v37 = vld [vmem:[#allocation2 + $0x181] ss:$6 sm:$0xff]  ;;  %v7454_v40 = vld [vmem:[#allocation2 + $0x180] ss:$6 sm:$0xff] }
 0x5bf   : > { %7433 = vst [vmem:[#allocation2 + $0x1b8] sm:$0xff] %v7373_v6  ;;  %v7247_v12 = vmax.f32 %v7127_v7, %v7187_v43  ;;  %v7128_v13 = vmax.f32 %v5391_v8, %v5393_v10  ;;  %v7188_v14 = vmax.f32 %v7056_v9, %v7058_v11  ;;  %v12540_v0 = vld [vmem:[%s14700_s4 + $0x448] ss:$16 sps:$4 sm:$0xff]   ;;  %v12545_v4 = vld [vmem:[%s14700_s4 + $0x464] ss:$16 sps:$4 sm:$0xff]  }
 0x5c0   : > { %v7508_v1 = vld [vmem:[#allocation2 + $0xf3] ss:$6 sm:$0xff]  ;;  %v7506_v3 = vld [vmem:[#allocation2 + $0xc3] ss:$6 sm:$0xff]  ;;  %v7488_v11 = vld [vmem:[#allocation2 + $0xf2] ss:$6 sm:$0xff] }
 0x5c1   : > { %v7314_v15 = vadd.f32 %v14341_v60, %v7247_v12  ;;  %v7248_v16 = vmax.f32 %v7128_v13, %v7188_v14  ;;  %v12548_v6 = vld [vmem:[%s14700_s4 + $0x46c] ss:$16 sps:$4 sm:$0xff]   ;;  %v7572_v7 = vpack.c.bf16 %v7508_v1, %v7506_v3  ;;  %v12543_v43 = vld [vmem:[%s14700_s4 + $0x460] ss:$16 sps:$4 sm:$0xff]   ;;  %v12546_v8 = vld [vmem:[%s14700_s4 + $0x468] ss:$16 sps:$4 sm:$0xff]  }
 0x5c2   : > { %v12551_v9 = vld [vmem:[%s14700_s4 + $0x484] ss:$16 sps:$4 sm:$0xff]   ;;  %v12554_v10 = vld [vmem:[%s14700_s4 + $0x48c] ss:$16 sps:$4 sm:$0xff]   ;;  %v12549_v13 = vld [vmem:[%s14700_s4 + $0x480] ss:$16 sps:$4 sm:$0xff]  }
 0x5c3   : > { %v7374_v17 = vmax.f32 %v7314_v15, 0.0  ;;  %v7315_v18 = vadd.f32 %v14341_v60, %v7248_v16  ;;  %v5397_v19 = vpop.f32.mrb[116].mxu0  ;;  %v7062_v20 = vpop.f32.mrb[116].mxu1  ;;  %v7486_v12 = vld [vmem:[#allocation2 + $0xc2] ss:$6 sm:$0xff] }
 0x5c4   : > { %v5399_v21 = vpop.f32.mrb[117].mxu0  ;;  %v7064_v22 = vpop.f32.mrb[117].mxu1  ;;  %v12552_v14 = vld [vmem:[%s14700_s4 + $0x488] ss:$16 sps:$4 sm:$0xff]   ;;  %v7571_v16 = vpack.c.bf16 %v7488_v11, %v7486_v12  ;;  %v12587_v50 = vld [vmem:[%s14700_s4 + $0x544] ss:$16 sps:$4 sm:$0xff]  }
 0x5c5   : > { %7434 = vst [vmem:[#allocation2 + $0x1c0] sm:$0xff] %v7374_v17  ;;  %v7375_v5 = vmax.f32 %v7315_v18, 0.0  ;;  %v7129_v23 = vmax.f32 %v5397_v19, %v5399_v21  ;;  %v7189_v24 = vmax.f32 %v7062_v20, %v7064_v22  ;;  %v5401_v25 = vpop.f32.mrb[118].mxu0  ;;  %v7066_v26 = vpop.f32.mrb[118].mxu1  ;;  %v7512_v15 = vld [vmem:[#allocation2 + $0x153] ss:$6 sm:$0xff] }
 0x5c6   : > { %v5403_v27 = vpop.f32.mrb[119].mxu0  ;;  %v7068_v28 = vpop.f32.mrb[119].mxu1  ;;  %v7510_v17 = vld [vmem:[#allocation2 + $0x123] ss:$6 sm:$0xff]  ;;  %v7520_v11 = vld [vmem:[#allocation2 + $0x34] ss:$6 sm:$0xff] }
 0x5c7   : > { %7435 = vst [vmem:[#allocation2 + $0x1c8] sm:$0xff] %v7375_v5  ;;  %v7249_v29 = vmax.f32 %v7129_v23, %v7189_v24  ;;  %v7130_v30 = vmax.f32 %v5401_v25, %v5403_v27  ;;  %v7190_v31 = vmax.f32 %v7066_v26, %v7068_v28  ;;  %v12557_v18 = vld [vmem:[%s14700_s4 + $0x4a4] ss:$16 sps:$4 sm:$0xff]   ;;  %v12560_v19 = vld [vmem:[%s14700_s4 + $0x4ac] ss:$16 sps:$4 sm:$0xff]   ;;  %v7578_v20 = vpack.c.bf16 %v7512_v15, %v7510_v17 }
 0x5c8   : > { %v12555_v21 = vld [vmem:[%s14700_s4 + $0x4a0] ss:$16 sps:$4 sm:$0xff]   ;;  %v12558_v22 = vld [vmem:[%s14700_s4 + $0x4a8] ss:$16 sps:$4 sm:$0xff]   ;;  %v12563_v5 = vld [vmem:[%s14700_s4 + $0x4c4] ss:$16 sps:$4 sm:$0xff]  }
 0x5c9   : > { %v7316_v32 = vadd.f32 %v14341_v60, %v7249_v29  ;;  %v7250_v33 = vmax.f32 %v7130_v30, %v7190_v31  ;;  %v12566_v23 = vld [vmem:[%s14700_s4 + $0x4cc] ss:$16 sps:$4 sm:$0xff]   ;;  %v12561_v25 = vld [vmem:[%s14700_s4 + $0x4c0] ss:$16 sps:$4 sm:$0xff]   ;;  %v12564_v26 = vld [vmem:[%s14700_s4 + $0x4c8] ss:$16 sps:$4 sm:$0xff]  }
 0x5ca   : > { %v7492_v24 = vld [vmem:[#allocation2 + $0x152] ss:$6 sm:$0xff]  ;;  %v7490_v27 = vld [vmem:[#allocation2 + $0x122] ss:$6 sm:$0xff]  ;;  %v7514_v30 = vld [vmem:[#allocation2 + $0x183] ss:$6 sm:$0xff] }
 0x5cb   : > { %v7376_v34 = vmax.f32 %v7316_v32, 0.0  ;;  %v7317_v35 = vadd.f32 %v14341_v60, %v7250_v33  ;;  %v7478_v60 = vld [vmem:[#allocation2 + $0x2] ss:$6 sm:$0xff]  ;;  %v7577_v29 = vpack.c.bf16 %v7492_v24, %v7490_v27  ;;  %v7544_v12 = vld [vmem:[#allocation2 + $0x95] ss:$6 sm:$0xff] }
 0x5cc   : > { %v7559_v51 = vpack.c.bf16 %v7480_v47, %v7478_v60  ;;  %v12569_v31 = vld [vmem:[%s14700_s4 + $0x4e4] ss:$16 sps:$4 sm:$0xff]   ;;  %v12572_v32 = vld [vmem:[%s14700_s4 + $0x4ec] ss:$16 sps:$4 sm:$0xff]   ;;  %v12585_v52 = vld [vmem:[%s14700_s4 + $0x540] ss:$16 sps:$4 sm:$0xff]  }
 0x5cd   : > { %7436 = vst [vmem:[#allocation2 + $0x1d0] sm:$0xff] %v7376_v34  ;;  %v7377_v36 = vmax.f32 %v7317_v35, 0.0  ;;  %v12567_v34 = vld [vmem:[%s14700_s4 + $0x4e0] ss:$16 sps:$4 sm:$0xff]   ;;  %v12570_v35 = vld [vmem:[%s14700_s4 + $0x4e8] ss:$16 sps:$4 sm:$0xff]  }
 0x5ce   : > { %v12584_v47 = vld [vmem:[%s14700_s4 + $0x52c] ss:$16 sps:$4 sm:$0xff]   ;;  %v12597_v61 = vld [vmem:[%s14700_s4 + $0x580] ss:$16 sps:$4 sm:$0xff]   ;;  %v12600_v62 = vld [vmem:[%s14700_s4 + $0x588] ss:$16 sps:$4 sm:$0xff]  }
 0x5cf   : > { %7437 = vst [vmem:[#allocation2 + $0x1d8] sm:$0xff] %v7377_v36  ;;  %v12575_v36 = vld [vmem:[%s14700_s4 + $0x504] ss:$16 sps:$4 sm:$0xff]   ;;  %v12603_v1 = vld [vmem:[%s14700_s4 + $0x5a0] ss:$16 sps:$4 sm:$0xff]  }
 0x5d0   : > { %v12611_v3 = vld [vmem:[%s14700_s4 + $0x5c4] ss:$16 sps:$4 sm:$0xff]  }
 0x5d1   : > { %v7542_v15 = vld [vmem:[#allocation2 + $0x65] ss:$6 sm:$0xff]  ;;  %v7524_v17 = vld [vmem:[#allocation2 + $0x94] ss:$6 sm:$0xff]  ;;  %v7526_v24 = vld [vmem:[#allocation2 + $0xc4] ss:$6 sm:$0xff] }
 0x5d6   : > { %v7476_v39 = vld [vmem:[#allocation2 + $0x1b1] ss:$6 sm:$0xff]  ;;  %v7456_v41 = vld [vmem:[#allocation2 + $0x1b0] ss:$6 sm:$0xff] }
 0x5d7   : > { %v7582_v42 = vpack.c.bf16 %v7476_v39, %v7474_v37  ;;  %v7581_v44 = vpack.c.bf16 %v7456_v41, %v7454_v40  ;;  %v7516_v28 = vld [vmem:[#allocation2 + $0x1b3] ss:$6 sm:$0xff]  ;;  %v7496_v38 = vld [vmem:[#allocation2 + $0x1b2] ss:$6 sm:$0xff] }
 0x5d8   : > { %v7584_v33 = vpack.c.bf16 %v7516_v28, %v7514_v30  ;;  %v12578_v37 = vld [vmem:[%s14700_s4 + $0x50c] ss:$16 sps:$4 sm:$0xff]   ;;  %v12573_v40 = vld [vmem:[%s14700_s4 + $0x500] ss:$16 sps:$4 sm:$0xff]   ;;  %v12576_v41 = vld [vmem:[%s14700_s4 + $0x508] ss:$16 sps:$4 sm:$0xff]  }
 0x5d9   : > { %8833 = vmatprep.mubr.bf16.mxu0 %v7582_v42  ;;  %9082 = vmatprep.mubr.bf16.mxu1 %v7582_v42  ;;  %v7540_v39 = vld [vmem:[#allocation2 + $0x35] ss:$6 sm:$0xff]  ;;  %v7494_v42 = vld [vmem:[#allocation2 + $0x182] ss:$6 sm:$0xff] }
 0x5da   : > { %8834 = vmatmul.mubr.bf16.gmra.mrb[136].mxu0 %v7581_v44  ;;  %9083 = vmatmul.mubr.bf16.gmra.mrb[136].mxu1 %v7581_v44  ;;  %v7583_v44 = vpack.c.bf16 %v7496_v38, %v7494_v42  ;;  %v7562_v60 = vpack.c.bf16 %v7540_v39, %v7538_v45  ;;  %v7532_v28 = vld [vmem:[#allocation2 + $0x154] ss:$6 sm:$0xff]  ;;  %v7530_v30 = vld [vmem:[#allocation2 + $0x124] ss:$6 sm:$0xff]  ;;  %v7781_v38 = vlaneseq }
 0x5db   : > { %8876 = vmatprep.mubr.bf16.mxu0 %v7560_v46  ;;  %9125 = vmatprep.mubr.bf16.mxu1 %v7560_v46  ;;  %v12581_v46 = vld [vmem:[%s14700_s4 + $0x524] ss:$16 sps:$4 sm:$0xff]   ;;  %v7779_v42 = vld [vmem:[%s14701_s5] sm:$0xf] }
 0x5dc   : > { %v7782_v39 = vshrl.u32 %v7781_v38, 7 }
 0x5de   : > { %v7795_v45 = vsub.s32 3, %v7782_v39 }
 0x5e2   : > { %8877 = vmatmul.mubr.bf16.vlgmr.msra.gmra.mrb[120].mxu0 %v7559_v51  ;;  %9126 = vmatmul.mubr.bf16.vlgmr.msra.gmra.mrb[120].mxu1 %v7559_v51  ;;  %v12590_v51 = vld [vmem:[%s14700_s4 + $0x54c] ss:$16 sps:$4 sm:$0xff]  }
 0x5e3   : > { %8928 = vmatpush1.bf16.msra.mxu0 %v12525_v48  ;;  %9177 = vmatpush1.bf16.msra.mxu1 %v12528_v49  ;;  %v12579_v48 = vld [vmem:[%s14700_s4 + $0x520] ss:$16 sps:$4 sm:$0xff]   ;;  %v12582_v49 = vld [vmem:[%s14700_s4 + $0x528] ss:$16 sps:$4 sm:$0xff]  }
 0x5e4   : > { %8886 = vmatprep.mubr.bf16.mxu0 %v7566_v55  ;;  %9135 = vmatprep.mubr.bf16.mxu1 %v7566_v55  ;;  %v12596_v55 = vld [vmem:[%s14700_s4 + $0x56c] ss:$16 sps:$4 sm:$0xff]  }
 0x5e5   : > { %8929 = vmatprep.subr.bf16.mxu0 %v12533_v53  ;;  %9178 = vmatprep.subr.bf16.mxu1 %v12536_v54  ;;  %v12588_v53 = vld [vmem:[%s14700_s4 + $0x548] ss:$16 sps:$4 sm:$0xff]   ;;  %v12593_v54 = vld [vmem:[%s14700_s4 + $0x564] ss:$16 sps:$4 sm:$0xff]  }
 0x5e7   : > { %8930 = vmatpush1.bf16.msra.mxu0 %v12531_v56  ;;  %9179 = vmatpush1.bf16.msra.mxu1 %v12534_v57  ;;  %v12591_v56 = vld [vmem:[%s14700_s4 + $0x560] ss:$16 sps:$4 sm:$0xff]   ;;  %v12594_v57 = vld [vmem:[%s14700_s4 + $0x568] ss:$16 sps:$4 sm:$0xff]  }
 0x5e8   : > { %8931 = vmatprep.subr.bf16.mxu0 %v12539_v58  ;;  %9180 = vmatprep.subr.bf16.mxu1 %v12542_v59  ;;  %v12599_v58 = vld [vmem:[%s14700_s4 + $0x584] ss:$16 sps:$4 sm:$0xff]   ;;  %v12602_v59 = vld [vmem:[%s14700_s4 + $0x58c] ss:$16 sps:$4 sm:$0xff]  }
 0x5ea   : > { %8887 = vmatmul.mubr.bf16.gmra.mrb[124].mxu0 %v7565_v2  ;;  %9136 = vmatmul.mubr.bf16.gmra.mrb[124].mxu1 %v7565_v2  ;;  %v12606_v2 = vld [vmem:[%s14700_s4 + $0x5a8] ss:$16 sps:$4 sm:$0xff]  }
 0x5eb   : > { %8932 = vmatpush1.bf16.msra.mxu0 %v12537_v63  ;;  %9181 = vmatpush1.bf16.msra.mxu1 %v12540_v0  ;;  %v12605_v63 = vld [vmem:[%s14700_s4 + $0x5a4] ss:$16 sps:$4 sm:$0xff]   ;;  %v12608_v0 = vld [vmem:[%s14700_s4 + $0x5ac] ss:$16 sps:$4 sm:$0xff]  }
 0x5ec   : > { %8896 = vmatprep.mubr.bf16.mxu0 %v7572_v7  ;;  %9145 = vmatprep.mubr.bf16.mxu1 %v7572_v7  ;;  %v12612_v7 = vld [vmem:[%s14700_s4 + $0x5c8] ss:$16 sps:$4 sm:$0xff]  }
 0x5ed   : > { %8933 = vmatprep.subr.bf16.mxu0 %v12545_v4  ;;  %9182 = vmatprep.subr.bf16.mxu1 %v12548_v6  ;;  %v12614_v4 = vld [vmem:[%s14700_s4 + $0x5cc] ss:$16 sps:$4 sm:$0xff]   ;;  %v12609_v6 = vld [vmem:[%s14700_s4 + $0x5c0] ss:$16 sps:$4 sm:$0xff]  }
 0x5ef   : > { %8934 = vmatpush1.bf16.msra.mxu0 %v12543_v43  ;;  %9183 = vmatpush1.bf16.msra.mxu1 %v12546_v8  ;;  %v12617_v43 = vld [vmem:[%s14700_s4 + $0x5e4] ss:$16 sps:$4 sm:$0xff]   ;;  %v12620_v8 = vld [vmem:[%s14700_s4 + $0x5ec] ss:$16 sps:$4 sm:$0xff]  }
 0x5f0   : > { %8935 = vmatprep.subr.bf16.mxu0 %v12551_v9  ;;  %9184 = vmatprep.subr.bf16.mxu1 %v12554_v10  ;;  %v12615_v9 = vld [vmem:[%s14700_s4 + $0x5e0] ss:$16 sps:$4 sm:$0xff]   ;;  %v12618_v10 = vld [vmem:[%s14700_s4 + $0x5e8] ss:$16 sps:$4 sm:$0xff]  }
 0x5f2   : > { %8897 = vmatmul.mubr.bf16.gmra.mrb[128].mxu0 %v7571_v16  ;;  %9146 = vmatmul.mubr.bf16.gmra.mrb[128].mxu1 %v7571_v16  ;;  %v7568_v16 = vpack.c.bf16 %v7544_v12, %v7542_v15 }
 0x5f3   : > { %8936 = vmatpush1.bf16.msra.mxu0 %v12549_v13  ;;  %9185 = vmatpush1.bf16.msra.mxu1 %v12552_v14  ;;  %v7518_v13 = vld [vmem:[#allocation2 + $0x4] ss:$6 sm:$0xff] }
 0x5f4   : > { %8906 = vmatprep.mubr.bf16.mxu0 %v7578_v20  ;;  %9155 = vmatprep.mubr.bf16.mxu1 %v7578_v20  ;;  %v7561_v14 = vpack.c.bf16 %v7520_v11, %v7518_v13 }
 0x5f5   : > { %8937 = vmatprep.subr.bf16.mxu0 %v12557_v18  ;;  %9186 = vmatprep.subr.bf16.mxu1 %v12560_v19  ;;  %v7548_v18 = vld [vmem:[#allocation2 + $0xf5] ss:$6 sm:$0xff]  ;;  %v7522_v19 = vld [vmem:[#allocation2 + $0x64] ss:$6 sm:$0xff] }
 0x5f6   : > { %v7567_v20 = vpack.c.bf16 %v7524_v17, %v7522_v19 }
 0x5f7   : > { %8938 = vmatpush1.bf16.msra.mxu0 %v12555_v21  ;;  %9187 = vmatpush1.bf16.msra.mxu1 %v12558_v22  ;;  %v7546_v21 = vld [vmem:[#allocation2 + $0xc5] ss:$6 sm:$0xff] }
 0x5f8   : > { %8939 = vmatprep.subr.bf16.mxu0 %v12563_v5  ;;  %9188 = vmatprep.subr.bf16.mxu1 %v12566_v23  ;;  %v7574_v22 = vpack.c.bf16 %v7548_v18, %v7546_v21  ;;  %v7528_v5 = vld [vmem:[#allocation2 + $0xf4] ss:$6 sm:$0xff]  ;;  %v7552_v23 = vld [vmem:[#allocation2 + $0x155] ss:$6 sm:$0xff] }
 0x5fa   : > { %8907 = vmatmul.mubr.bf16.gmra.mrb[132].mxu0 %v7577_v29  ;;  %9156 = vmatmul.mubr.bf16.gmra.mrb[132].mxu1 %v7577_v29  ;;  %v7556_v29 = vld [vmem:[#allocation2 + $0x1b5] ss:$6 sm:$0xff] }
 0x5fb   : > { %8940 = vmatpush1.bf16.msra.mxu0 %v12561_v25  ;;  %9189 = vmatpush1.bf16.msra.mxu1 %v12564_v26  ;;  %v7573_v25 = vpack.c.bf16 %v7528_v5, %v7526_v24  ;;  %v7550_v26 = vld [vmem:[#allocation2 + $0x125] ss:$6 sm:$0xff] }
 0x5fc   : > { %8916 = vmatprep.mubr.bf16.mxu0 %v7584_v33  ;;  %9165 = vmatprep.mubr.bf16.mxu1 %v7584_v33  ;;  %v7580_v27 = vpack.c.bf16 %v7552_v23, %v7550_v26  ;;  %v9267_v23 = vld [vmem:[%s14565_s23 + $0x40] sm:$0xff] }
 0x5fd   : > { %8941 = vmatprep.subr.bf16.mxu0 %v12569_v31  ;;  %9190 = vmatprep.subr.bf16.mxu1 %v12572_v32  ;;  %v7579_v31 = vpack.c.bf16 %v7532_v28, %v7530_v30  ;;  %v7554_v32 = vld [vmem:[#allocation2 + $0x185] ss:$6 sm:$0xff] }
 0x5fe   : > { %v7586_v33 = vpack.c.bf16 %v7556_v29, %v7554_v32  ;;  %v9268_v29 = vld [vmem:[%s14565_s23 + $0x48] sm:$0xff] }
 0x5ff   : > { %8942 = vmatpush1.bf16.msra.mxu0 %v12567_v34  ;;  %9191 = vmatpush1.bf16.msra.mxu1 %v12570_v35  ;;  %v7536_v34 = vld [vmem:[#allocation2 + $0x1b4] ss:$6 sm:$0xff]  ;;  %v7534_v35 = vld [vmem:[#allocation2 + $0x184] ss:$6 sm:$0xff] }
 0x600   : > { %8943 = vmatprep.subr.bf16.mxu0 %v12575_v36  ;;  %9192 = vmatprep.subr.bf16.mxu1 %v12578_v37  ;;  %v7585_v36 = vpack.c.bf16 %v7536_v34, %v7534_v35  ;;  %v9399_v37 = vld [vmem:[%s14703_s7] sm:$0xff] }
 0x602   : > { %8917 = vmatmul.mubr.bf16.gmra.mrb[136].mxu0 %v7583_v44  ;;  %9166 = vmatmul.mubr.bf16.gmra.mrb[136].mxu1 %v7583_v44  ;;  %v7787_v44 = vsub.s32 1, %v7782_v39 }
 0x603   : > { %8944 = vmatpush1.bf16.msra.mxu0 %v12573_v40  ;;  %9193 = vmatpush1.bf16.msra.mxu1 %v12576_v41  ;;  %v7783_v40 = vsub.s32 0, %v7782_v39  ;;  %v7791_v41 = vsub.s32 2, %v7782_v39  ;;  %v9273_v39 = vld [vmem:[%s14565_s23 + $0x70] sm:$0xff] }
 0x604   : > { %8959 = vmatprep.mubr.bf16.mxu0 %v7562_v60  ;;  %9208 = vmatprep.mubr.bf16.mxu1 %v7562_v60  ;;  %v14571_v60 = vrot.slane %v7779_v42, %v7787_v44 }
 0x605   : > { %8945 = vmatprep.subr.bf16.mxu0 %v12581_v46  ;;  %9194 = vmatprep.subr.bf16.mxu1 %v12584_v47  ;;  %v14567_v46 = vrot.slane %v7779_v42, %v7783_v40  ;;  %v14569_v47 = vrot.slane %v7779_v42, %v7791_v41  ;;  %v9379_v40 = vld [vmem:[%s14702_s6] sm:$0xff] }
 0x607   : > { %8946 = vmatpush1.bf16.msra.mxu0 %v12579_v48  ;;  %9195 = vmatpush1.bf16.msra.mxu1 %v12582_v49  ;;  %v14573_v48 = vrot.slane %v7779_v42, %v7795_v45 }
 0x608   : > { %8947 = vmatprep.subr.bf16.mxu0 %v12587_v50  ;;  %9196 = vmatprep.subr.bf16.mxu1 %v12590_v51  ;;  %v9259_v50 = vld [vmem:[%s14565_s23] sm:$0xff] }
 0x60b   : > { %8948 = vmatpush1.bf16.msra.mxu0 %v12585_v52  ;;  %9197 = vmatpush1.bf16.msra.mxu1 %v12588_v53  ;;  %v9261_v52 = vld [vmem:[%s14565_s23 + $0x10] sm:$0xff] }
 0x60c   : > { %8949 = vmatprep.subr.bf16.mxu0 %v12593_v54  ;;  %9198 = vmatprep.subr.bf16.mxu1 %v12596_v55 }
 0x60f   : > { %8950 = vmatpush1.bf16.msra.mxu0 %v12591_v56  ;;  %9199 = vmatpush1.bf16.msra.mxu1 %v12594_v57  ;;  %v9260_v56 = vld [vmem:[%s14565_s23 + $0x8] sm:$0xff] }
 0x610   : > { %8951 = vmatprep.subr.bf16.mxu0 %v12599_v58  ;;  %9200 = vmatprep.subr.bf16.mxu1 %v12602_v59  ;;  %v9262_v58 = vld [vmem:[%s14565_s23 + $0x18] sm:$0xff] }
 0x613   : > { %8952 = vmatpush1.bf16.msra.mxu0 %v12597_v61  ;;  %9201 = vmatpush1.bf16.msra.mxu1 %v12600_v62 }
 0x614   : > { %8953 = vmatprep.subr.bf16.mxu0 %v12605_v63  ;;  %9202 = vmatprep.subr.bf16.mxu1 %v12608_v0  ;;  %v9263_v63 = vld [vmem:[%s14565_s23 + $0x20] sm:$0xff] }
 0x617   : > { %8954 = vmatpush1.bf16.msra.mxu0 %v12603_v1  ;;  %9203 = vmatpush1.bf16.msra.mxu1 %v12606_v2  ;;  %v9265_v1 = vld [vmem:[%s14565_s23 + $0x30] sm:$0xff] }
 0x618   : > { %8955 = vmatprep.subr.bf16.mxu0 %v12611_v3  ;;  %9204 = vmatprep.subr.bf16.mxu1 %v12614_v4 }
 0x61b   : > { %8956 = vmatpush1.bf16.msra.mxu0 %v12609_v6  ;;  %9205 = vmatpush1.bf16.msra.mxu1 %v12612_v7 }
 0x61c   : > { %8957 = vmatprep.subr.bf16.mxu0 %v12617_v43  ;;  %9206 = vmatprep.subr.bf16.mxu1 %v12620_v8  ;;  %v9264_v43 = vld [vmem:[%s14565_s23 + $0x28] sm:$0xff] }
 0x61f   : > { %8958 = vmatpush1.bf16.msra.mxu0 %v12615_v9  ;;  %9207 = vmatpush1.bf16.msra.mxu1 %v12618_v10  ;;  %v9266_v9 = vld [vmem:[%s14565_s23 + $0x38] sm:$0xff] }
 0x622   : > { %8960 = vmatmul.mubr.bf16.vlgmr.msra.gmra.mrb[120].mxu0 %v7561_v14  ;;  %9209 = vmatmul.mubr.bf16.vlgmr.msra.gmra.mrb[120].mxu1 %v7561_v14 }
 0x623   : > { %8969 = vmatprep.mubr.bf16.mxu0 %v7568_v16  ;;  %9218 = vmatprep.mubr.bf16.mxu1 %v7568_v16 }
 0x62a   : > { %8970 = vmatmul.mubr.bf16.gmra.mrb[124].mxu0 %v7567_v20  ;;  %9219 = vmatmul.mubr.bf16.gmra.mrb[124].mxu1 %v7567_v20 }
 0x62b   : > { %8979 = vmatprep.mubr.bf16.mxu0 %v7574_v22  ;;  %9228 = vmatprep.mubr.bf16.mxu1 %v7574_v22 }
 0x632   : > { %8980 = vmatmul.mubr.bf16.gmra.mrb[128].mxu0 %v7573_v25  ;;  %9229 = vmatmul.mubr.bf16.gmra.mrb[128].mxu1 %v7573_v25  ;;  %v9269_v25 = vld [vmem:[%s14565_s23 + $0x50] sm:$0xff] }
 0x633   : > { %8989 = vmatprep.mubr.bf16.mxu0 %v7580_v27  ;;  %9238 = vmatprep.mubr.bf16.mxu1 %v7580_v27 }
 0x63a   : > { %8990 = vmatmul.mubr.bf16.gmra.mrb[132].mxu0 %v7579_v31  ;;  %9239 = vmatmul.mubr.bf16.gmra.mrb[132].mxu1 %v7579_v31  ;;  %v9270_v31 = vld [vmem:[%s14565_s23 + $0x58] sm:$0xff] }
 0x63b   : > { %8999 = vmatprep.mubr.bf16.mxu0 %v7586_v33  ;;  %9248 = vmatprep.mubr.bf16.mxu1 %v7586_v33 }
 0x642   : > { %9000 = vmatmul.mubr.bf16.gmra.mrb[136].mxu0 %v7585_v36  ;;  %9249 = vmatmul.mubr.bf16.gmra.mrb[136].mxu1 %v7585_v36 }
 0x643   : > { %10424 = vmatprep.mubr.msk.f32.mxu0 %vm9401_vm2, %v9399_v37  ;;  %v9271_v37 = vld [vmem:[%s14565_s23 + $0x60] sm:$0xff] }
 0x6f5   : > { %v8961_v49 = vpop.f32.mrb[120].mxu0  ;;  %v9210_v51 = vpop.f32.mrb[120].mxu1 }
 0x6f6   : > { %v10447_v53 = vadd.f32 %v8961_v49, %v14567_v46  ;;  %v10467_v54 = vadd.f32 %v9210_v51, %v14569_v47  ;;  %v8963_v55 = vpop.f32.mrb[121].mxu0  ;;  %v9212_v57 = vpop.f32.mrb[121].mxu1 }
 0x6f7   : > { %v10448_v59 = vadd.f32 %v8963_v55, %v14571_v60  ;;  %v10468_v61 = vadd.f32 %v9212_v57, %v14573_v48  ;;  %v8965_v62 = vpop.f32.mrb[122].mxu0  ;;  %v9214_v0 = vpop.f32.mrb[122].mxu1  ;;  %v9274_v57 = vld [vmem:[%s14565_s23 + $0x78] sm:$0xff] }
 0x6f8   : > { %v9299_v2 = vmul.f32 %v10447_v53, %v9259_v50  ;;  %v9301_v3 = vmul.f32 %v10467_v54, %v9261_v52  ;;  %v10449_v4 = vadd.f32 %v8965_v62, %v14567_v46  ;;  %v10469_v6 = vadd.f32 %v9214_v0, %v14569_v47  ;;  %v8967_v7 = vpop.f32.mrb[123].mxu0  ;;  %v9216_v8 = vpop.f32.mrb[123].mxu1  ;;  %v9272_v50 = vld [vmem:[%s14565_s23 + $0x68] sm:$0xff] }
 0x6f9   : > { %v9300_v10 = vmul.f32 %v10448_v59, %v9260_v56  ;;  %v9302_v11 = vmul.f32 %v10468_v61, %v9262_v58  ;;  %v10450_v12 = vadd.f32 %v8967_v7, %v14571_v60  ;;  %v10470_v13 = vadd.f32 %v9216_v8, %v14573_v48  ;;  %v9380_v52 = vld [vmem:[%s14702_s6 + $0x8] sm:$0xff] }
 0x6fa   : > { %v9303_v14 = vmul.f32 %v10449_v4, %v9263_v63  ;;  %v9305_v15 = vmul.f32 %v10469_v6, %v9265_v1 }
 0x6fb   : > { %v9339_v16 = vmax.f32 %v9299_v2, %v9300_v10  ;;  %v9349_v17 = vmax.f32 %v9301_v3, %v9302_v11  ;;  %v9304_v18 = vmul.f32 %v10450_v12, %v9264_v43  ;;  %v9306_v19 = vmul.f32 %v10470_v13, %v9266_v9  ;;  %v9275_v43 = vld [vmem:[%s14565_s23 + $0x80] sm:$0xff]  ;;  %v9277_v9 = vld [vmem:[%s14565_s23 + $0x90] sm:$0xff] }
 0x6fd   : > { %v9359_v20 = vmax.f32 %v9339_v16, %v9349_v17  ;;  %v9340_v21 = vmax.f32 %v9303_v14, %v9304_v18  ;;  %v9350_v22 = vmax.f32 %v9305_v15, %v9306_v19  ;;  %v8971_v5 = vpop.f32.mrb[124].mxu0  ;;  %v9220_v24 = vpop.f32.mrb[124].mxu1  ;;  %v9276_v15 = vld [vmem:[%s14565_s23 + $0x88] sm:$0xff]  ;;  %v9278_v17 = vld [vmem:[%s14565_s23 + $0x98] sm:$0xff] }
 0x6fe   : > { %v10451_v26 = vadd.f32 %v8971_v5, %v14567_v46  ;;  %v10471_v27 = vadd.f32 %v9220_v24, %v14569_v47  ;;  %v8973_v28 = vpop.f32.mrb[125].mxu0  ;;  %v9222_v30 = vpop.f32.mrb[125].mxu1 }
 0x6ff   : > { %v9369_v32 = vmax.f32 %v9359_v20, 0.0  ;;  %v9360_v33 = vmax.f32 %v9340_v21, %v9350_v22  ;;  %v10452_v34 = vadd.f32 %v8973_v28, %v14571_v60  ;;  %v10472_v35 = vadd.f32 %v9222_v30, %v14573_v48  ;;  %v8975_v36 = vpop.f32.mrb[126].mxu0  ;;  %v9224_v38 = vpop.f32.mrb[126].mxu1  ;;  %v9279_v22 = vld [vmem:[%s14565_s23 + $0xa0] sm:$0xff] }
 0x700   : > { %v9307_v41 = vmul.f32 %v10451_v26, %v9267_v23  ;;  %v9309_v42 = vmul.f32 %v10471_v27, %v9269_v25  ;;  %v10453_v44 = vadd.f32 %v8975_v36, %v14567_v46  ;;  %v10473_v45 = vadd.f32 %v9224_v38, %v14569_v47  ;;  %v8977_v49 = vpop.f32.mrb[127].mxu0  ;;  %v9226_v51 = vpop.f32.mrb[127].mxu1  ;;  %v9281_v27 = vld [vmem:[%s14565_s23 + $0xb0] sm:$0xff] }
 0x701   : > { %v9370_v53 = vmax.f32 %v9360_v33, 0.0  ;;  %v9308_v54 = vmul.f32 %v10452_v34, %v9268_v29  ;;  %v9310_v55 = vmul.f32 %v10472_v35, %v9270_v31  ;;  %v10454_v56 = vadd.f32 %v8977_v49, %v14571_v60  ;;  %v9280_v29 = vld [vmem:[%s14565_s23 + $0xa8] sm:$0xff]  ;;  %v9282_v35 = vld [vmem:[%s14565_s23 + $0xb8] sm:$0xff]  ;;  %v9381_v36 = vld [vmem:[%s14702_s6 + $0x10] sm:$0xff] }
 0x702   : > { %v9311_v58 = vmul.f32 %v10453_v44, %v9271_v37  ;;  %v9313_v59 = vmul.f32 %v10473_v45, %v9273_v39  ;;  %v10474_v61 = vadd.f32 %v9226_v51, %v14573_v48  ;;  %v9389_v62 = vmul.f32 %v9379_v40, %v9369_v32  ;;  %v9382_v37 = vld [vmem:[%s14702_s6 + $0x18] sm:$0xff] }
 0x703   : > { %v9341_v63 = vmax.f32 %v9307_v41, %v9308_v54  ;;  %v9351_v0 = vmax.f32 %v9309_v42, %v9310_v55  ;;  %v9312_v1 = vmul.f32 %v10454_v56, %v9272_v50  ;;  %v9390_v2 = vmul.f32 %v9380_v52, %v9370_v53  ;;  %v9283_v55 = vld [vmem:[%s14565_s23 + $0xc0] sm:$0xff] }
 0x704   : > { %v9314_v3 = vmul.f32 %v10474_v61, %v9274_v57  ;;  %v9285_v57 = vld [vmem:[%s14565_s23 + $0xd0] sm:$0xff] }
 0x705   : > { %v9361_v4 = vmax.f32 %v9341_v63, %v9351_v0  ;;  %v9342_v6 = vmax.f32 %v9311_v58, %v9312_v1  ;;  %v8981_v7 = vpop.f32.mrb[128].mxu0  ;;  %v9230_v8 = vpop.f32.mrb[128].mxu1  ;;  %v10427_v10 = vpack.c.bf16 %v9390_v2, %v9389_v62  ;;  %v9284_v63 = vld [vmem:[%s14565_s23 + $0xc8] sm:$0xff]  ;;  %v9286_v1 = vld [vmem:[%s14565_s23 + $0xd8] sm:$0xff] }
 0x706   : > { %v9352_v11 = vmax.f32 %v9313_v59, %v9314_v3  ;;  %v10455_v12 = vadd.f32 %v8981_v7, %v14567_v46  ;;  %v10475_v13 = vadd.f32 %v9230_v8, %v14569_v47  ;;  %v8983_v14 = vpop.f32.mrb[129].mxu0  ;;  %v9232_v16 = vpop.f32.mrb[129].mxu1 }
 0x707   : > { %v9371_v18 = vmax.f32 %v9361_v4, 0.0  ;;  %v10456_v19 = vadd.f32 %v8983_v14, %v14571_v60  ;;  %v10476_v20 = vadd.f32 %v9232_v16, %v14573_v48  ;;  %v8985_v21 = vpop.f32.mrb[130].mxu0  ;;  %v9234_v5 = vpop.f32.mrb[130].mxu1  ;;  %10428 = vmatprep.subr.bf16.mxu0 %v10427_v10 }
 0x708   : > { %v9362_v23 = vmax.f32 %v9342_v6, %v9352_v11  ;;  %v9315_v24 = vmul.f32 %v10455_v12, %v9275_v43  ;;  %v9317_v25 = vmul.f32 %v10475_v13, %v9277_v9  ;;  %v10457_v26 = vadd.f32 %v8985_v21, %v14567_v46  ;;  %v8987_v28 = vpop.f32.mrb[131].mxu0  ;;  %v9236_v30 = vpop.f32.mrb[131].mxu1  ;;  %10430 = vmatpush3.bf16.msra.mxu0 %v10427_v10  ;;  %v9287_v43 = vld [vmem:[%s14565_s23 + $0xe0] sm:$0xff]  ;;  %v9289_v13 = vld [vmem:[%s14565_s23 + $0xf0] sm:$0xff]  ;;  %v9290_v21 = vld [vmem:[%s14565_s23 + $0xf8] sm:$0xff] }
 0x709   : > { %v9316_v31 = vmul.f32 %v10456_v19, %v9276_v15  ;;  %v9318_v32 = vmul.f32 %v10476_v20, %v9278_v17  ;;  %v10477_v33 = vadd.f32 %v9234_v5, %v14569_v47  ;;  %v10458_v34 = vadd.f32 %v8987_v28, %v14571_v60  ;;  %v9288_v15 = vld [vmem:[%s14565_s23 + $0xe8] sm:$0xff] }
 0x70a   : > { %v9372_v38 = vmax.f32 %v9362_v23, 0.0  ;;  %v9319_v39 = vmul.f32 %v10457_v26, %v9279_v22  ;;  %v10478_v40 = vadd.f32 %v9236_v30, %v14573_v48  ;;  %v9391_v50 = vmul.f32 %v9381_v36, %v9371_v18  ;;  %v9383_v22 = vld [vmem:[%s14702_s6 + $0x20] sm:$0xff]  ;;  %v9384_v5 = vld [vmem:[%s14702_s6 + $0x28] sm:$0xff] }
 0x70b   : > { %v9343_v41 = vmax.f32 %v9315_v24, %v9316_v31  ;;  %v9353_v42 = vmax.f32 %v9317_v25, %v9318_v32  ;;  %v9321_v44 = vmul.f32 %v10477_v33, %v9281_v27  ;;  %v9320_v45 = vmul.f32 %v10458_v34, %v9280_v29  ;;  %v9291_v36 = vld [vmem:[%s14565_s23 + $0x100] sm:$0xff] }
 0x70c   : > { %v9322_v49 = vmul.f32 %v10478_v40, %v9282_v35  ;;  %v9392_v51 = vmul.f32 %v9382_v37, %v9372_v38  ;;  %v9293_v38 = vld [vmem:[%s14565_s23 + $0x110] sm:$0xff] }
 0x70d   : > { %v9363_v52 = vmax.f32 %v9343_v41, %v9353_v42  ;;  %v9344_v53 = vmax.f32 %v9319_v39, %v9320_v45  ;;  %v8991_v54 = vpop.f32.mrb[132].mxu0  ;;  %v9240_v56 = vpop.f32.mrb[132].mxu1 }
 0x70e   : > { %v9354_v58 = vmax.f32 %v9321_v44, %v9322_v49  ;;  %v10459_v59 = vadd.f32 %v8991_v54, %v14567_v46  ;;  %v10479_v61 = vadd.f32 %v9240_v56, %v14569_v47  ;;  %v8993_v62 = vpop.f32.mrb[133].mxu0  ;;  %v9242_v0 = vpop.f32.mrb[133].mxu1  ;;  %v10431_v2 = vpack.c.bf16 %v9392_v51, %v9391_v50  ;;  %v9292_v44 = vld [vmem:[%s14565_s23 + $0x108] sm:$0xff]  ;;  %v9294_v49 = vld [vmem:[%s14565_s23 + $0x118] sm:$0xff] }
 0x70f   : > { %v9373_v3 = vmax.f32 %v9363_v52, 0.0  ;;  %v10460_v4 = vadd.f32 %v8993_v62, %v14571_v60  ;;  %v10480_v6 = vadd.f32 %v9242_v0, %v14573_v48  ;;  %v8995_v7 = vpop.f32.mrb[134].mxu0  ;;  %v9244_v8 = vpop.f32.mrb[134].mxu1  ;;  %v9297_v62 = vld [vmem:[%s14565_s23 + $0x130] sm:$0xff]  ;;  %v9296_v0 = vld [vmem:[%s14565_s23 + $0x128] sm:$0xff] }
 0x710   : > { %v9364_v9 = vmax.f32 %v9344_v53, %v9354_v58  ;;  %v9323_v10 = vmul.f32 %v10459_v59, %v9283_v55  ;;  %v9325_v11 = vmul.f32 %v10479_v61, %v9285_v57  ;;  %v10461_v12 = vadd.f32 %v8995_v7, %v14567_v46  ;;  %10432 = vmatprep.subr.bf16.mxu0 %v10431_v2  ;;  %v8997_v14 = vpop.f32.mrb[135].mxu0  ;;  %v9246_v16 = vpop.f32.mrb[135].mxu1  ;;  %v9295_v55 = vld [vmem:[%s14565_s23 + $0x120] sm:$0xff]  ;;  %v9298_v7 = vld [vmem:[%s14565_s23 + $0x138] sm:$0xff] }
 0x711   : > { %v9324_v17 = vmul.f32 %v10460_v4, %v9284_v63  ;;  %v9326_v18 = vmul.f32 %v10480_v6, %v9286_v1  ;;  %v10481_v19 = vadd.f32 %v9244_v8, %v14569_v47  ;;  %v10462_v20 = vadd.f32 %v8997_v14, %v14571_v60  ;;  %10434 = vmatpush3.bf16.msra.mxu0 %v10431_v2 }
 0x712   : > { %v9374_v23 = vmax.f32 %v9364_v9, 0.0  ;;  %v9327_v24 = vmul.f32 %v10461_v12, %v9287_v43  ;;  %v10482_v25 = vadd.f32 %v9246_v16, %v14573_v48  ;;  %v9393_v31 = vmul.f32 %v9383_v22, %v9373_v3  ;;  %v9385_v43 = vld [vmem:[%s14702_s6 + $0x30] sm:$0xff]  ;;  %v9387_v22 = vld [vmem:[%s14702_s6 + $0x40] sm:$0xff] }
 0x713   : > { %v9345_v26 = vmax.f32 %v9323_v10, %v9324_v17  ;;  %v9355_v27 = vmax.f32 %v9325_v11, %v9326_v18  ;;  %v9329_v28 = vmul.f32 %v10481_v19, %v9289_v13  ;;  %v9328_v29 = vmul.f32 %v10462_v20, %v9288_v15 }
 0x714   : > { %v9330_v30 = vmul.f32 %v10482_v25, %v9290_v21  ;;  %v9394_v32 = vmul.f32 %v9384_v5, %v9374_v23 }
 0x715   : > { %v9365_v33 = vmax.f32 %v9345_v26, %v9355_v27  ;;  %v9346_v34 = vmax.f32 %v9327_v24, %v9328_v29  ;;  %v9001_v35 = vpop.f32.mrb[136].mxu0  ;;  %v9250_v37 = vpop.f32.mrb[136].mxu1  ;;  %v9400_v26 = vld [vmem:[%s14703_s7 + $0x8] sm:$0xff]  ;;  %v10388_v29 = vld [vmem:[#allocation3] ss:$0 sm:$0xff] }
 0x716   : > { %v9356_v39 = vmax.f32 %v9329_v28, %v9330_v30  ;;  %v10463_v40 = vadd.f32 %v9001_v35, %v14567_v46  ;;  %v10483_v41 = vadd.f32 %v9250_v37, %v14569_v47  ;;  %v9003_v42 = vpop.f32.mrb[137].mxu0  ;;  %v9252_v45 = vpop.f32.mrb[137].mxu1  ;;  %v10435_v50 = vpack.c.bf16 %v9394_v32, %v9393_v31 }
 0x717   : > { %v9375_v51 = vmax.f32 %v9365_v33, 0.0  ;;  %v10464_v52 = vadd.f32 %v9003_v42, %v14571_v60  ;;  %v10484_v53 = vadd.f32 %v9252_v45, %v14573_v48  ;;  %v9005_v54 = vpop.f32.mrb[138].mxu0  ;;  %v9254_v56 = vpop.f32.mrb[138].mxu1 }
 0x718   : > { %v9366_v57 = vmax.f32 %v9346_v34, %v9356_v39  ;;  %v9331_v58 = vmul.f32 %v10463_v40, %v9291_v36  ;;  %v9333_v59 = vmul.f32 %v10483_v41, %v9293_v38  ;;  %v10465_v61 = vadd.f32 %v9005_v54, %v14567_v46  ;;  %10436 = vmatprep.subr.bf16.mxu0 %v10435_v50  ;;  %v9007_v63 = vpop.f32.mrb[139].mxu0  ;;  %v9256_v1 = vpop.f32.mrb[139].mxu1  ;;  %v9386_v46 = vld [vmem:[%s14702_s6 + $0x38] sm:$0xff] }
 0x719   : > { %v9332_v2 = vmul.f32 %v10464_v52, %v9292_v44  ;;  %v9334_v3 = vmul.f32 %v10484_v53, %v9294_v49  ;;  %v10485_v4 = vadd.f32 %v9254_v56, %v14569_v47  ;;  %v10466_v6 = vadd.f32 %v9007_v63, %v14571_v60  ;;  %10438 = vmatpush3.bf16.msra.mxu0 %v10435_v50 }
 0x71a   : > { %v9376_v8 = vmax.f32 %v9366_v57, 0.0  ;;  %v9335_v9 = vmul.f32 %v10465_v61, %v9295_v55  ;;  %v10486_v10 = vadd.f32 %v9256_v1, %v14573_v48  ;;  %v9395_v60 = vmul.f32 %v9385_v43, %v9375_v51  ;;  %v9388_v48 = vld [vmem:[%s14702_s6 + $0x48] sm:$0xff] }
 0x71b   : > { %v9347_v11 = vmax.f32 %v9331_v58, %v9332_v2  ;;  %v9357_v12 = vmax.f32 %v9333_v59, %v9334_v3  ;;  %v9337_v13 = vmul.f32 %v10485_v4, %v9297_v62  ;;  %v9336_v47 = vmul.f32 %v10466_v6, %v9296_v0 }
 0x71c   : > { %v9338_v14 = vmul.f32 %v10486_v10, %v9298_v7  ;;  %v9396_v15 = vmul.f32 %v9386_v46, %v9376_v8 }
 0x71d   : > { %v9367_v16 = vmax.f32 %v9347_v11, %v9357_v12  ;;  %v9348_v17 = vmax.f32 %v9335_v9, %v9336_v47 }
 0x71e   : > { %v9358_v18 = vmax.f32 %v9337_v13, %v9338_v14  ;;  %v10439_v19 = vpack.c.bf16 %v9396_v15, %v9395_v60 }
 0x71f   : > { %v9377_v20 = vmax.f32 %v9367_v16, 0.0 }
 0x720   : > { %v9368_v21 = vmax.f32 %v9348_v17, %v9358_v18  ;;  %10440 = vmatprep.subr.bf16.mxu0 %v10439_v19 }
 0x721   : > { %10442 = vmatpush3.bf16.msra.mxu0 %v10439_v19  ;;  %v9397_v23 = vmul.f32 %v9387_v22, %v9377_v20 }
 0x722   : > { %v9378_v5 = vmax.f32 %v9368_v21, 0.0 }
 0x724   : > { %v9398_v24 = vmul.f32 %v9388_v48, %v9378_v5 }
 0x726   : > { %v10443_v25 = vpack.c.bf16 %v9398_v24, %v9397_v23 }
 0x728   : > { %10444 = vmatprep.subr.bf16.mxu0 %v10443_v25 }
 0x729   : > { %10446 = vmatpush3.bf16.msra.mxu0 %v10443_v25 }
 0x72c   : > { %10425 = vmatmul.mubr.msk.f32.vlgmr.msra.gmra.mrb[140].mxu0 %vm9401_vm2, %v9400_v26 }
 0x7ff   : > { %v10426_v27 = vpop.f32.mrb[140].mxu0 }
 0x800   : > { %v9474_v28 = vpop.f32.mrb[141].mxu0 }
 0x801   : > { %9483 = vadd.xlane.f32.xlu0 %v9474_v28 }
 0x805   : > { %9485 = vadd.xlane.f32.xlu0 %v10426_v27 }
 0x88e   : > { %v9484_v30 = vpop.xlane.xlu0 %9483 }
 0x88f   : > { %v9494_v31 = vadd.f32 %v10388_v29, %v9484_v30 }
 0x891   : > { %v9496_v32 = vsub.f32 0.0, %v9494_v31 }
 0x892   : > { %v9486_v33 = vpop.xlane.xlu0 %9485 }
 0x893   : > { %v9498_v34 = vmul.f32 1.442695, %v9496_v32  ;;  %v9495_v35 = vadd.f32 %v10388_v29, %v9486_v33 }
 0x895   : > { %12621 = vpow2.f32 %v9498_v34  ;;  %v9497_v36 = vsub.f32 0.0, %v9495_v35 }
 0x897   : > { %v9500_v37 = vmul.f32 1.442695, %v9497_v36 }
 0x899   : > { %12623 = vpow2.f32 %v9500_v37 }
 0x89f   : > { %v12622_v38 = vpop.eup %12621 }
 0x8a0   : > { %v9502_v39 = vadd.f32 1.0, %v12622_v38 }
 0x8a2   : > { %12625 = vrcp.f32 %v9502_v39 }
 0x8a3   : > { %v12624_v40 = vpop.eup %12623 }
 0x8a4   : > { %v9503_v41 = vadd.f32 1.0, %v12624_v40 }
 0x8a6   : > { %12627 = vrcp.f32 %v9503_v41 }
 0x8ac   : > { %v12626_v42 = vpop.eup %12625 }
 0x8ad   : > { %9509 = vst.msk [vmem:[%s364_s10] sm:$0xff] %vm9508_vm3, %v12626_v42 }
 0x8b0   : > { %v12628_v44 = vpop.eup %12627 }
 0x8b1   : > { %9510 = vst.msk [vmem:[%s364_s10 + $0x8] sm:$0xff] %vm9508_vm3, %v12628_v44 }
 0x8b2 PF: > { %s21_s11 = sadd.s32 1, %s12636_s11  }
 0x8b3   : > { %p18_p6 = scmp.ge.s32.totalorder %s21_s11, 4  }
 0x8b5   :  { %20 = sbr.rel (!%p18_p6) target bundleno = 3 (0x3), region = 148 }

</bundles_post_ra>
